<compile_context>
chip_gen: v7x
topology: tpu7x:2x2x1
jax: 0.10.0
libtpu: 0.0.40
codegen_flags: <defaults>
</compile_context>

<pallas_src>
import jax
import jax.numpy as jnp
from jax import lax
from jax.experimental import pallas as pl
from jax.experimental.pallas import tpu as pltpu


def upsample_conv_prelu_kernel(x_ref, w_ref, b_ref, alpha_ref, o_ref,
                               xpad_scr, patch_scr):
    """Fused 3x3 SAME conv + bias + PReLU for one batch element.

    x_ref:     (1, H, W, Cin)    unpadded NHWC input tile (VMEM, bf16)
    w_ref:     (K_pad, Cout)     im2col weights, rows (dy*3+dx)*Cin+ci (bf16)
    b_ref:     (1, Cout)         bias (VMEM, f32)
    alpha_ref: (1, 1)            PReLU slope (SMEM scalar, f32)
    o_ref:     (1, H*W, Cout)    conv+PReLU output slab (VMEM, f32)
    xpad_scr:  (H+2, W+2, Cin)   zero-padded input scratch (bf16)
    patch_scr: (H*W, K_pad)      im2col patch slab scratch (bf16)
    """
    _, H, W, cin = x_ref.shape
    HW, K_pad = patch_scr.shape
    K = 9 * cin

    # Zero only the halo border (interior is fully overwritten below) and the
    # padded tail of the contraction dim. Done every step so a megacore-split
    # "parallel" batch axis stays correct (per-core scratch, no stale state).
    zero_row = jnp.zeros((1, W + 2, cin), xpad_scr.dtype)
    xpad_scr[0:1, :, :] = zero_row
    xpad_scr[H + 1:H + 2, :, :] = zero_row
    zero_col = jnp.zeros((H, 1, cin), xpad_scr.dtype)
    xpad_scr[1:H + 1, 0:1, :] = zero_col
    xpad_scr[1:H + 1, W + 1:W + 2, :] = zero_col
    if K_pad > K:  # static (only when 9*Cin is padded up toward 128)
        patch_scr[:, K:] = jnp.zeros((HW, K_pad - K), patch_scr.dtype)

    # In-kernel padding: copy the interior; border stays zero.
    xpad_scr[1:H + 1, 1:W + 1, :] = x_ref[0]

    # im2col: 9 shifted windows -> one (H*W, 9*Cin) lane-dense slab.
    for dy in range(3):
        for dx in range(3):
            t = dy * 3 + dx
            patch_scr[:, t * cin:(t + 1) * cin] = (
                xpad_scr[dy:dy + H, dx:dx + W, :].reshape(HW, cin))

    # Single MXU matmul over the full contraction dim, f32 accumulation.
    acc = jnp.dot(patch_scr[...], w_ref[...],
                  preferred_element_type=jnp.float32)

    # Epilogue in f32: bias + shared-alpha PReLU.
    acc = acc + b_ref[...]
    alpha = alpha_ref[0, 0]
    acc = jnp.where(acc > 0, acc, alpha * acc)

    o_ref[...] = acc.reshape(o_ref.shape).astype(o_ref.dtype)


def upsample_block(x_nchw, w_hwio, bias, alpha, *, scale_factor=2):
    """x_nchw: (N, Cin, H, W) -> (N, Cin, H*r, W*r), matching PyTorch."""
    N, Cin, H, W = x_nchw.shape
    r = scale_factor
    Cout = Cin * r * r
    assert w_hwio.shape == (3, 3, Cin, Cout)

    K = 9 * Cin
    # Pad the contraction dim toward 128 when Cin is small (keep multiples of
    # 16 for bf16 sublane packing otherwise).
    K_pad = max(128, ((K + 15) // 16) * 16)

    # Layout glue (single XLA pass each): NCHW -> NHWC + bf16 cast; weights
    # reshaped to im2col layout and zero-padded along K.
    x_nhwc = jnp.transpose(x_nchw, (0, 2, 3, 1)).astype(jnp.bfloat16)
    w2d = w_hwio.reshape(K, Cout).astype(jnp.bfloat16)
    if K_pad > K:
        w2d = jnp.pad(w2d, ((0, K_pad - K), (0, 0)))
    bias2d = bias.reshape(1, Cout).astype(jnp.float32)
    alpha2d = jnp.asarray(alpha, jnp.float32).reshape(1, 1)

    conv_out = pl.pallas_call(
        upsample_conv_prelu_kernel,
        out_shape=jax.ShapeDtypeStruct((N, H * W, Cout), jnp.float32),
        grid_spec=pltpu.PrefetchScalarGridSpec(
            num_scalar_prefetch=0,
            grid=(N,),
            in_specs=[
                pl.BlockSpec((1, H, W, Cin), lambda n: (n, 0, 0, 0)),
                pl.BlockSpec((K_pad, Cout), lambda n: (0, 0)),
                pl.BlockSpec((1, Cout), lambda n: (0, 0)),
                pl.BlockSpec(memory_space=pltpu.MemorySpace.SMEM),
            ],
            out_specs=pl.BlockSpec((1, H * W, Cout), lambda n: (n, 0, 0)),
            scratch_shapes=[
                pltpu.VMEM((H + 2, W + 2, Cin), jnp.bfloat16),
                pltpu.VMEM((H * W, K_pad), jnp.bfloat16),
            ],
        ),
        compiler_params=pltpu.CompilerParams(
            dimension_semantics=("parallel",),
            vmem_limit_bytes=64 * 1024 * 1024,
        ),
    )(x_nhwc, w2d, bias2d, alpha2d)

    # Pixel shuffle (pure rearrangement) + NCHW conversion, one XLA pass:
    # conv_out[n, h*W+w, c*r*r + i*r + j] -> out[n, c, h*r + i, w*r + j]
    ps = conv_out.reshape(N, H, W, Cin, r, r)
    ps = jnp.transpose(ps, (0, 3, 1, 4, 2, 5))        # (N, Cin, H, r, W, r)
    return ps.reshape(N, Cin, H * r, W * r)


def _reference(x_nchw, w_hwio, bias, alpha, *, scale_factor=2):
    """Plain-JAX reference (conv -> pixel shuffle -> PReLU) for validation.

    Uses the same bf16-rounded activations/weights as the kernel so only
    accumulation-order differences remain.
    """
    N, Cin, H, W = x_nchw.shape
    r = scale_factor
    xb = x_nchw.astype(jnp.bfloat16).astype(jnp.float32)
    wb = w_hwio.astype(jnp.bfloat16).astype(jnp.float32)
    x_nhwc = jnp.transpose(xb, (0, 2, 3, 1))
    y = lax.conv_general_dilated(
        x_nhwc, wb, window_strides=(1, 1), padding="SAME",
        dimension_numbers=("NHWC", "HWIO", "NHWC"),
        precision=lax.Precision.HIGHEST,
    ) + bias.reshape(1, 1, 1, -1).astype(jnp.float32)
    y = y.reshape(N, H, W, Cin, r, r)
    y = jnp.transpose(y, (0, 3, 1, 4, 2, 5)).reshape(N, Cin, H * r, W * r)
    return jnp.where(y > 0, y, jnp.float32(alpha) * y)


if __name__ == "__main__":
    key = jax.random.PRNGKey(0)
    N, Cin, H, W = 2, 4, 16, 16
    r = 2
    Cout = Cin * r * r

    kx, kw, kb = jax.random.split(key, 3)
    x = jax.random.normal(kx, (N, Cin, H, W), jnp.float32)
    # Deterministic "init": conv weight in HWIO layout, bias, PReLU alpha=0.25.
    w_hwio = jax.random.normal(kw, (3, 3, Cin, Cout), jnp.float32) * 0.1
    bias = jax.random.normal(kb, (Cout,), jnp.float32) * 0.1
    alpha = jnp.float32(0.25)

    out = upsample_block(x, w_hwio, bias, alpha, scale_factor=r)
    out = jax.block_until_ready(out)

    ref = _reference(x, w_hwio, bias, alpha, scale_factor=r)
    assert out.shape == (N, Cin, H * r, W * r)
    assert jnp.allclose(out, ref, atol=2e-3, rtol=2e-3), (
        float(jnp.max(jnp.abs(out - ref))))
    print("KERNEL_OK")
</pallas_src>

<mosaic_0001>
module attributes {stable_mosaic.version = 11 : i64} {
  func.func @upsample_conv_prelu_kernel(%arg0: i32, %arg1: memref<1x16x16x4xbf16, #tpu.memory_space<vmem>>, %arg2: memref<128x16xbf16, #tpu.memory_space<vmem>>, %arg3: memref<1x16xf32, #tpu.memory_space<vmem>>, %arg4: memref<1x1xf32, #tpu.memory_space<smem>>, %arg5: memref<1x256x16xf32, #tpu.memory_space<vmem>>, %arg6: memref<18x18x4xbf16, #tpu.memory_space<vmem>>, %arg7: memref<256x128xbf16, #tpu.memory_space<vmem>>) attributes {dimension_semantics = [#tpu.dimension_semantics<parallel>], iteration_bounds = array<i64: 2>, scalar_prefetch = 0 : i64, scratch_operands = 2 : i64, tpu.core_type = #tpu.core_type<tc>, window_params = [{transform_indices = @transform_0, window_bounds = array<i64: 1, 16, 16, 4>}, {pipeline_mode = #tpu.pipeline_mode<synchronous>, transform_indices = @transform_1, window_bounds = array<i64: 128, 16>}, {pipeline_mode = #tpu.pipeline_mode<synchronous>, transform_indices = @transform_2, window_bounds = array<i64: 1, 16>}, {transform_indices = @transform_3, window_bounds = array<i64: 1, 1>}, {transform_indices = @transform_4, window_bounds = array<i64: 1, 256, 16>}]} {
    %cst = arith.constant 0.000000e+00 : bf16
    %0 = vector.broadcast %cst : bf16 to vector<1x18x4xbf16>
    %c0 = arith.constant 0 : index
    %c0_0 = arith.constant 0 : index
    %c0_1 = arith.constant 0 : index
    %1 = vector.load %arg6[%c0, %c0_0, %c0_1] : memref<18x18x4xbf16, #tpu.memory_space<vmem>>, vector<1x18x4xbf16>
    tpu.vector_store %arg6[%c0, %c0_0, %c0_1], %0 {strides = array<i32>} : memref<18x18x4xbf16, #tpu.memory_space<vmem>>, vector<1x18x4xbf16>,
    %c17 = arith.constant 17 : index
    %c0_2 = arith.constant 0 : index
    %c0_3 = arith.constant 0 : index
    %2 = vector.load %arg6[%c17, %c0_2, %c0_3] : memref<18x18x4xbf16, #tpu.memory_space<vmem>>, vector<1x18x4xbf16>
    tpu.vector_store %arg6[%c17, %c0_2, %c0_3], %0 {strides = array<i32>} : memref<18x18x4xbf16, #tpu.memory_space<vmem>>, vector<1x18x4xbf16>,
    %cst_4 = arith.constant 0.000000e+00 : bf16
    %3 = vector.broadcast %cst_4 : bf16 to vector<16x1x4xbf16>
    %c1 = arith.constant 1 : index
    %c0_5 = arith.constant 0 : index
    %c0_6 = arith.constant 0 : index
    %4 = vector.load %arg6[%c1, %c0_5, %c0_6] : memref<18x18x4xbf16, #tpu.memory_space<vmem>>, vector<16x1x4xbf16>
    tpu.vector_store %arg6[%c1, %c0_5, %c0_6], %3 {strides = array<i32>} : memref<18x18x4xbf16, #tpu.memory_space<vmem>>, vector<16x1x4xbf16>,
    %c1_7 = arith.constant 1 : index
    %c17_8 = arith.constant 17 : index
    %c0_9 = arith.constant 0 : index
    %5 = vector.load %arg6[%c1_7, %c17_8, %c0_9] : memref<18x18x4xbf16, #tpu.memory_space<vmem>>, vector<16x1x4xbf16>
    tpu.vector_store %arg6[%c1_7, %c17_8, %c0_9], %3 {strides = array<i32>} : memref<18x18x4xbf16, #tpu.memory_space<vmem>>, vector<16x1x4xbf16>,
    %cst_10 = arith.constant 0.000000e+00 : bf16
    %6 = vector.broadcast %cst_10 : bf16 to vector<256x92xbf16>
    %c0_11 = arith.constant 0 : index
    %c36 = arith.constant 36 : index
    %7 = vector.load %arg7[%c0_11, %c36] : memref<256x128xbf16, #tpu.memory_space<vmem>>, vector<256x92xbf16>
    tpu.vector_store %arg7[%c0_11, %c36], %6 {strides = array<i32>} : memref<256x128xbf16, #tpu.memory_space<vmem>>, vector<256x92xbf16>,
    %c0_12 = arith.constant 0 : index
    %c0_13 = arith.constant 0 : index
    %c0_14 = arith.constant 0 : index
    %c0_15 = arith.constant 0 : index
    %8 = vector.load %arg1[%c0_12, %c0_13, %c0_14, %c0_15] : memref<1x16x16x4xbf16, #tpu.memory_space<vmem>>, vector<1x16x16x4xbf16>
    %9 = vector.shape_cast %8 : vector<1x16x16x4xbf16> to vector<16x16x4xbf16>
    %c1_16 = arith.constant 1 : index
    %c1_17 = arith.constant 1 : index
    %c0_18 = arith.constant 0 : index
    %10 = vector.load %arg6[%c1_16, %c1_17, %c0_18] : memref<18x18x4xbf16, #tpu.memory_space<vmem>>, vector<16x16x4xbf16>
    tpu.vector_store %arg6[%c1_16, %c1_17, %c0_18], %9 {strides = array<i32>} : memref<18x18x4xbf16, #tpu.memory_space<vmem>>, vector<16x16x4xbf16>,
    %c0_19 = arith.constant 0 : index
    %c0_20 = arith.constant 0 : index
    %c0_21 = arith.constant 0 : index
    %11 = vector.load %arg6[%c0_19, %c0_20, %c0_21] : memref<18x18x4xbf16, #tpu.memory_space<vmem>>, vector<16x16x4xbf16>
    %12 = vector.shape_cast %11 : vector<16x16x4xbf16> to vector<256x4xbf16>
    %c0_22 = arith.constant 0 : index
    %c0_23 = arith.constant 0 : index
    %13 = vector.load %arg7[%c0_22, %c0_23] : memref<256x128xbf16, #tpu.memory_space<vmem>>, vector<256x4xbf16>
    tpu.vector_store %arg7[%c0_22, %c0_23], %12 {strides = array<i32>} : memref<256x128xbf16, #tpu.memory_space<vmem>>, vector<256x4xbf16>,
    %c0_24 = arith.constant 0 : index
    %c1_25 = arith.constant 1 : index
    %c0_26 = arith.constant 0 : index
    %14 = vector.load %arg6[%c0_24, %c1_25, %c0_26] : memref<18x18x4xbf16, #tpu.memory_space<vmem>>, vector<16x16x4xbf16>
    %15 = vector.shape_cast %14 : vector<16x16x4xbf16> to vector<256x4xbf16>
    %c0_27 = arith.constant 0 : index
    %c4 = arith.constant 4 : index
    %16 = vector.load %arg7[%c0_27, %c4] : memref<256x128xbf16, #tpu.memory_space<vmem>>, vector<256x4xbf16>
    tpu.vector_store %arg7[%c0_27, %c4], %15 {strides = array<i32>} : memref<256x128xbf16, #tpu.memory_space<vmem>>, vector<256x4xbf16>,
    %c0_28 = arith.constant 0 : index
    %c2 = arith.constant 2 : index
    %c0_29 = arith.constant 0 : index
    %17 = vector.load %arg6[%c0_28, %c2, %c0_29] : memref<18x18x4xbf16, #tpu.memory_space<vmem>>, vector<16x16x4xbf16>
    %18 = vector.shape_cast %17 : vector<16x16x4xbf16> to vector<256x4xbf16>
    %c0_30 = arith.constant 0 : index
    %c8 = arith.constant 8 : index
    %19 = vector.load %arg7[%c0_30, %c8] : memref<256x128xbf16, #tpu.memory_space<vmem>>, vector<256x4xbf16>
    tpu.vector_store %arg7[%c0_30, %c8], %18 {strides = array<i32>} : memref<256x128xbf16, #tpu.memory_space<vmem>>, vector<256x4xbf16>,
    %c1_31 = arith.constant 1 : index
    %c0_32 = arith.constant 0 : index
    %c0_33 = arith.constant 0 : index
    %20 = vector.load %arg6[%c1_31, %c0_32, %c0_33] : memref<18x18x4xbf16, #tpu.memory_space<vmem>>, vector<16x16x4xbf16>
    %21 = vector.shape_cast %20 : vector<16x16x4xbf16> to vector<256x4xbf16>
    %c0_34 = arith.constant 0 : index
    %c12 = arith.constant 12 : index
    %22 = vector.load %arg7[%c0_34, %c12] : memref<256x128xbf16, #tpu.memory_space<vmem>>, vector<256x4xbf16>
    tpu.vector_store %arg7[%c0_34, %c12], %21 {strides = array<i32>} : memref<256x128xbf16, #tpu.memory_space<vmem>>, vector<256x4xbf16>,
    %c1_35 = arith.constant 1 : index
    %c1_36 = arith.constant 1 : index
    %c0_37 = arith.constant 0 : index
    %23 = vector.load %arg6[%c1_35, %c1_36, %c0_37] : memref<18x18x4xbf16, #tpu.memory_space<vmem>>, vector<16x16x4xbf16>
    %24 = vector.shape_cast %23 : vector<16x16x4xbf16> to vector<256x4xbf16>
    %c0_38 = arith.constant 0 : index
    %c16 = arith.constant 16 : index
    %25 = vector.load %arg7[%c0_38, %c16] : memref<256x128xbf16, #tpu.memory_space<vmem>>, vector<256x4xbf16>
    tpu.vector_store %arg7[%c0_38, %c16], %24 {strides = array<i32>} : memref<256x128xbf16, #tpu.memory_space<vmem>>, vector<256x4xbf16>,
    %c1_39 = arith.constant 1 : index
    %c2_40 = arith.constant 2 : index
    %c0_41 = arith.constant 0 : index
    %26 = vector.load %arg6[%c1_39, %c2_40, %c0_41] : memref<18x18x4xbf16, #tpu.memory_space<vmem>>, vector<16x16x4xbf16>
    %27 = vector.shape_cast %26 : vector<16x16x4xbf16> to vector<256x4xbf16>
    %c0_42 = arith.constant 0 : index
    %c20 = arith.constant 20 : index
    %28 = vector.load %arg7[%c0_42, %c20] : memref<256x128xbf16, #tpu.memory_space<vmem>>, vector<256x4xbf16>
    tpu.vector_store %arg7[%c0_42, %c20], %27 {strides = array<i32>} : memref<256x128xbf16, #tpu.memory_space<vmem>>, vector<256x4xbf16>,
    %c2_43 = arith.constant 2 : index
    %c0_44 = arith.constant 0 : index
    %c0_45 = arith.constant 0 : index
    %29 = vector.load %arg6[%c2_43, %c0_44, %c0_45] : memref<18x18x4xbf16, #tpu.memory_space<vmem>>, vector<16x16x4xbf16>
    %30 = vector.shape_cast %29 : vector<16x16x4xbf16> to vector<256x4xbf16>
    %c0_46 = arith.constant 0 : index
    %c24 = arith.constant 24 : index
    %31 = vector.load %arg7[%c0_46, %c24] : memref<256x128xbf16, #tpu.memory_space<vmem>>, vector<256x4xbf16>
    tpu.vector_store %arg7[%c0_46, %c24], %30 {strides = array<i32>} : memref<256x128xbf16, #tpu.memory_space<vmem>>, vector<256x4xbf16>,
    %c2_47 = arith.constant 2 : index
    %c1_48 = arith.constant 1 : index
    %c0_49 = arith.constant 0 : index
    %32 = vector.load %arg6[%c2_47, %c1_48, %c0_49] : memref<18x18x4xbf16, #tpu.memory_space<vmem>>, vector<16x16x4xbf16>
    %33 = vector.shape_cast %32 : vector<16x16x4xbf16> to vector<256x4xbf16>
    %c0_50 = arith.constant 0 : index
    %c28 = arith.constant 28 : index
    %34 = vector.load %arg7[%c0_50, %c28] : memref<256x128xbf16, #tpu.memory_space<vmem>>, vector<256x4xbf16>
    tpu.vector_store %arg7[%c0_50, %c28], %33 {strides = array<i32>} : memref<256x128xbf16, #tpu.memory_space<vmem>>, vector<256x4xbf16>,
    %c2_51 = arith.constant 2 : index
    %c2_52 = arith.constant 2 : index
    %c0_53 = arith.constant 0 : index
    %35 = vector.load %arg6[%c2_51, %c2_52, %c0_53] : memref<18x18x4xbf16, #tpu.memory_space<vmem>>, vector<16x16x4xbf16>
    %36 = vector.shape_cast %35 : vector<16x16x4xbf16> to vector<256x4xbf16>
    %c0_54 = arith.constant 0 : index
    %c32 = arith.constant 32 : index
    %37 = vector.load %arg7[%c0_54, %c32] : memref<256x128xbf16, #tpu.memory_space<vmem>>, vector<256x4xbf16>
    tpu.vector_store %arg7[%c0_54, %c32], %36 {strides = array<i32>} : memref<256x128xbf16, #tpu.memory_space<vmem>>, vector<256x4xbf16>,
    %c0_55 = arith.constant 0 : index
    %c0_56 = arith.constant 0 : index
    %38 = vector.load %arg7[%c0_55, %c0_56] : memref<256x128xbf16, #tpu.memory_space<vmem>>, vector<256x128xbf16>
    %c0_57 = arith.constant 0 : index
    %c0_58 = arith.constant 0 : index
    %39 = vector.load %arg2[%c0_57, %c0_58] : memref<128x16xbf16, #tpu.memory_space<vmem>>, vector<128x16xbf16>
    %cst_59 = arith.constant dense<0.000000e+00> : vector<256x16xf32>
    %40 = tpu.matmul %38, %39, %cst_59 {dimension_numbers = #tpu.dot_dimension_numbers<[1], [0], [0], [1], [0, 0, 1, 1], [], []>} : vector<256x128xbf16>, vector<128x16xbf16>, vector<256x16xf32> -> vector<256x16xf32>
    %c0_60 = arith.constant 0 : index
    %c0_61 = arith.constant 0 : index
    %41 = vector.load %arg3[%c0_60, %c0_61] : memref<1x16xf32, #tpu.memory_space<vmem>>, vector<1x16xf32>
    %42 = vector.broadcast %41 : vector<1x16xf32> to vector<256x16xf32>
    %43 = arith.addf %40, %42 : vector<256x16xf32>
    %c0_62 = arith.constant 0 : index
    %c0_63 = arith.constant 0 : index
    %44 = memref.load %arg4[%c0_62, %c0_63] : memref<1x1xf32, #tpu.memory_space<smem>>
    %cst_64 = arith.constant 0.000000e+00 : f32
    %45 = vector.broadcast %cst_64 : f32 to vector<256x16xf32>
    %46 = arith.cmpf ogt, %43, %45 : vector<256x16xf32>
    %47 = vector.broadcast %44 : f32 to vector<256x16xf32>
    %48 = arith.mulf %47, %43 : vector<256x16xf32>
    %49 = arith.select %46, %43, %48 : vector<256x16xi1>, vector<256x16xf32>
    %50 = vector.shape_cast %49 : vector<256x16xf32> to vector<1x256x16xf32>
    %c0_65 = arith.constant 0 : index
    %c0_66 = arith.constant 0 : index
    %c0_67 = arith.constant 0 : index
    %51 = vector.load %arg5[%c0_65, %c0_66, %c0_67] : memref<1x256x16xf32, #tpu.memory_space<vmem>>, vector<1x256x16xf32>
    tpu.vector_store %arg5[%c0_65, %c0_66, %c0_67], %50 {strides = array<i32>} : memref<1x256x16xf32, #tpu.memory_space<vmem>>, vector<1x256x16xf32>,
    return
  }
  func.func @transform_0(%arg0: i32) -> (i32, i32, i32, i32) {
    %c0_i32 = arith.constant 0 : i32
    %c0_i32_0 = arith.constant 0 : i32
    %c0_i32_1 = arith.constant 0 : i32
    %c0_i32_2 = arith.constant 0 : i32
    return %arg0, %c0_i32, %c0_i32_0, %c0_i32_1 : i32, i32, i32, i32
  }
  func.func @transform_1(%arg0: i32) -> (i32, i32) {
    %c0_i32 = arith.constant 0 : i32
    %c0_i32_0 = arith.constant 0 : i32
    %c0_i32_1 = arith.constant 0 : i32
    return %c0_i32, %c0_i32_0 : i32, i32
  }
  func.func @transform_2(%arg0: i32) -> (i32, i32) {
    %c0_i32 = arith.constant 0 : i32
    %c0_i32_0 = arith.constant 0 : i32
    %c0_i32_1 = arith.constant 0 : i32
    return %c0_i32, %c0_i32_0 : i32, i32
  }
  func.func @transform_3(%arg0: i32) -> (i32, i32) {
    %c0_i32 = arith.constant 0 : i32
    %c0_i32_0 = arith.constant 0 : i32
    %c0_i32_1 = arith.constant 0 : i32
    return %c0_i32, %c0_i32_0 : i32, i32
  }
  func.func @transform_4(%arg0: i32) -> (i32, i32, i32) {
    %c0_i32 = arith.constant 0 : i32
    %c0_i32_0 = arith.constant 0 : i32
    %c0_i32_1 = arith.constant 0 : i32
    return %arg0, %c0_i32, %c0_i32_0 : i32, i32, i32
  }
}

</mosaic_0001>

<bundles_post_ra>
// kernel: tpu_custom_call.1
= control target key start
LH: loop header
LB: loop body
LE: loop exit
PB: predicated region body
PF: predicated region fallthrough
CT: control target
= control target key end

     0   :  { %s6970_s0 = inlined_call_operand.hbm [shape: bf16[2,16,16,4], index: 0, kind: input, shape index: {}]   ;;  %s6971_s1 = inlined_call_operand.hbm [shape: bf16[128,16], index: 1, kind: input, shape index: {}]   ;;  %s6972_s2 = inlined_call_operand.hbm [shape: f32[1,16], index: 2, kind: input, shape index: {}]   ;;  %s6973_s3 = inlined_call_operand.<no memory space> [shape: f32[1,1], index: 3, kind: input, shape index: {}]   ;;  %s6974_s4 = inlined_call_operand.hbm [shape: f32[2,256,16], index: 4, kind: output, shape index: {}]  }
   0x1   :  { %9 = sst [smem:[#allocation4]] %s6973_s3 }
   0x2   :  { %10 = vsyncpa [#allocation6], 0 }
   0x3   :  { %12 = vsyncpa [#allocation6 + $0x1], 0 }
   0x4   :  { %13 = vsyncpa [#allocation9], 0 }
   0x5   :  { %14 = vsyncpa [#allocation7], 0 }
   0x6   :  { %16 = vsyncpa [#allocation7 + $0x1], 0  ;;  %s5076_s17 = smov 0   ;;  %s5078_s18 = smov 0  }
   0x7   :  { %s5080_s19 = smov 0   ;;  %s5082_s20 = smov 0  }
   0x8 LB: > { %s5097_s3 = sadd.s32 4294967295, %s5030_s20   ;;  %s4430_s21 = sadd.s32 4294967294, %s5030_s20   ;;  %s5030_s20 = sphi %s5082_s20, %s7006_s20   ;;  %s5026_s19 = sphi %s5080_s19, %s7005_s19   ;;  %s5022_s18 = sphi %s5078_s18, %s7004_s18   ;;  %s5018_s17 = sphi %s5076_s17, %s7003_s17  }
   0x9   : > { %p42_p0 = scmp.ne.s32.totalorder %s5022_s18, %s5018_s17  ;;  %p6975_p1 = scmp.eq.s32.totalorder %s5097_s3, 0 }
   0xa   : > { %p135_p3 = scmp.eq.s32.totalorder %s4430_s21, 1  ;;  %p4431_p5 = scmp.ge.s32.totalorder %s5030_s20, 1 }
   0xb   : > { %p5106_p4 = por %p6975_p1, %p42_p0  ;;  %p142_p7 = scmp.lt.s32.totalorder %s5030_s20, 3 }
   0xc   : > { %p5111_p6 = por %p135_p3, %p42_p0  ;;  %s5032_s25 = smov [#allocation8]  }
   0xd   : > { %s6978_s22 = scalar_select %p5106_p4, 1, 0 }
   0xe   : > { %s6979_s23 = scalar_select %p5111_p6, 1, 0 }
   0xf   : > { %p5116_p8 = pnand %p4431_p5, %p142_p7  ;;  %s154_s26 = sshll.u32 %s5032_s25, 4  ;;  %s5120_s26 = int_to_ptr.vmem [resolvable:$true] %s154_s26 }
  0x10   : > { %s5033_s28 = smov [#allocation10]   ;;  %s4874_s6 = scalar_lea.hbm %s6971_s1, 1024 }
  0x11   : > { %p4751_p9 = pneg %p5116_p8  ;;  %s168_s29 = sshll.u32 %s5033_s28, 4  ;;  %s5131_s29 = int_to_ptr.vmem [resolvable:$true] %s168_s29 }
  0x12   : > { %p4875_p12 = scmp.ne.s32.totalorder %s6971_s1, %s4874_s6  ;;  %p4881_p5 = scmp.lt.u32.totalorder %s4874_s6, %s6971_s1 }
  0x13   : > { %p5127_p11 = pnand %p4751_p9, %p6975_p1 }
  0x15   : > { %p4876_p13 = pneg %p5127_p11 }
  0x17   : > { %p4877_p0 = pnand %p4876_p13, %p4875_p12 }
  0x19   : > { %p4878_p3 = pneg %p4877_p0 }
  0x1b   : > { %p4883_p7 = pnand %p4881_p5, %p4878_p3 }
  0x1d   : > { %4886 = shalt.err (!%p4883_p7)
}
  0x1e   : > { %s4887_s11 = scalar_lea.vmem %s5120_s26, 1024  ;;  %p4895_p2 = scmp.lt.s32.totalorder %s5120_s26, %s5120_s26 }
  0x1f   : > { %p4888_p9 = scmp.ne.s32.totalorder %s5120_s26, %s4887_s11  ;;  %p4896_p12 = scmp.lt.s32.totalorder %s4887_s11, %s4887_s11 }
  0x21   : > { %p4890_p10 = pnand %p4888_p9, %p4876_p13  ;;  %p4897_p0 = por %p4896_p12, %p4895_p2 }
  0x23   : > { %p4891_p1 = pneg %p4890_p10 }
  0x25   : > { %p4898_p6 = pnand %p4897_p0, %p4891_p1 }
  0x27   : > { %4901 = shalt.err (!%p4898_p6)
}
  0x28   : > { %s5034_s12 = smov 64   ;;  %s5035_s13 = smov 4  }
  0x29   : > { %4754 = dma.hbm_to_vmem [thread:$0]  (!%p5127_p11), %s6971_s1, 1024, %s5120_s26, [#allocation9], %s5034_s12, %s5034_s12, %s5035_s13  }
  0x2a   : > { %s4902_s25 = scalar_lea.hbm %s6972_s2, 16 }
  0x2b   : > { %p4903_p1 = scmp.ne.s32.totalorder %s6972_s2, %s4902_s25  ;;  %p4909_p10 = scmp.lt.u32.totalorder %s4902_s25, %s6972_s2 }
  0x2d   : > { %p4905_p2 = pnand %p4903_p1, %p4876_p13 }
  0x2f   : > { %p4906_p6 = pneg %p4905_p2 }
  0x31   : > { %p4911_p3 = pnand %p4909_p10, %p4906_p6 }
  0x33   : > { %4914 = shalt.err (!%p4911_p3)
}
  0x34   : > { %s4915_s26 = scalar_lea.vmem %s5131_s29, 16  ;;  %s4922_s7 = scalar_lea.vmem %s5131_s29, 32 }
  0x35   : > { %p4916_p5 = scmp.ne.s32.totalorder %s5131_s29, %s4915_s26  ;;  %p4923_p12 = scmp.lt.s32.totalorder %s5131_s29, %s5131_s29 }
  0x36   : > { %p4924_p0 = scmp.lt.s32.totalorder %s4922_s7, %s4915_s26 }
  0x37   : > { %p4918_p7 = pnand %p4916_p5, %p4876_p13 }
  0x38   : > { %p4925_p1 = por %p4924_p0, %p4923_p12 }
  0x39   : > { %p4919_p9 = pneg %p4918_p7 }
  0x3b   : > { %p4926_p2 = pnand %p4925_p1, %p4919_p9 }
  0x3d   : > { %4929 = shalt.err (!%p4926_p2)
}
  0x3e   : > { %4757 = dma.hbm_to_vmem [thread:$0]  (!%p5127_p11), %s6972_s2, 16, %s5131_s29, [#allocation9]  }
  0x3f   : > { %s5190_s10 = sadd.s32 1, %s5030_s20   ;;  %s29_s27 = sadd.s32 1, %s5026_s19 }
  0x40   : > { %s26_s11 = ssub.s32 %s5030_s20, %s5190_s10  ;;  %p36_p13 = scmp.ne.s32.totalorder %s5026_s19, %s5022_s18 }
  0x41   : > { %p27_p6 = scmp.eq.s32.totalorder %s26_s11, 0  ;;  %p37_p10 = scmp.eq.s32.totalorder %s5030_s20, 0 }
  0x42   : > { %p6982_p3 = scmp.eq.s32.totalorder %s5097_s3, 1  ;;  %p4768_p7 = scmp.lt.s32.totalorder %s5030_s20, 2 }
  0x43   : > { %s5206_s15 = scalar_select %p27_p6, %s5026_s19, %s29_s27  }
  0x44   : > { %p5200_p5 = por %p6982_p3, %p36_p13  ;;  %p38_p9 = por %p37_p10, %p36_p13 }
  0x45   : > { %s182_s16 = sand.u32 1, %s5026_s19   ;;  %s4649_s29 = sshll.u32 %s5030_s20, 11 }
  0x46   : > { %s6983_s14 = scalar_select %p5200_p5, 1, 0 }
  0x47   : > { %s4435_s21 = sshll.u32 %s182_s16, 7  ;;  %s5213_s30 = scalar_lea.hbm %s6970_s0, %s4649_s29 }
  0x48   : > { %s186_s5 = scalar_lea.vmem [#allocation5], %s4435_s21  ;;  %p5217_p11 = pnand %p4768_p7, %p38_p9 }
  0x49   : > { %s193_s6 = sshll.u32 %s186_s5, 4  ;;  %s5221_s7 = scalar_lea.sflag [#allocation6], %s182_s16  ;;  %s5215_s6 = int_to_ptr.vmem [resolvable:$true] %s193_s6 }
  0x4a   : > { %s4930_s8 = scalar_lea.hbm %s5213_s30, 2048  ;;  %p4932_p0 = pneg %p5217_p11 }
  0x4b   : > { %p4931_p12 = scmp.ne.s32.totalorder %s5213_s30, %s4930_s8  ;;  %s4935_s11 = scalar_lea.hbm %s6970_s0, 4096 }
  0x4c   : > { %p4936_p13 = scmp.lt.u32.totalorder %s5213_s30, %s6970_s0  ;;  %p4937_p6 = scmp.lt.u32.totalorder %s4935_s11, %s4930_s8 }
  0x4d   : > { %p4933_p1 = pnand %p4932_p0, %p4931_p12  ;;  %p4939_p3 = scmp.lt.u32.totalorder %s4930_s8, %s5213_s30 }
  0x4e   : > { %p4938_p10 = por %p4937_p6, %p4936_p13 }
  0x4f   : > { %p4934_p2 = pneg %p4933_p1 }
  0x50   : > { %p4940_p7 = por %p4939_p3, %p4938_p10 }
  0x52   : > { %p4941_p9 = pnand %p4940_p7, %p4934_p2 }
  0x54   : > { %4944 = shalt.err (!%p4941_p9)
}
  0x55   : > { %s4945_s16 = scalar_lea.vmem %s5215_s6, 2048  ;;  %s5036_s25 = smov [#allocation5]  }
  0x56   : > { %p4946_p12 = scmp.ne.s32.totalorder %s5215_s6, %s4945_s16  ;;  %s4950_s28 = sshll.u32 %s5036_s25, 4  ;;  %s4951_s28 = int_to_ptr.vmem [resolvable:$false] %s4950_s28 }
  0x57   : > { %s4952_s5 = scalar_lea.vmem %s4951_s28, 4096  ;;  %p4953_p4 = scmp.lt.s32.totalorder %s5215_s6, %s4951_s28 }
  0x58   : > { %p4948_p1 = pnand %p4946_p12, %p4932_p0  ;;  %p4954_p13 = scmp.lt.s32.totalorder %s4952_s5, %s4945_s16 }
  0x5a   : > { %p4949_p5 = pneg %p4948_p1  ;;  %p4955_p6 = por %p4954_p13, %p4953_p4 }
  0x5c   : > { %p4956_p10 = pnand %p4955_p6, %p4949_p5 }
  0x5e   : > { %4959 = shalt.err (!%p4956_p10)
}
  0x5f   : > { %4761 = dma.hbm_to_vmem [thread:$0]  (!%p5217_p11), %s5213_s30, 2048, %s5215_s6, %s5221_s7, %s5034_s12, %s5034_s12, %s5035_s13  }
  0x60   : > { %205 = sbr.rel (%p5116_p8) target bundleno = 865 (0x361), region = 36  ;;  %s5255_s8 = sand.u32 (!%p5116_p8), 1, %s5022_s18  }
  0x61   : > { %s4439_s9 = sshll.u32 (!%p5116_p8), %s5255_s8, 7  ;;  %s208_s27 = scalar_lea.sflag (!%p5116_p8), [#allocation6], %s5255_s8 }
  0x62   : > { %s5259_s11 = scalar_lea.vmem (!%p5116_p8), [#allocation5], %s4439_s9  ;;  %p6985_p4 = scmp.ne.s32.totalorder (!%p5116_p8), %s6978_s22, 0 }
  0x67   : > { %5005 = dma.done.wait (%p6985_p4), %s208_s27, 2048  }
  0x68   : > { %5007 = vsyncadd (%p6985_p4), %s208_s27, 4294965248  ;;  %p6986_p5 = scmp.eq.s32.totalorder %s5097_s3, 0 }
  0x6a   : > { %5009 = dma.done.wait (%p6986_p5), [#allocation9], 1040   ;;  %p6987_p8 = pmov %p6986_p5 }
  0x6b   : > { %vm245_vm0 = vcmask 27648   ;;  %vm248_vm1 = vcmask 24576   ;;  %v5037_v0 = vmov 0   ;;  %vm256_vm2 = vsmask.f32 256  ;;  %s5038_s22 = smov 8  }
  0x6c   : > { %5011 = vsyncadd (%p6987_p8), [#allocation9], 4294966256  ;;  %246 = vst.msk [vmem:[#allocation2] sm:$0xf] %vm245_vm0, %v5037_v0  ;;  %vm1630_vm3 = vcmask 1042432   ;;  %vm1631_vm4 = vcmask 1046532  }
  0x6d   : > { %247 = vst.msk [vmem:[#allocation2 + $0x4] sm:$0xf] %vm245_vm0, %v5037_v0  ;;  %251 = vst.msk [vmem:[#allocation2 + $0xcc] sm:$0xf] %vm245_vm0, %v5037_v0  ;;  %vm306_vm6 = vsmask.f32 7938 }
  0x6e   : > { %249 = vst.msk [vmem:[#allocation2 + $0x8] sm:$0x1] %vm248_vm1, %v5037_v0  ;;  %253 = vst.msk [vmem:[#allocation2 + $0xd4] sm:$0x1] %vm248_vm1, %v5037_v0  ;;  %vm1034_vm7 = vsmask.f32 3328 }
  0x6f   : > { %252 = vst.msk [vmem:[#allocation2 + $0xd0] sm:$0xf] %vm245_vm0, %v5037_v0  ;;  %vm5283_vm5 = vmand %vm248_vm1, %vm256_vm2  ;;  %vm1035_vm8 = vsmask.f32 7440  ;;  %v282_v3 = vld [vmem:[#allocation2 + $0x6c] sm:$0x1] }
  0x70   : > { %vm5287_vm9 = vmor %vm1630_vm3, %vm1631_vm4  ;;  %v389_v4 = vld [vmem:[%s5259_s11 + $0x40] sm:$0xf]  ;;  %vm405_vm10 = vsmask.f32 4368  ;;  %v283_v12 = vsel %vm5283_vm5, 0, %v282_v3  ;;  %s5039_s24 = smov 4  }
  0x71   : > { %284 = vst [vmem:[#allocation2 + $0x6c] sm:$0x1] %v283_v12  ;;  %v390_v21 = vld [vmem:[%s5259_s11 + $0x44] sm:$0xf]  ;;  %v544_v25 = vshrl.u32 %v389_v4, 16  ;;  %v547_v30 = vshll.u32 %v389_v4, 16  ;;  %vm5302_vm11 = vmand %vm245_vm0, %vm306_vm6 }
  0x72   : > { %v258_v26 = vld [vmem:[#allocation2 + $0xc] sm:$0x1]  ;;  %v373_v31 = vld [vmem:[%s5259_s11] sm:$0xf]  ;;  %v374_v37 = vld [vmem:[%s5259_s11 + $0x4] sm:$0xf] }
  0x73   : > { %v1534_v5 = vld [vmem:[#allocation2] sm:$0xe]  ;;  %v546_v36 = vrot.slane %v544_v25, 7  ;;  %vm5309_vm12 = vmor %vm1034_vm7, %vm1035_vm8  ;;  %v552_v40 = vshrl.u32 %v390_v21, 16  ;;  %v555_v41 = vshll.u32 %v390_v21, 16  ;;  %v259_v42 = vsel %vm5283_vm5, 0, %v258_v26 }
  0x74   : > { %v1535_v6 = vld [vmem:[#allocation2 + $0x4] sm:$0xf]  ;;  %v4475_v8 = vrot.slane %v1534_v5, 9  ;;  %v986_v11 = vld [vmem:[#allocation2] sm:$0xf]  ;;  %v408_v46 = vshrl.u32 %v373_v31, 16  ;;  %vm5322_vm13 = vmor %vm256_vm2, %vm405_vm10 }
  0x75   : > { %v1536_v7 = vld [vmem:[#allocation2 + $0x8] sm:$0x1]  ;;  %v1635_v9 = vrot.slane %v1535_v6, 5  ;;  %v987_v13 = vld [vmem:[#allocation2 + $0x4] sm:$0xf]  ;;  %v1038_v15 = vshrl.u32 %v986_v11, 16  ;;  %v549_v44 = vor.u32 %v547_v30, %v546_v36  ;;  %vm5348_vm14 = vmand %vm248_vm1, %vm306_vm6 }
  0x76   : > { %v1638_v10 = vrot.slane %v1536_v7, 5  ;;  %v988_v14 = vld [vmem:[#allocation2 + $0x8] sm:$0x1]  ;;  %v1041_v16 = vshll.u32 %v986_v11, 16  ;;  %v1047_v19 = vshll.u32 %v987_v13, 16  ;;  %v1051_v20 = vshrl.u32 %v987_v13, 16 }
  0x77   : > { %v1636_v17 = vsel %vm5287_vm9, %v4475_v8, %v1635_v9  ;;  %v1637_v18 = vrot.slane %v1635_v9, 4  ;;  %v1040_v22 = vrot.slane %v1038_v15, 4  ;;  %v1057_v24 = vshll.u32 %v988_v14, 16  ;;  %260 = vst [vmem:[#allocation2 + $0xc] sm:$0x1] %v259_v42  ;;  %s5040_s12 = smov 12  }
  0x78   : > { %v1043_v23 = vrot.slane %v1041_v16, 5  ;;  %v1049_v28 = vrot.slane %v1047_v19, 5  ;;  %v1053_v29 = vrot.slane %v1051_v20, 4  ;;  %v550_v45 = vrot.slane %v546_v36, 4  ;;  %v285_v47 = vld [vmem:[#allocation2 + $0x78] sm:$0x1] }
  0x79   : > { %v1639_v27 = vsel %vm5287_vm9, %v1637_v18, %v1638_v10  ;;  %v1059_v35 = vrot.slane %v1057_v24, 5  ;;  %v5316_v49 = vrot.slane %v552_v40, 7  ;;  %v785_v50 = vld [vmem:[#allocation2 + $0x6c] sm:$0xf]  ;;  %v411_v51 = vshll.u32 %v373_v31, 16  ;;  %s5041_s13 = smov 20  }
  0x7a   : > { %v4491_v33 = vcombine.low %v1636_v17, %v1639_v27  ;;  %v1044_v34 = vor.u32 %v1043_v23, %v1040_v22  ;;  %v1054_v39 = vor.u32 %v1053_v29, %v1049_v28  ;;  %v416_v52 = vshrl.u32 %v374_v37, 16  ;;  %v391_v58 = vld [vmem:[%s5259_s11 + $0x48] sm:$0xf]  ;;  %v392_v62 = vld [vmem:[%s5259_s11 + $0x4c] sm:$0xf]  ;;  %s5042_s30 = smov 16  }
  0x7b   : > { %v786_v55 = vsel %vm5302_vm11, %v549_v44, %v785_v50  ;;  %v410_v56 = vrot.slane %v408_v46, 7  ;;  %v419_v57 = vshll.u32 %v374_v37, 16  ;;  %v557_v60 = vor.u32 %v555_v41, %v5316_v49  ;;  %v261_v63 = vld [vmem:[#allocation2 + $0x18] sm:$0x1]  ;;  %v375_v7 = vld [vmem:[%s5259_s11 + $0x8] sm:$0xf] }
  0x7c   : > { %1793 = vrot.lane.b32.xlu0 %v4491_v33, %s5038_s22  ;;  %v1045_v43 = vrot.slane %v1044_v34, 4  ;;  %v1055_v48 = vrot.slane %v1054_v39, 4  ;;  %787 = vst [vmem:[#allocation2 + $0x6c] sm:$0xf] %v786_v55  ;;  %v5332_v61 = vrot.slane %v416_v52, 7  ;;  %v286_v6 = vsel %vm5283_vm5, 0, %v285_v47 }
  0x7d   : > { %v413_v4 = vor.u32 %v411_v51, %v410_v56  ;;  %v414_v5 = vrot.slane %v410_v56, 4  ;;  %v558_v8 = vsel %vm5322_vm13, %v550_v45, %v557_v60  ;;  %287 = vst [vmem:[#allocation2 + $0x78] sm:$0x1] %v286_v6  ;;  %v561_v10 = vshrl.u32 %v391_v58, 16  ;;  %v376_v11 = vld [vmem:[%s5259_s11 + $0xc] sm:$0xf] }
  0x7e   : > { %v1050_v53 = vsel %vm5309_vm12, %v1045_v43, %v1049_v28  ;;  %v1060_v59 = vsel %vm5309_vm12, %v1055_v48, %v1059_v35  ;;  %v421_v9 = vor.u32 %v419_v57, %v5332_v61  ;;  %v279_v12 = vld [vmem:[#allocation2 + $0x60] sm:$0x1]  ;;  %788 = vst.msk [vmem:[#allocation2 + $0x70] sm:$0xf] %vm245_vm0, %v558_v8  ;;  %v564_v13 = vshll.u32 %v391_v58, 16  ;;  %s5043_s6 = smov 24  }
  0x7f   : > { %v4459_v3 = vcombine.low %v1050_v53, %v1060_v59  ;;  %v569_v14 = vshrl.u32 %v392_v62, 16  ;;  %v572_v15 = vshll.u32 %v392_v62, 16  ;;  %v262_v16 = vsel %vm5283_vm5, 0, %v261_v63  ;;  %v329_v17 = vld [vmem:[#allocation2 + $0x68] sm:$0x1]  ;;  %s5044_s26 = smov 28  }
  0x80   : > { %v422_v19 = vsel %vm5322_vm13, %v414_v5, %v421_v9  ;;  %v729_v20 = vld [vmem:[#allocation2 + $0xc] sm:$0xf]  ;;  %v563_v21 = vrot.slane %v561_v10, 7  ;;  %263 = vst [vmem:[#allocation2 + $0x18] sm:$0x1] %v262_v16  ;;  %v425_v22 = vshrl.u32 %v375_v7, 16 }
  0x81   : > { %1469 = vrot.lane.b32.xlu0 %v4459_v3, %s5039_s24  ;;  %v428_v23 = vshll.u32 %v375_v7, 16  ;;  %v730_v24 = vsel %vm5302_vm11, %v413_v4, %v729_v20  ;;  %732 = vst.msk [vmem:[#allocation2 + $0x10] sm:$0xf] %vm245_vm0, %v422_v19  ;;  %v5357_v25 = vrot.slane %v569_v14, 7  ;;  %v433_v26 = vshrl.u32 %v376_v11, 16  ;;  %s5045_s7 = smov 32  }
  0x82   : > { %v436_v27 = vshll.u32 %v376_v11, 16  ;;  %v387_v28 = vld [vmem:[%s5259_s11 + $0x38] sm:$0xf]  ;;  %731 = vst [vmem:[#allocation2 + $0xc] sm:$0xf] %v730_v24  ;;  %v566_v29 = vor.u32 %v564_v13, %v563_v21  ;;  %v567_v30 = vrot.slane %v563_v21, 4 }
  0x83   : > { %v427_v31 = vrot.slane %v425_v22, 7  ;;  %v280_v33 = vsel %vm5283_vm5, 0, %v279_v12  ;;  %v388_v34 = vld [vmem:[%s5259_s11 + $0x3c] sm:$0xf]  ;;  %v574_v35 = vor.u32 %v572_v15, %v5357_v25  ;;  %v5364_v36 = vrot.slane %v433_v26, 7  ;;  %s4193_s21 = sld [smem:[#allocation4]] }
  0x84   : > { %281 = vst [vmem:[#allocation2 + $0x60] sm:$0x1] %v280_v33  ;;  %v330_v37 = vsel %vm5348_vm14, 0, %v329_v17  ;;  %v308_v39 = vld [vmem:[#allocation2 + $0x14] sm:$0x1]  ;;  %v527_v42 = vshrl.u32 %v387_v28, 16 }
  0x85   : > { %v430_v40 = vor.u32 %v428_v23, %v427_v31  ;;  %v431_v41 = vrot.slane %v427_v31, 4  ;;  %331 = vst [vmem:[#allocation2 + $0x68] sm:$0x1] %v330_v37  ;;  %v530_v43 = vshll.u32 %v387_v28, 16  ;;  %v332_v44 = vld [vmem:[#allocation2 + $0x74] sm:$0x1]  ;;  %v575_v46 = vsel %vm5322_vm13, %v567_v30, %v574_v35 }
  0x86   : > { %v559_v45 = vrot.slane %v5316_v49, 4  ;;  %v792_v47 = vld [vmem:[#allocation2 + $0x78] sm:$0xf]  ;;  %v438_v48 = vor.u32 %v436_v27, %v5364_v36  ;;  %v535_v50 = vshrl.u32 %v388_v34, 16  ;;  %v4818_v51 = vld [vmem:[#allocation2 + $0x6c] sm:$0xff]   ;;  %v529_v53 = vrot.slane %v527_v42, 7 }
  0x87   : > { %v793_v52 = vsel %vm5302_vm11, %v566_v29, %v792_v47  ;;  %795 = vst.msk [vmem:[#allocation2 + $0x7c] sm:$0xf] %vm245_vm0, %v575_v46  ;;  %v538_v55 = vshll.u32 %v388_v34, 16  ;;  %v309_v56 = vsel %vm5348_vm14, 0, %v308_v39  ;;  %v5377_v57 = vld [vmem:[#allocation2 + $0x6c] sm:$0xe]  ;;  %1986 = vrot.lane.b32.xlu1 %v4818_v51, %s5040_s12 }
  0x88   : > { %794 = vst [vmem:[#allocation2 + $0x78] sm:$0xf] %v793_v52  ;;  %v439_v58 = vsel %vm5322_vm13, %v431_v41, %v438_v48  ;;  %v736_v59 = vld [vmem:[#allocation2 + $0x18] sm:$0xf]  ;;  %v537_v60 = vrot.slane %v535_v50, 7  ;;  %v333_v62 = vsel %vm5348_vm14, 0, %v332_v44  ;;  %v532_v6 = vor.u32 %v530_v43, %v529_v53 }
  0x89   : > { %310 = vst [vmem:[#allocation2 + $0x14] sm:$0x1] %v309_v56  ;;  %v5383_v63 = vld [vmem:[#allocation2 + $0x70] sm:$0xf]  ;;  %v5385_v3 = vld [vmem:[#allocation2 + $0x6c] sm:$0xe]  ;;  %v737_v5 = vsel %vm5302_vm11, %v430_v40, %v736_v59 }
  0x8a   : > { %v423_v4 = vrot.slane %v5332_v61, 4  ;;  %739 = vst.msk [vmem:[#allocation2 + $0x1c] sm:$0xf] %vm245_vm0, %v439_v58  ;;  %v533_v7 = vrot.slane %v529_v53, 4  ;;  %v1538_v8 = vld [vmem:[#allocation2 + $0x10] sm:$0xf]  ;;  %v540_v10 = vor.u32 %v538_v55, %v537_v60 }
  0x8b   : > { %334 = vst [vmem:[#allocation2 + $0x74] sm:$0x1] %v333_v62  ;;  %v4819_v9 = vld [vmem:[#allocation2 + $0xc] sm:$0xff]   ;;  %738 = vst [vmem:[#allocation2 + $0x18] sm:$0xf] %v737_v5  ;;  %v542_v11 = vrot.slane %v537_v60, 4 }
  0x8c   : > { %v1537_v12 = vld [vmem:[#allocation2 + $0xc] sm:$0xe]  ;;  %v576_v13 = vrot.slane %v5357_v25, 4  ;;  %v440_v14 = vrot.slane %v5364_v36, 4  ;;  %v778_v15 = vld [vmem:[#allocation2 + $0x60] sm:$0xf]  ;;  %1970 = vrot.lane.b32.xlu0 %v4819_v9, %s5040_s12  ;;  %v541_v16 = vsel %vm5322_vm13, %v533_v7, %v540_v10 }
  0x8d   : > { %v311_v61 = vld [vmem:[#allocation2 + $0x20] sm:$0x1]  ;;  %v779_v17 = vsel %vm5302_vm11, %v532_v6, %v778_v15  ;;  %v782_v19 = vld [vmem:[#allocation2 + $0x68] sm:$0x1]  ;;  %v4476_v20 = vrot.slane %v1537_v12, 9  ;;  %v4484_v21 = vrot.slane %v5377_v57, 9 }
  0x8e   : > { %v2581_v22 = vld [vmem:[#allocation2 + $0x10] sm:$0xf]  ;;  %780 = vst [vmem:[#allocation2 + $0x60] sm:$0xf] %v779_v17  ;;  %781 = vst.msk [vmem:[#allocation2 + $0x64] sm:$0xf] %vm245_vm0, %v541_v16  ;;  %v783_v23 = vsel %vm5283_vm5, %v542_v11, %v782_v19 }
  0x8f   : > { %v1642_v24 = vrot.slane %v1538_v8, 5  ;;  %v1698_v26 = vrot.slane %v5383_v63, 5  ;;  %v2605_v27 = vld [vmem:[#allocation2 + $0x70] sm:$0xf]  ;;  %v4547_v28 = vrot.slane %v5385_v3, 9  ;;  %v2678_v31 = vrot.slane %v2581_v22, 5 }
  0x90   : > { %v335_v29 = vld [vmem:[#allocation2 + $0x80] sm:$0x1]  ;;  %784 = vst [vmem:[#allocation2 + $0x68] sm:$0x1] %v783_v23  ;;  %v2580_v30 = vld [vmem:[#allocation2 + $0xc] sm:$0xe] }
  0x91   : > { %v2734_v33 = vrot.slane %v2605_v27, 5  ;;  %v4820_v34 = vld [vmem:[#allocation2 + $0x78] sm:$0xff]   ;;  %v733_v35 = vld [vmem:[#allocation2 + $0x14] sm:$0x1]  ;;  %v312_v37 = vsel %vm5348_vm14, 0, %v311_v61  ;;  %v1644_v43 = vrot.slane %v1642_v24, 4  ;;  %v5423_v59 = vsel %vm5287_vm9, %v4484_v21, %v1698_v26 }
  0x92   : > { %v734_v39 = vsel %vm5283_vm5, %v423_v4, %v733_v35  ;;  %v789_v40 = vld [vmem:[#allocation2 + $0x74] sm:$0x1]  ;;  %313 = vst [vmem:[#allocation2 + $0x20] sm:$0x1] %v312_v37  ;;  %v5409_v41 = vld [vmem:[#allocation2 + $0xc] sm:$0xf]  ;;  %1988 = vrot.lane.b32.xlu1 %v4820_v34, %s5040_s12 }
  0x93   : > { %v4821_v42 = vld [vmem:[#allocation2 + $0x18] sm:$0xff]   ;;  %735 = vst [vmem:[#allocation2 + $0x14] sm:$0x1] %v734_v39  ;;  %v790_v44 = vsel %vm5283_vm5, %v559_v45, %v789_v40  ;;  %v4539_v47 = vrot.slane %v2580_v30, 9  ;;  %v336_v50 = vsel %vm5348_vm14, 0, %v335_v29  ;;  %v1700_v52 = vrot.slane %v1698_v26, 4 }
  0x94   : > { %v2583_v46 = vld [vmem:[#allocation2 + $0x18] sm:$0xe]  ;;  %791 = vst [vmem:[#allocation2 + $0x74] sm:$0x1] %v790_v44  ;;  %v2584_v48 = vld [vmem:[#allocation2 + $0x1c] sm:$0xf]  ;;  %1972 = vrot.lane.b32.xlu0 %v4821_v42, %s5040_s12  ;;  %v1643_v45 = vsel %vm5287_vm9, %v4476_v20, %v1642_v24  ;;  %v5432_v9 = vsel %vm5287_vm9, %v4547_v28, %v2734_v33 }
  0x95   : > { %v2607_v51 = vld [vmem:[#allocation2 + $0x78] sm:$0xe]  ;;  %v2680_v53 = vrot.slane %v2678_v31, 4  ;;  %v2736_v55 = vrot.slane %v2734_v33, 4  ;;  %v2685_v56 = vrot.slane %v2584_v48, 5  ;;  %v4540_v60 = vrot.slane %v2583_v46, 9 }
  0x96   : > { %337 = vst [vmem:[#allocation2 + $0x80] sm:$0x1] %v336_v50  ;;  %v2608_v57 = vld [vmem:[#allocation2 + $0x7c] sm:$0xf]  ;;  %v1558_v49 = vld [vmem:[#allocation2 + $0x60] sm:$0xe]  ;;  %v5428_v8 = vsel %vm5287_vm9, %v4539_v47, %v2678_v31 }
  0x97   : > { %v1559_v58 = vld [vmem:[#allocation2 + $0x64] sm:$0xf]  ;;  %v2741_v62 = vrot.slane %v2608_v57, 5  ;;  %v1560_v63 = vld [vmem:[#allocation2 + $0x68] sm:$0x1]  ;;  %v4483_v3 = vrot.slane %v1558_v49, 9  ;;  %v5446_v23 = vsel %vm5287_vm9, %v4540_v60, %v2685_v56 }
  0x98   : > { %v1691_v4 = vrot.slane %v1559_v58, 5  ;;  %v4548_v5 = vrot.slane %v2607_v51, 9  ;;  %v1062_v6 = vshrl.u32 %v5409_v41, 16  ;;  %v1694_v7 = vrot.slane %v1560_v63, 5  ;;  %v1010_v11 = vld [vmem:[#allocation2 + $0x60] sm:$0xf] }
  0x99   : > { %v5434_v10 = vrot.slane %v2685_v56, 4  ;;  %v1011_v12 = vld [vmem:[#allocation2 + $0x64] sm:$0xf]  ;;  %v740_v16 = vld [vmem:[#allocation2 + $0x20] sm:$0x1]  ;;  %v5438_v17 = vrot.slane %v2741_v62, 4 }
  0x9a   : > { %v1692_v15 = vsel %vm5287_vm9, %v4483_v3, %v1691_v4  ;;  %v1693_v61 = vrot.slane %v1691_v4, 4  ;;  %v1230_v19 = vshrl.u32 %v1010_v11, 16  ;;  %v1539_v20 = vld [vmem:[#allocation2 + $0x14] sm:$0x1]  ;;  %v741_v22 = vsel %vm5283_vm5, %v440_v14, %v740_v16  ;;  %v1012_v44 = vld [vmem:[#allocation2 + $0x68] sm:$0x1] }
  0x9b   : > { %v2582_v21 = vld [vmem:[#allocation2 + $0x14] sm:$0x1]  ;;  %v1233_v24 = vshll.u32 %v1010_v11, 16  ;;  %v1239_v26 = vshll.u32 %v1011_v12, 16  ;;  %v1645_v28 = vrot.slane %v1539_v20, 5  ;;  %v5452_v36 = vsel %vm5287_vm9, %v4548_v5, %v2741_v62  ;;  %s4442_s29 = sshll.u32 %s5255_s8, 8 }
  0x9c   : > { %v1695_v27 = vsel %vm5287_vm9, %v1693_v61, %v1694_v7  ;;  %v1563_v29 = vld [vmem:[#allocation2 + $0x74] sm:$0x1]  ;;  %v2681_v30 = vrot.slane %v2582_v21, 5  ;;  %742 = vst [vmem:[#allocation2 + $0x20] sm:$0x1] %v741_v22  ;;  %v1232_v37 = vrot.slane %v1230_v19, 4 }
  0x9d   : > { %v2606_v31 = vld [vmem:[#allocation2 + $0x74] sm:$0x1]  ;;  %v4499_v33 = vcombine.low %v1692_v15, %v1695_v27  ;;  %v1701_v14 = vrot.slane %v1563_v29, 5  ;;  %v796_v35 = vld [vmem:[#allocation2 + $0x80] sm:$0x1]  ;;  %v1646_v39 = vsel %vm5287_vm9, %v1644_v43, %v1645_v28  ;;  %v1235_v46 = vrot.slane %v1233_v24, 5 }
  0x9e   : > { %v2737_v34 = vrot.slane %v2606_v31, 5  ;;  %v2682_v40 = vsel %vm5287_vm9, %v2680_v53, %v2681_v30  ;;  %v797_v42 = vsel %vm5283_vm5, %v576_v13, %v796_v35  ;;  %v4492_v47 = vcombine.low %v1643_v45, %v1646_v39  ;;  %v990_v51 = vld [vmem:[#allocation2 + $0x10] sm:$0xf]  ;;  %v991_v53 = vld [vmem:[#allocation2 + $0x14] sm:$0x1]  ;;  %s6790_s16 = scalar_lea.vmem [#allocation11], %s4442_s29 }
  0x9f   : > { %1809 = vrot.lane.b32.xlu1 %v4499_v33, %s5038_s22  ;;  %v1702_v48 = vsel %vm5287_vm9, %v1700_v52, %v1701_v14  ;;  %v4555_v50 = vcombine.low %v5428_v8, %v2682_v40  ;;  %798 = vst [vmem:[#allocation2 + $0x80] sm:$0x1] %v797_v42  ;;  %v1236_v56 = vor.u32 %v1235_v46, %v1232_v37  ;;  %v1241_v57 = vrot.slane %v1239_v26, 5  ;;  %v2035_v49 = vld [vmem:[#allocation2 + $0xc] sm:$0xf]  ;;  %s4650_s25 = sshll.u32 %s5097_s3, 12 }
  0xa0   : > { %v2738_v43 = vsel %vm5287_vm9, %v2736_v55, %v2737_v34  ;;  %v4500_v25 = vcombine.low %v5423_v59, %v1702_v48  ;;  %1795 = vrot.lane.b32.xlu0 %v4492_v47, %s5038_s22  ;;  %v1243_v58 = vshrl.u32 %v1011_v12, 16  ;;  %v1249_v45 = vshll.u32 %v1012_v44, 16  ;;  %v2036_v4 = vld [vmem:[#allocation2 + $0x10] sm:$0xf]  ;;  %v2037_v19 = vld [vmem:[#allocation2 + $0x14] sm:$0x1]  ;;  %s6917_s9 = scalar_lea.hbm %s6974_s4, %s4650_s25 }
  0xa1   : > { %v4563_v13 = vcombine.low %v5432_v9, %v2738_v43  ;;  %v1064_v52 = vrot.slane %v1062_v6, 4  ;;  %v1065_v60 = vshll.u32 %v5409_v41, 16  ;;  %v1237_v62 = vrot.slane %v1236_v56, 4  ;;  %v1013_v28 = vld [vmem:[#allocation2 + $0x6c] sm:$0xf]  ;;  %s4338_s28 = sshll.u32 %s6790_s16, 4  ;;  %s6921_s28 = int_to_ptr.vmem [resolvable:$true] %s4338_s28 }
  0xa2   : > { %v1071_v63 = vshll.u32 %v990_v51, 16  ;;  %v1075_v55 = vshrl.u32 %v990_v51, 16  ;;  %v1081_v3 = vshll.u32 %v991_v53, 16  ;;  %v1245_v5 = vrot.slane %v1243_v58, 4  ;;  %v1014_v42 = vld [vmem:[#allocation2 + $0x70] sm:$0xf] }
  0xa3   : > { %1811 = vrot.lane.b32.xlu1 %v4500_v25, %s5038_s22  ;;  %v2585_v59 = vld [vmem:[#allocation2 + $0x20] sm:$0x1]  ;;  %v1251_v7 = vrot.slane %v1249_v45, 5  ;;  %v1067_v8 = vrot.slane %v1065_v60, 5  ;;  %v2084_v9 = vshrl.u32 %v2035_v49, 16  ;;  %v1242_v12 = vsel %vm5309_vm12, %v1237_v62, %v1241_v57  ;;  %s4325_s27 = scalar_lea.sflag [#allocation7], %s5255_s8 }
  0xa4   : > { %v2688_v11 = vrot.slane %v2585_v59, 5  ;;  %v1073_v15 = vrot.slane %v1071_v63, 5  ;;  %v1077_v6 = vrot.slane %v1075_v55, 4  ;;  %2836 = vrot.lane.b32.xlu0 %v4555_v50, %s5041_s13  ;;  %v1246_v41 = vor.u32 %v1245_v5, %v1241_v57  ;;  %v1015_v50 = vld [vmem:[#allocation2 + $0x74] sm:$0x1]  ;;  %p7000_p0 = scmp.ne.s32.totalorder %s6983_s14, 0 }
  0xa5   : > { %v1068_v61 = vor.u32 %v1067_v8, %v1064_v52  ;;  %v1083_v16 = vrot.slane %v1081_v3, 5  ;;  %v2086_v20 = vrot.slane %v2084_v9, 4  ;;  %v2087_v26 = vshll.u32 %v2035_v49, 16  ;;  %v2038_v43 = vld [vmem:[#allocation2 + $0x18] sm:$0xf] }
  0xa6   : > { %v2689_v21 = vsel %vm5287_vm9, %v5434_v10, %v2688_v11  ;;  %v2609_v22 = vld [vmem:[#allocation2 + $0x80] sm:$0x1]  ;;  %v1078_v24 = vor.u32 %v1077_v6, %v1073_v15  ;;  %v2093_v27 = vshll.u32 %v2036_v4, 16  ;;  %v1247_v31 = vrot.slane %v1246_v41, 4  ;;  %v2059_v59 = vld [vmem:[#allocation2 + $0x6c] sm:$0xf] }
  0xa7   : > { %2852 = vrot.lane.b32.xlu1 %v4563_v13, %s5041_s13  ;;  %v4556_v29 = vcombine.low %v5446_v23, %v2689_v21  ;;  %v2744_v30 = vrot.slane %v2609_v22, 5  ;;  %v1069_v33 = vrot.slane %v1068_v61, 4  ;;  %v2089_v34 = vrot.slane %v2087_v26, 5  ;;  %v2039_v13 = vld [vmem:[#allocation2 + $0x1c] sm:$0xf] }
  0xa8   : > { %v1079_v14 = vrot.slane %v1078_v24, 4  ;;  %v2095_v35 = vrot.slane %v2093_v27, 5  ;;  %v2097_v37 = vshrl.u32 %v2036_v4, 16  ;;  %v1252_v39 = vsel %vm5309_vm12, %v1247_v31, %v1251_v7  ;;  %v2040_v60 = vld [vmem:[#allocation2 + $0x20] sm:$0x1] }
  0xa9   : > { %2838 = vrot.lane.b32.xlu0 %v4556_v29, %s5041_s13  ;;  %v2745_v10 = vsel %vm5287_vm9, %v5438_v17, %v2744_v30  ;;  %v1074_v40 = vsel %vm5309_vm12, %v1069_v33, %v1073_v15  ;;  %v2103_v23 = vshll.u32 %v2037_v19, 16  ;;  %v4467_v46 = vcombine.low %v1242_v12, %v1252_v39  ;;  %v2060_v19 = vld [vmem:[#allocation2 + $0x70] sm:$0xf]  ;;  %v2061_v27 = vld [vmem:[#allocation2 + $0x74] sm:$0x1] }
  0xaa   : > { %v4564_v44 = vcombine.low %v5452_v36, %v2745_v10  ;;  %v1084_v47 = vsel %vm5309_vm12, %v1079_v14, %v1083_v16  ;;  %v2090_v48 = vor.u32 %v2089_v34, %v2086_v20  ;;  %v2099_v53 = vrot.slane %v2097_v37, 4  ;;  %v2062_v33 = vld [vmem:[#allocation2 + $0x78] sm:$0xf] }
  0xab   : > { %v4460_v51 = vcombine.low %v1074_v40, %v1084_v47  ;;  %v2105_v17 = vrot.slane %v2103_v23, 5  ;;  %v1254_v25 = vshrl.u32 %v1013_v28, 16  ;;  %v1257_v57 = vshll.u32 %v1013_v28, 16 }
  0xac   : > { %2854 = vrot.lane.b32.xlu1 %v4564_v44, %s5041_s13  ;;  %v2091_v56 = vrot.slane %v2090_v48, 4  ;;  %v1263_v49 = vshll.u32 %v1014_v42, 16  ;;  %v1267_v58 = vshrl.u32 %v1014_v42, 16  ;;  %v2100_v36 = vor.u32 %v2099_v53, %v2095_v35  ;;  %v2063_v42 = vld [vmem:[#allocation2 + $0x7c] sm:$0xf] }
  0xad   : > { %1485 = vrot.lane.b32.xlu0 %v4467_v46, %s5039_s24  ;;  %v1256_v45 = vrot.slane %v1254_v25, 4  ;;  %v1273_v52 = vshll.u32 %v1015_v50, 16  ;;  %v2108_v62 = vshrl.u32 %v2038_v43, 16  ;;  %v1259_v55 = vrot.slane %v1257_v57, 5  ;;  %v2064_v53 = vld [vmem:[#allocation2 + $0x80] sm:$0x1] }
  0xae   : > { %v2096_v63 = vsel %vm5309_vm12, %v2091_v56, %v2095_v35  ;;  %v1265_v3 = vrot.slane %v1263_v49, 5  ;;  %v1269_v4 = vrot.slane %v1267_v58, 4  ;;  %v2101_v5 = vrot.slane %v2100_v36, 4  ;;  %v264_v49 = vld [vmem:[#allocation2 + $0x24] sm:$0x1] }
  0xaf   : > { %v1275_v7 = vrot.slane %v1273_v52, 5  ;;  %v2110_v8 = vrot.slane %v2108_v62, 4  ;;  %v2111_v9 = vshll.u32 %v2038_v43, 16  ;;  %v1260_v11 = vor.u32 %v1259_v55, %v1256_v45 }
  0xb0   : > { %1471 = vrot.lane.b32.xlu1 %v4460_v51, %s5039_s24  ;;  %v1270_v12 = vor.u32 %v1269_v4, %v1265_v3  ;;  %v2117_v15 = vshll.u32 %v2039_v13, 16  ;;  %v2121_v6 = vshrl.u32 %v2039_v13, 16  ;;  %v2106_v41 = vsel %vm5309_vm12, %v2101_v5, %v2105_v17  ;;  %v378_v4 = vld [vmem:[%s5259_s11 + $0x14] sm:$0xf] }
  0xb1   : > { %v2113_v61 = vrot.slane %v2111_v9, 5  ;;  %v2127_v16 = vshll.u32 %v2040_v60, 16  ;;  %v2276_v20 = vshrl.u32 %v2059_v59, 16  ;;  %v4523_v21 = vcombine.low %v2096_v63, %v2106_v41  ;;  %v377_v60 = vld [vmem:[%s5259_s11 + $0x10] sm:$0xf] }
  0xb2   : > { %v1261_v22 = vrot.slane %v1260_v11, 4  ;;  %v1271_v24 = vrot.slane %v1270_v12, 4  ;;  %v2119_v26 = vrot.slane %v2117_v15, 5  ;;  %v2123_v29 = vrot.slane %v2121_v6, 4  ;;  %v3079_v9 = vld [vmem:[#allocation2 + $0x18] sm:$0xf] }
  0xb3   : > { %v2114_v28 = vor.u32 %v2113_v61, %v2110_v8  ;;  %v2129_v30 = vrot.slane %v2127_v16, 5  ;;  %v2278_v31 = vrot.slane %v2276_v20, 4  ;;  %2515 = vrot.lane.b32.xlu0 %v4523_v21, %s5042_s30  ;;  %v2279_v35 = vshll.u32 %v2059_v59, 16  ;;  %v4822_v12 = vld [vmem:[#allocation2 + $0x18] sm:$0xff]  }
  0xb4   : > { %v1266_v14 = vsel %vm5309_vm12, %v1261_v22, %v1265_v3  ;;  %v1276_v34 = vsel %vm5309_vm12, %v1271_v24, %v1275_v7  ;;  %v2285_v37 = vshll.u32 %v2060_v19, 16  ;;  %v2124_v40 = vor.u32 %v2123_v29, %v2119_v26  ;;  %v3080_v21 = vld [vmem:[#allocation2 + $0x1c] sm:$0xf] }
  0xb5   : > { %v4468_v10 = vcombine.low %v1266_v14, %v1276_v34  ;;  %v2115_v39 = vrot.slane %v2114_v28, 4  ;;  %v2289_v23 = vshrl.u32 %v2060_v19, 16  ;;  %v2281_v44 = vrot.slane %v2279_v35, 5  ;;  %v288_v14 = vld [vmem:[#allocation2 + $0x84] sm:$0x1] }
  0xb6   : > { %v2287_v46 = vrot.slane %v2285_v37, 5  ;;  %v2295_v47 = vshll.u32 %v2061_v27, 16  ;;  %v2300_v48 = vshrl.u32 %v2062_v33, 16  ;;  %v2125_v43 = vrot.slane %v2124_v40, 4  ;;  %v3081_v27 = vld [vmem:[#allocation2 + $0x20] sm:$0x1] }
  0xb7   : > { %1487 = vrot.lane.b32.xlu1 %v4468_v10, %s5039_s24  ;;  %v2120_v50 = vsel %vm5309_vm12, %v2115_v39, %v2119_v26  ;;  %v2291_v51 = vrot.slane %v2289_v23, 4  ;;  %v2303_v17 = vshll.u32 %v2062_v33, 16  ;;  %v2282_v25 = vor.u32 %v2281_v44, %v2278_v31  ;;  %v393_v39 = vld [vmem:[%s5259_s11 + $0x50] sm:$0xf] }
  0xb8   : > { %v2297_v13 = vrot.slane %v2295_v47, 5  ;;  %v2302_v56 = vrot.slane %v2300_v48, 4  ;;  %v2309_v57 = vshll.u32 %v2063_v42, 16  ;;  %v2130_v58 = vsel %vm5309_vm12, %v2125_v43, %v2129_v30 }
  0xb9   : > { %v2292_v36 = vor.u32 %v2291_v51, %v2287_v46  ;;  %v2305_v45 = vrot.slane %v2303_v17, 5  ;;  %v2313_v52 = vshrl.u32 %v2063_v42, 16  ;;  %v4524_v62 = vcombine.low %v2120_v50, %v2130_v58  ;;  %v314_v51 = vld [vmem:[#allocation2 + $0x2c] sm:$0x1]  ;;  %v4824_v58 = vld [vmem:[#allocation2 + $0x78] sm:$0xff]  }
  0xba   : > { %v2283_v63 = vrot.slane %v2282_v25, 4  ;;  %v2311_v55 = vrot.slane %v2309_v57, 5  ;;  %v2319_v3 = vshll.u32 %v2064_v53, 16  ;;  %v265_v8 = vsel %vm5283_vm5, 0, %v264_v49  ;;  %v3103_v57 = vld [vmem:[#allocation2 + $0x78] sm:$0xf] }
  0xbb   : > { %v2293_v59 = vrot.slane %v2292_v36, 4  ;;  %v2306_v5 = vor.u32 %v2305_v45, %v2302_v56  ;;  %v2315_v7 = vrot.slane %v2313_v52, 4  ;;  %2517 = vrot.lane.b32.xlu0 %v4524_v62, %s5042_s30  ;;  %266 = vst [vmem:[#allocation2 + $0x24] sm:$0x1] %v265_v8  ;;  %v442_v6 = vshrl.u32 %v377_v60, 16 }
  0xbc   : > { %v2288_v11 = vsel %vm5309_vm12, %v2283_v63, %v2287_v46  ;;  %v2321_v15 = vrot.slane %v2319_v3, 5  ;;  %v445_v41 = vshll.u32 %v377_v60, 16  ;;  %v450_v20 = vshrl.u32 %v378_v4, 16  ;;  %v394_v46 = vld [vmem:[%s5259_s11 + $0x54] sm:$0xf] }
  0xbd   : > { %v2298_v61 = vsel %vm5309_vm12, %v2293_v59, %v2297_v13  ;;  %v2307_v16 = vrot.slane %v2306_v5, 4  ;;  %v2316_v19 = vor.u32 %v2315_v7, %v2311_v55  ;;  %v444_v24 = vrot.slane %v442_v6, 7  ;;  %v3104_v3 = vld [vmem:[#allocation2 + $0x7c] sm:$0xf]  ;;  %v3105_v5 = vld [vmem:[#allocation2 + $0x80] sm:$0x1] }
  0xbe   : > { %v4531_v22 = vcombine.low %v2288_v11, %v2298_v61  ;;  %v453_v26 = vshll.u32 %v378_v4, 16  ;;  %v3128_v28 = vshrl.u32 %v3079_v9, 16  ;;  %v5520_v31 = vrot.slane %v450_v20, 7  ;;  %v3624_v6 = vld [vmem:[#allocation2 + $0x18] sm:$0xe] }
  0xbf   : > { %v2312_v29 = vsel %vm5309_vm12, %v2307_v16, %v2311_v55  ;;  %v2317_v30 = vrot.slane %v2316_v19, 4  ;;  %v3131_v33 = vshll.u32 %v3079_v9, 16  ;;  %3014 = vrot.lane.b32.xlu0 %v4822_v12, %s5043_s6  ;;  %v447_v34 = vor.u32 %v445_v41, %v444_v24 }
  0xc0   : > { %2531 = vrot.lane.b32.xlu1 %v4531_v22, %s5042_s30  ;;  %v448_v35 = vrot.slane %v444_v24, 4  ;;  %v3130_v37 = vrot.slane %v3128_v28, 4  ;;  %v3137_v10 = vshll.u32 %v3080_v21, 16  ;;  %v455_v23 = vor.u32 %v453_v26, %v5520_v31 }
  0xc1   : > { %v2322_v40 = vsel %vm5309_vm12, %v2317_v30, %v2321_v15  ;;  %v457_v42 = vrot.slane %v5520_v31, 4  ;;  %v3133_v44 = vrot.slane %v3131_v33, 5  ;;  %v3141_v50 = vshrl.u32 %v3080_v21, 16 }
  0xc2   : > { %v4532_v47 = vcombine.low %v2312_v29, %v2322_v40  ;;  %v3139_v48 = vrot.slane %v3137_v10, 5  ;;  %v3147_v43 = vshll.u32 %v3081_v27, 16  ;;  %v456_v53 = vsel %vm5322_vm13, %v448_v35, %v455_v23  ;;  %v743_v17 = vld [vmem:[#allocation2 + $0x24] sm:$0xf]  ;;  %v3625_v29 = vld [vmem:[#allocation2 + $0x1c] sm:$0xf] }
  0xc3   : > { %v3134_v25 = vor.u32 %v3133_v44, %v3130_v37  ;;  %v289_v13 = vsel %vm5283_vm5, 0, %v288_v14  ;;  %v578_v56 = vshrl.u32 %v393_v39, 16  ;;  %v744_v49 = vsel %vm5302_vm11, %v447_v34, %v743_v17  ;;  %746 = vst.msk [vmem:[#allocation2 + $0x28] sm:$0xf] %vm245_vm0, %v456_v53  ;;  %v3626_v23 = vld [vmem:[#allocation2 + $0x20] sm:$0x1] }
  0xc4   : > { %2533 = vrot.lane.b32.xlu1 %v4532_v47, %s5042_s30  ;;  %v3143_v36 = vrot.slane %v3141_v50, 4  ;;  %v3149_v45 = vrot.slane %v3147_v43, 5  ;;  %290 = vst [vmem:[#allocation2 + $0x84] sm:$0x1] %v289_v13  ;;  %v581_v52 = vshll.u32 %v393_v39, 16  ;;  %v586_v63 = vshrl.u32 %v394_v46, 16 }
  0xc5   : > { %745 = vst [vmem:[#allocation2 + $0x24] sm:$0xf] %v744_v49  ;;  %v3135_v60 = vrot.slane %v3134_v25, 4  ;;  %v580_v62 = vrot.slane %v578_v56, 7  ;;  %v589_v55 = vshll.u32 %v394_v46, 16  ;;  %v315_v59 = vsel %vm5348_vm14, 0, %v314_v51 }
  0xc6   : > { %v3144_v4 = vor.u32 %v3143_v36, %v3139_v48  ;;  %v3320_v7 = vshrl.u32 %v3103_v57, 16  ;;  %v3323_v8 = vshll.u32 %v3103_v57, 16  ;;  %v5542_v15 = vrot.slane %v586_v63, 7  ;;  %316 = vst [vmem:[#allocation2 + $0x2c] sm:$0x1] %v315_v59 }
  0xc7   : > { %v3140_v9 = vsel %vm5309_vm12, %v3135_v60, %v3139_v48  ;;  %v583_v11 = vor.u32 %v581_v52, %v580_v62  ;;  %v584_v12 = vrot.slane %v580_v62, 4  ;;  %v3329_v19 = vshll.u32 %v3104_v3, 16  ;;  %v338_v44 = vld [vmem:[#allocation2 + $0x8c] sm:$0x1]  ;;  %v992_v43 = vld [vmem:[#allocation2 + $0x18] sm:$0xf] }
  0xc8   : > { %3030 = vrot.lane.b32.xlu1 %v4824_v58, %s5043_s6  ;;  %v3145_v41 = vrot.slane %v3144_v4, 4  ;;  %v3322_v61 = vrot.slane %v3320_v7, 4  ;;  %v3325_v16 = vrot.slane %v3323_v8, 5  ;;  %v591_v20 = vor.u32 %v589_v55, %v5542_v15  ;;  %v993_v36 = vld [vmem:[#allocation2 + $0x1c] sm:$0xf] }
  0xc9   : > { %v593_v21 = vrot.slane %v5542_v15, 4  ;;  %v3333_v22 = vshrl.u32 %v3104_v3, 16  ;;  %v3339_v24 = vshll.u32 %v3105_v5, 16  ;;  %v3331_v28 = vrot.slane %v3329_v19, 5 }
  0xca   : > { %v3150_v26 = vsel %vm5309_vm12, %v3145_v41, %v3149_v45  ;;  %v3326_v27 = vor.u32 %v3325_v16, %v3322_v61  ;;  %v4603_v30 = vrot.slane %v3624_v6, 9  ;;  %v592_v33 = vsel %vm5322_vm13, %v584_v12, %v591_v20  ;;  %v3083_v34 = vld [vmem:[#allocation2 + $0x28] sm:$0xf] }
  0xcb   : > { %v799_v14 = vld [vmem:[#allocation2 + $0x84] sm:$0xf]  ;;  %v4587_v37 = vcombine.low %v3140_v9, %v3150_v26  ;;  %802 = vst.msk [vmem:[#allocation2 + $0x88] sm:$0xf] %vm245_vm0, %v592_v33  ;;  %v3161_v40 = vshll.u32 %v3083_v34, 16  ;;  %v3165_v48 = vshrl.u32 %v3083_v34, 16 }
  0xcc   : > { %v4823_v35 = vld [vmem:[#allocation2 + $0x24] sm:$0xff]   ;;  %v800_v10 = vsel %vm5302_vm11, %v583_v11, %v799_v14  ;;  %v3327_v50 = vrot.slane %v3326_v27, 4  ;;  %v3335_v17 = vrot.slane %v3333_v22, 4  ;;  %v3341_v25 = vrot.slane %v3339_v24, 5  ;;  %v994_v26 = vld [vmem:[#allocation2 + $0x20] sm:$0x1] }
  0xcd   : > { %v3082_v39 = vld [vmem:[#allocation2 + $0x24] sm:$0xf]  ;;  %801 = vst [vmem:[#allocation2 + $0x84] sm:$0xf] %v800_v10  ;;  %3016 = vrot.lane.b32.xlu0 %v4823_v35, %s5043_s6  ;;  %v747_v51 = vld [vmem:[#allocation2 + $0x2c] sm:$0x1] }
  0xce   : > { %v3152_v46 = vshrl.u32 %v3082_v39, 16  ;;  %v3155_v47 = vshll.u32 %v3082_v39, 16  ;;  %v5555_v53 = vrot.slane %v3161_v40, 5  ;;  %v3722_v13 = vrot.slane %v3625_v29, 5  ;;  %v3648_v27 = vld [vmem:[#allocation2 + $0x78] sm:$0xe] }
  0xcf   : > { %v748_v56 = vsel %vm5283_vm5, %v457_v42, %v747_v51  ;;  %v3167_v58 = vrot.slane %v3165_v48, 4  ;;  %v3332_v45 = vsel %vm5309_vm12, %v3327_v50, %v3331_v28  ;;  %v3336_v52 = vor.u32 %v3335_v17, %v3331_v28  ;;  %v3649_v14 = vld [vmem:[#allocation2 + $0x7c] sm:$0xf]  ;;  %v1016_v17 = vld [vmem:[#allocation2 + $0x78] sm:$0xf] }
  0xd0   : > { %v3154_v57 = vrot.slane %v3152_v46, 4  ;;  %v3157_v49 = vrot.slane %v3155_v47, 5  ;;  %749 = vst [vmem:[#allocation2 + $0x2c] sm:$0x1] %v748_v56  ;;  %v5565_v60 = vsel %vm5287_vm9, %v4603_v30, %v3722_v13  ;;  %v3724_v62 = vrot.slane %v3722_v13, 4 }
  0xd1   : > { %v3168_v31 = vor.u32 %v3167_v58, %v5555_v53  ;;  %v3725_v55 = vrot.slane %v3626_v23, 5  ;;  %v339_v42 = vsel %vm5348_vm14, 0, %v338_v44  ;;  %3559 = vrot.lane.b32.xlu0 %v4587_v37, %s5044_s26  ;;  %v3337_v3 = vrot.slane %v3336_v52, 4  ;;  %v3650_v47 = vld [vmem:[#allocation2 + $0x80] sm:$0x1] }
  0xd2   : > { %v3158_v63 = vor.u32 %v3157_v49, %v3154_v57  ;;  %340 = vst [vmem:[#allocation2 + $0x8c] sm:$0x1] %v339_v42  ;;  %v1086_v4 = vshrl.u32 %v992_v43, 16  ;;  %v1089_v59 = vshll.u32 %v992_v43, 16  ;;  %v1095_v5 = vshll.u32 %v993_v36, 16 }
  0xd3   : > { %v3169_v8 = vrot.slane %v3168_v31, 4  ;;  %v5573_v9 = vsel %vm5287_vm9, %v3724_v62, %v3725_v55  ;;  %v3107_v11 = vld [vmem:[#allocation2 + $0x88] sm:$0xf]  ;;  %v3342_v6 = vsel %vm5309_vm12, %v3337_v3, %v3341_v25  ;;  %v1099_v39 = vshrl.u32 %v993_v36, 16  ;;  %v3627_v49 = vld [vmem:[#allocation2 + $0x24] sm:$0xe] }
  0xd4   : > { %v3159_v7 = vrot.slane %v3158_v63, 4  ;;  %v4825_v12 = vld [vmem:[#allocation2 + $0x84] sm:$0xff]   ;;  %v4619_v41 = vcombine.low %v5565_v60, %v5573_v9  ;;  %v3353_v16 = vshll.u32 %v3107_v11, 16  ;;  %v4595_v20 = vcombine.low %v3332_v45, %v3342_v6  ;;  %v1017_v42 = vld [vmem:[#allocation2 + $0x7c] sm:$0xf] }
  0xd5   : > { %v3106_v61 = vld [vmem:[#allocation2 + $0x84] sm:$0xf]  ;;  %3032 = vrot.lane.b32.xlu1 %v4825_v12, %s5043_s6  ;;  %v3357_v29 = vshrl.u32 %v3107_v11, 16  ;;  %v1088_v30 = vrot.slane %v1086_v4, 4  ;;  %v1091_v33 = vrot.slane %v1089_v59, 5  ;;  %v1097_v10 = vrot.slane %v1095_v5, 5 }
  0xd6   : > { %v3164_v19 = vsel %vm5309_vm12, %v3159_v7, %v5555_v53  ;;  %v3344_v22 = vshrl.u32 %v3106_v61, 16  ;;  %v3347_v24 = vshll.u32 %v3106_v61, 16  ;;  %v5583_v28 = vrot.slane %v3353_v16, 5  ;;  %v3628_v58 = vld [vmem:[#allocation2 + $0x28] sm:$0xf] }
  0xd7   : > { %v3084_v34 = vld [vmem:[#allocation2 + $0x2c] sm:$0x1]  ;;  %v3359_v23 = vrot.slane %v3357_v29, 4  ;;  %v1092_v44 = vor.u32 %v1091_v33, %v1088_v30  ;;  %v1105_v46 = vshll.u32 %v994_v26, 16  ;;  %v1101_v43 = vrot.slane %v1099_v39, 4 }
  0xd8   : > { %v3346_v35 = vrot.slane %v3344_v22, 4  ;;  %v3349_v37 = vrot.slane %v3347_v24, 5  ;;  %v3171_v40 = vshll.u32 %v3084_v34, 16  ;;  %v4611_v51 = vrot.slane %v3648_v27, 9  ;;  %v3629_v63 = vld [vmem:[#allocation2 + $0x2c] sm:$0x1] }
  0xd9   : > { %v803_v48 = vld [vmem:[#allocation2 + $0x8c] sm:$0x1]  ;;  %v3778_v53 = vrot.slane %v3649_v14, 5  ;;  %3575 = vrot.lane.b32.xlu1 %v4595_v20, %s5044_s26  ;;  %v3360_v56 = vor.u32 %v3359_v23, %v5583_v28  ;;  %v1093_v57 = vrot.slane %v1092_v44, 4  ;;  %v1102_v45 = vor.u32 %v1101_v43, %v1097_v10  ;;  %v1018_v16 = vld [vmem:[#allocation2 + $0x80] sm:$0x1] }
  0xda   : > { %v3350_v50 = vor.u32 %v3349_v37, %v3346_v35  ;;  %v3173_v25 = vrot.slane %v3171_v40, 5  ;;  %v804_v13 = vsel %vm5283_vm5, %v593_v21, %v803_v48  ;;  %v1107_v52 = vrot.slane %v1105_v46, 5  ;;  %v995_v22 = vld [vmem:[#allocation2 + $0x24] sm:$0xf]  ;;  %v996_v34 = vld [vmem:[#allocation2 + $0x28] sm:$0xf] }
  0xdb   : > { %805 = vst [vmem:[#allocation2 + $0x8c] sm:$0x1] %v804_v13  ;;  %v5595_v62 = vsel %vm5287_vm9, %v4611_v51, %v3778_v53  ;;  %v5599_v31 = vrot.slane %v3360_v56, 4  ;;  %v1098_v21 = vsel %vm5309_vm12, %v1093_v57, %v1097_v10  ;;  %v3780_v55 = vrot.slane %v3778_v53, 4  ;;  %v997_v48 = vld [vmem:[#allocation2 + $0x2c] sm:$0x1] }
  0xdc   : > { %v5591_v36 = vrot.slane %v3350_v50, 4  ;;  %v3174_v15 = vsel %vm5309_vm12, %v3169_v8, %v3173_v25  ;;  %v1103_v59 = vrot.slane %v1102_v45, 4  ;;  %v3781_v5 = vrot.slane %v3650_v47, 5  ;;  %v3651_v50 = vld [vmem:[#allocation2 + $0x84] sm:$0xe] }
  0xdd   : > { %v4588_v3 = vcombine.low %v3164_v19, %v3174_v15  ;;  %v4604_v7 = vrot.slane %v3627_v49, 9  ;;  %v3729_v11 = vrot.slane %v3628_v58, 5  ;;  %v3732_v12 = vrot.slane %v3629_v63, 5  ;;  %v1540_v25 = vld [vmem:[#allocation2 + $0x18] sm:$0xe] }
  0xde   : > { %v3356_v4 = vsel %vm5309_vm12, %v5591_v36, %v5583_v28  ;;  %v1278_v6 = vshrl.u32 %v1016_v17, 16  ;;  %v1108_v8 = vsel %vm5309_vm12, %v1103_v59, %v1107_v52  ;;  %v5612_v61 = vsel %vm5287_vm9, %v3780_v55, %v3781_v5  ;;  %v3652_v58 = vld [vmem:[#allocation2 + $0x88] sm:$0xf]  ;;  %v1541_v55 = vld [vmem:[#allocation2 + $0x1c] sm:$0xf] }
  0xdf   : > { %3561 = vrot.lane.b32.xlu0 %v4588_v3, %s5044_s26  ;;  %v1281_v19 = vshll.u32 %v1016_v17, 16  ;;  %v1287_v20 = vshll.u32 %v1017_v42, 16  ;;  %v4461_v24 = vcombine.low %v1098_v21, %v1108_v8  ;;  %v4627_v26 = vcombine.low %v5595_v62, %v5612_v61 }
  0xe0   : > { %v3730_v27 = vsel %vm5287_vm9, %v4604_v7, %v3729_v11  ;;  %v3731_v28 = vrot.slane %v3729_v11, 4  ;;  %v1280_v29 = vrot.slane %v1278_v6, 4  ;;  %v1291_v14 = vshrl.u32 %v1017_v42, 16  ;;  %v1542_v42 = vld [vmem:[#allocation2 + $0x20] sm:$0x1] }
  0xe1   : > { %v1283_v30 = vrot.slane %v1281_v19, 5  ;;  %v1289_v33 = vrot.slane %v1287_v20, 5  ;;  %v1297_v10 = vshll.u32 %v1018_v16, 16  ;;  %v1110_v39 = vshrl.u32 %v995_v22, 16  ;;  %v1019_v11 = vld [vmem:[#allocation2 + $0x84] sm:$0xf] }
  0xe2   : > { %v3108_v35 = vld [vmem:[#allocation2 + $0x8c] sm:$0x1]  ;;  %v3733_v37 = vsel %vm5287_vm9, %v3731_v28, %v3732_v12  ;;  %v1113_v40 = vshll.u32 %v995_v22, 16  ;;  %v1293_v47 = vrot.slane %v1291_v14, 4  ;;  %v1119_v17 = vshll.u32 %v996_v34, 16 }
  0xe3   : > { %3880 = vrot.lane.b32.xlu0 %v4619_v41, %s5045_s7  ;;  %v3363_v23 = vshll.u32 %v3108_v35, 16  ;;  %v4620_v44 = vcombine.low %v3730_v27, %v3733_v37  ;;  %v1284_v46 = vor.u32 %v1283_v30, %v1280_v29  ;;  %v1299_v43 = vrot.slane %v1297_v10, 5  ;;  %v3653_v9 = vld [vmem:[#allocation2 + $0x8c] sm:$0x1]  ;;  %v1020_v16 = vld [vmem:[#allocation2 + $0x88] sm:$0xf] }
  0xe4   : > { %v1112_v51 = vrot.slane %v1110_v39, 4  ;;  %v1115_v53 = vrot.slane %v1113_v40, 5  ;;  %v1294_v57 = vor.u32 %v1293_v47, %v1289_v33  ;;  %v1123_v49 = vshrl.u32 %v996_v34, 16  ;;  %v4842_v27 = vld [vmem:[#allocation8] sm:$0xff]   ;;  %v1544_v14 = vld [vmem:[#allocation2 + $0x28] sm:$0xf] }
  0xe5   : > { %v3365_v13 = vrot.slane %v3363_v23, 5  ;;  %v1285_v56 = vrot.slane %v1284_v46, 4  ;;  %v1121_v45 = vrot.slane %v1119_v17, 5  ;;  %v1129_v60 = vshll.u32 %v997_v48, 16  ;;  %v1545_v34 = vld [vmem:[#allocation2 + $0x2c] sm:$0x1]  ;;  %4675 = vmatprep.subr.bf16.mxu0 %v4842_v27  ;;  %4723 = vmatprep.subr.bf16.mxu1 %v4842_v27 }
  0xe6   : > { %v1116_v36 = vor.u32 %v1115_v53, %v1112_v51  ;;  %v4612_v41 = vrot.slane %v3651_v50, 9  ;;  %v1295_v15 = vrot.slane %v1294_v57, 4  ;;  %v1125_v21 = vrot.slane %v1123_v49, 4  ;;  %v1021_v37 = vld [vmem:[#allocation2 + $0x8c] sm:$0x1]  ;;  %4676 = vmatpush3.bf16.msra.mxu0 %v4842_v27  ;;  %4731 = vmatpush3.bf16.msra.mxu1 %v4842_v27 }
  0xe7   : > { %v3366_v52 = vsel %vm5309_vm12, %v5599_v31, %v3365_v13  ;;  %1473 = vrot.lane.b32.xlu0 %v4461_v24, %s5039_s24  ;;  %v1290_v63 = vsel %vm5309_vm12, %v1285_v56, %v1289_v33  ;;  %v1131_v5 = vrot.slane %v1129_v60, 5  ;;  %v3785_v7 = vrot.slane %v3652_v58, 5  ;;  %v1543_v24 = vld [vmem:[#allocation2 + $0x24] sm:$0xe]  ;;  %v1564_v23 = vld [vmem:[#allocation2 + $0x78] sm:$0xe] }
  0xe8   : > { %v4596_v3 = vcombine.low %v3356_v4, %v3366_v52  ;;  %v1117_v59 = vrot.slane %v1116_v36, 4  ;;  %v1300_v12 = vsel %vm5309_vm12, %v1295_v15, %v1299_v43  ;;  %v1126_v6 = vor.u32 %v1125_v21, %v1121_v45  ;;  %v1565_v46 = vld [vmem:[#allocation2 + $0x7c] sm:$0xf]  ;;  %v1566_v43 = vld [vmem:[#allocation2 + $0x80] sm:$0x1] }
  0xe9   : > { %v3788_v8 = vrot.slane %v3653_v9, 5  ;;  %v4477_v31 = vrot.slane %v1540_v25, 9  ;;  %v4469_v19 = vcombine.low %v1290_v63, %v1300_v12  ;;  %v5637_v4 = vsel %vm5287_vm9, %v4612_v41, %v3785_v7  ;;  %v1567_v13 = vld [vmem:[#allocation2 + $0x84] sm:$0xe]  ;;  %v1568_v36 = vld [vmem:[#allocation2 + $0x88] sm:$0xf] }
  0xea   : > { %3577 = vrot.lane.b32.xlu1 %v4596_v3, %s5044_s26  ;;  %v1122_v20 = vsel %vm5309_vm12, %v1117_v59, %v1121_v45  ;;  %v3787_v22 = vrot.slane %v3785_v7, 4  ;;  %v1127_v28 = vrot.slane %v1126_v6, 4  ;;  %v1649_v29 = vrot.slane %v1541_v55, 5  ;;  %v1569_v45 = vld [vmem:[#allocation2 + $0x8c] sm:$0x1] }
  0xeb   : > { %3882 = vrot.lane.b32.xlu0 %v4620_v44, %s5045_s7  ;;  %v1652_v30 = vrot.slane %v1542_v42, 5  ;;  %v1302_v33 = vshrl.u32 %v1019_v11, 16  ;;  %v1305_v10 = vshll.u32 %v1019_v11, 16  ;;  %v1311_v39 = vshll.u32 %v1020_v16, 16  ;;  %v379_v59 = vld [vmem:[%s5259_s11 + $0x18] sm:$0xf] }
  0xec   : > { %v3789_v35 = vsel %vm5287_vm9, %v3787_v22, %v3788_v8  ;;  %v1315_v40 = vshrl.u32 %v1020_v16, 16  ;;  %v1132_v44 = vsel %vm5309_vm12, %v1127_v28, %v1131_v5  ;;  %v1650_v48 = vsel %vm5287_vm9, %v4477_v31, %v1649_v29  ;;  %v380_v16 = vld [vmem:[%s5259_s11 + $0x1c] sm:$0xf]  ;;  %v2042_v27 = vld [vmem:[#allocation2 + $0x28] sm:$0xf]  ;;  %v4843_v28 = vld [vmem:[#allocation8 + $0x8] sm:$0xff]  }
  0xed   : > { %v4628_v47 = vcombine.low %v5637_v4, %v3789_v35  ;;  %v1651_v50 = vrot.slane %v1649_v29, 4  ;;  %v4462_v51 = vcombine.low %v1122_v20, %v1132_v44  ;;  %v1304_v53 = vrot.slane %v1302_v33, 4  ;;  %4677 = vmatprep.subr.bf16.mxu0 %v4843_v28  ;;  %4724 = vmatprep.subr.bf16.mxu1 %v4843_v28 }
  0xee   : > { %3896 = vrot.lane.b32.xlu1 %v4627_v26, %s5045_s7  ;;  %v1307_v17 = vrot.slane %v1305_v10, 5  ;;  %v1313_v25 = vrot.slane %v1311_v39, 5  ;;  %v1317_v57 = vrot.slane %v1315_v40, 4  ;;  %v1321_v49 = vshll.u32 %v1021_v37, 16  ;;  %v267_v26 = vld [vmem:[#allocation2 + $0x30] sm:$0x1]  ;;  %4678 = vmatpush3.bf16.msra.mxu0 %v4843_v28 }
  0xef   : > { %v1653_v56 = vsel %vm5287_vm9, %v1651_v50, %v1652_v30  ;;  %v4478_v58 = vrot.slane %v1543_v24, 9  ;;  %1475 = vrot.lane.b32.xlu0 %v4462_v51, %s5039_s24  ;;  %v1656_v62 = vrot.slane %v1544_v14, 5  ;;  %v1659_v61 = vrot.slane %v1545_v34, 5  ;;  %v2041_v24 = vld [vmem:[#allocation2 + $0x24] sm:$0xf]  ;;  %4732 = vmatpush3.bf16.msra.mxu1 %v4843_v28 }
  0xf0   : > { %v4493_v60 = vcombine.low %v1650_v48, %v1653_v56  ;;  %v1308_v9 = vor.u32 %v1307_v17, %v1304_v53  ;;  %v1318_v41 = vor.u32 %v1317_v57, %v1313_v25  ;;  %v1323_v52 = vrot.slane %v1321_v49, 5  ;;  %v2043_v39 = vld [vmem:[#allocation2 + $0x2c] sm:$0x1]  ;;  %v291_v40 = vld [vmem:[#allocation2 + $0x90] sm:$0x1] }
  0xf1   : > { %v4485_v63 = vrot.slane %v1564_v23, 9  ;;  %v1705_v15 = vrot.slane %v1565_v46, 5  ;;  %v1657_v55 = vsel %vm5287_vm9, %v4478_v58, %v1656_v62  ;;  %v1658_v42 = vrot.slane %v1656_v62, 4  ;;  %v4826_v23 = vld [vmem:[#allocation2 + $0x24] sm:$0xff]   ;;  %v395_v50 = vld [vmem:[%s5259_s11 + $0x58] sm:$0xf] }
  0xf2   : > { %1489 = vrot.lane.b32.xlu1 %v4469_v19, %s5039_s24  ;;  %v1309_v21 = vrot.slane %v1308_v9, 4  ;;  %v1708_v3 = vrot.slane %v1566_v43, 5  ;;  %v1319_v5 = vrot.slane %v1318_v41, 4  ;;  %v4486_v11 = vrot.slane %v1567_v13, 9  ;;  %v396_v43 = vld [vmem:[%s5259_s11 + $0x5c] sm:$0xf] }
  0xf3   : > { %v1707_v7 = vrot.slane %v1705_v15, 4  ;;  %1797 = vrot.lane.b32.xlu0 %v4493_v60, %s5038_s22  ;;  %v1660_v6 = vsel %vm5287_vm9, %v1658_v42, %v1659_v61  ;;  %v1712_v8 = vrot.slane %v1568_v36, 5  ;;  %v1715_v31 = vrot.slane %v1569_v45, 5  ;;  %v317_v58 = vld [vmem:[#allocation2 + $0x38] sm:$0x1]  ;;  %v5689_v61 = vpop.permute.xlu0 %1793 }
  0xf4   : > { %v1314_v12 = vsel %vm5309_vm12, %v1309_v21, %v1313_v25  ;;  %v1324_v19 = vsel %vm5309_vm12, %v1319_v5, %v1323_v52  ;;  %v4494_v20 = vcombine.low %v1657_v55, %v1660_v6  ;;  %v1706_v4 = vsel %vm5287_vm9, %v4485_v63, %v1705_v15  ;;  %v2065_v36 = vld [vmem:[#allocation2 + $0x84] sm:$0xf]  ;;  %v2066_v15 = vld [vmem:[#allocation2 + $0x88] sm:$0xf]  ;;  %v2067_v6 = vld [vmem:[#allocation2 + $0x8c] sm:$0x1] }
  0xf5   : > { %v268_v22 = vsel %vm5283_vm5, 0, %v267_v26  ;;  %v4470_v29 = vcombine.low %v1314_v12, %v1324_v19  ;;  %v1709_v30 = vsel %vm5287_vm9, %v1707_v7, %v1708_v3  ;;  %v5675_v33 = vsel %vm5287_vm9, %v4486_v11, %v1712_v8 }
  0xf6   : > { %3898 = vrot.lane.b32.xlu1 %v4628_v47, %s5045_s7  ;;  %v1714_v14 = vrot.slane %v1712_v8, 4  ;;  %269 = vst [vmem:[#allocation2 + $0x30] sm:$0x1] %v268_v22  ;;  %v459_v34 = vshrl.u32 %v379_v59, 16  ;;  %v462_v35 = vshll.u32 %v379_v59, 16  ;;  %v467_v37 = vshrl.u32 %v380_v16, 16 }
  0xf7   : > { %v470_v10 = vshll.u32 %v380_v16, 16  ;;  %1799 = vrot.lane.b32.xlu0 %v4494_v20, %s5038_s22  ;;  %v2132_v44 = vshrl.u32 %v2041_v24, 16  ;;  %v2135_v47 = vshll.u32 %v2041_v24, 16  ;;  %v2141_v48 = vshll.u32 %v2042_v27, 16  ;;  %v5707_v20 = vld [vmem:[#allocation2 + $0x24] sm:$0xe] }
  0xf8   : > { %v1716_v46 = vsel %vm5287_vm9, %v1714_v14, %v1715_v31  ;;  %v4501_v51 = vcombine.low %v1706_v4, %v1709_v30  ;;  %v461_v53 = vrot.slane %v459_v34, 7  ;;  %v5682_v17 = vrot.slane %v467_v37, 7  ;;  %v5709_v4 = vld [vmem:[#allocation2 + $0x28] sm:$0xf]  ;;  %v5714_v34 = vpop.permute.xlu0 %1469 }
  0xf9   : > { %v2145_v25 = vshrl.u32 %v2042_v27, 16  ;;  %v2134_v13 = vrot.slane %v2132_v44, 4  ;;  %v2137_v56 = vrot.slane %v2135_v47, 5  ;;  %v5685_v57 = vrot.slane %v2141_v48, 5  ;;  %v4844_v22 = vld [vmem:[#allocation8 + $0x10] sm:$0xff]   ;;  %v4845_v48 = vld [vmem:[#allocation8 + $0x18] sm:$0xff]  }
  0xfa   : > { %1491 = vrot.lane.b32.xlu1 %v4470_v29, %s5039_s24  ;;  %v2151_v49 = vshll.u32 %v2043_v39, 16  ;;  %v4502_v45 = vcombine.low %v5675_v33, %v1716_v46  ;;  %v464_v60 = vor.u32 %v462_v35, %v461_v53  ;;  %v465_v9 = vrot.slane %v461_v53, 4  ;;  %v5711_v29 = vld [vmem:[#allocation2 + $0x2c] sm:$0x1]  ;;  %4679 = vmatprep.subr.bf16.mxu0 %v4844_v22  ;;  %v4828_v37 = vld [vmem:[#allocation2 + $0x84] sm:$0xff]  }
  0xfb   : > { %v472_v62 = vor.u32 %v470_v10, %v5682_v17  ;;  %1974 = vrot.lane.b32.xlu0 %v4826_v23, %s5040_s12  ;;  %v2138_v26 = vor.u32 %v2137_v56, %v2134_v13  ;;  %v2147_v41 = vrot.slane %v2145_v25, 4  ;;  %v292_v63 = vsel %vm5283_vm5, 0, %v291_v40  ;;  %4725 = vmatprep.subr.bf16.mxu1 %v4844_v22 }
  0xfc   : > { %v5692_v52 = vrot.slane %v2151_v49, 5  ;;  %293 = vst [vmem:[#allocation2 + $0x90] sm:$0x1] %v292_v63  ;;  %v595_v42 = vshrl.u32 %v395_v50, 16  ;;  %v598_v3 = vshll.u32 %v395_v50, 16  ;;  %v603_v59 = vshrl.u32 %v396_v43, 16  ;;  %4680 = vmatpush3.bf16.msra.mxu0 %v4844_v22  ;;  %4733 = vmatpush3.bf16.msra.mxu1 %v4844_v22 }
  0xfd   : > { %v473_v21 = vsel %vm5322_vm13, %v465_v9, %v472_v62  ;;  %v750_v55 = vld [vmem:[#allocation2 + $0x30] sm:$0xf]  ;;  %v2139_v7 = vrot.slane %v2138_v26, 4  ;;  %v2148_v11 = vor.u32 %v2147_v41, %v5685_v57  ;;  %v606_v12 = vshll.u32 %v396_v43, 16  ;;  %v341_v49 = vld [vmem:[#allocation2 + $0x98] sm:$0x1]  ;;  %4681 = vmatprep.subr.bf16.mxu0 %v4845_v48  ;;  %4726 = vmatprep.subr.bf16.mxu1 %v4845_v48 }
  0xfe   : > { %1813 = vrot.lane.b32.xlu1 %v4501_v51, %s5038_s22  ;;  %v751_v5 = vsel %vm5302_vm11, %v464_v60, %v750_v55  ;;  %753 = vst.msk [vmem:[#allocation2 + $0x34] sm:$0xf] %vm245_vm0, %v473_v21  ;;  %v597_v8 = vrot.slane %v595_v42, 7  ;;  %v5703_v31 = vrot.slane %v603_v59, 7  ;;  %v318_v16 = vsel %vm5348_vm14, 0, %v317_v58  ;;  %v5734_v58 = vpop.permute.xlu1 %1986  ;;  %v4847_v22 = vld [vmem:[#allocation8 + $0x20] sm:$0xff]  }
  0xff   : > { %752 = vst [vmem:[#allocation2 + $0x30] sm:$0xf] %v751_v5  ;;  %v2324_v19 = vshrl.u32 %v2065_v36, 16  ;;  %v2149_v24 = vrot.slane %v2148_v11, 4  ;;  %319 = vst [vmem:[#allocation2 + $0x38] sm:$0x1] %v318_v16  ;;  %v2144_v10 = vsel %vm5309_vm12, %v2139_v7, %v5685_v57 }
 0x100   : > { %v2327_v27 = vshll.u32 %v2065_v36, 16  ;;  %v2333_v28 = vshll.u32 %v2066_v15, 16  ;;  %v600_v30 = vor.u32 %v598_v3, %v597_v8  ;;  %v601_v33 = vrot.slane %v597_v8, 4  ;;  %4682 = vmatpush3.bf16.msra.mxu0 %v4845_v48  ;;  %4734 = vmatpush3.bf16.msra.mxu1 %v4845_v48  ;;  %v5749_v7 = vld [vmem:[#allocation2 + $0x84] sm:$0xe] }
 0x101   : > { %v608_v14 = vor.u32 %v606_v12, %v5703_v31  ;;  %v474_v35 = vrot.slane %v5682_v17, 4  ;;  %v2326_v39 = vrot.slane %v2324_v19, 4  ;;  %v2154_v23 = vsel %vm5309_vm12, %v2149_v24, %v5692_v52  ;;  %v5751_v16 = vld [vmem:[#allocation2 + $0x88] sm:$0xf]  ;;  %4683 = vmatprep.subr.bf16.mxu0 %v4847_v22  ;;  %4727 = vmatprep.subr.bf16.mxu1 %v4847_v22 }
 0x102   : > { %1815 = vrot.lane.b32.xlu1 %v4502_v45, %s5038_s22  ;;  %v2329_v40 = vrot.slane %v2327_v27, 5  ;;  %v2337_v44 = vshrl.u32 %v2066_v15, 16  ;;  %v2343_v47 = vshll.u32 %v2067_v6, 16  ;;  %v5727_v51 = vrot.slane %v2333_v28, 5  ;;  %v5737_v15 = vpop.permute.xlu0 %1970 }
 0x103   : > { %v609_v46 = vsel %vm5322_vm13, %v601_v33, %v608_v14  ;;  %v806_v50 = vld [vmem:[#allocation2 + $0x90] sm:$0xf]  ;;  %v4541_v53 = vrot.slane %v5707_v20, 9  ;;  %v2692_v17 = vrot.slane %v5709_v4, 5  ;;  %v2695_v57 = vrot.slane %v5711_v29, 5 }
 0x104   : > { %809 = vst.msk [vmem:[#allocation2 + $0x94] sm:$0xf] %vm245_vm0, %v609_v46  ;;  %v2330_v43 = vor.u32 %v2329_v40, %v2326_v39  ;;  %v807_v25 = vsel %vm5302_vm11, %v600_v30, %v806_v50  ;;  %v2339_v56 = vrot.slane %v2337_v44, 4  ;;  %v4525_v45 = vcombine.low %v2144_v10, %v2154_v23  ;;  %v5762_v33 = vpop.permute.xlu1 %1988  ;;  %v5770_v39 = vld [vmem:[#allocation2 + $0x8c] sm:$0x1]  ;;  %v4851_v40 = vld [vmem:[#allocation8 + $0x28] sm:$0xff]   ;;  %4684 = vmatpush3.bf16.msra.mxu0 %v4847_v22 }
 0x105   : > { %v2045_v13 = vld [vmem:[#allocation2 + $0x34] sm:$0xf]  ;;  %808 = vst [vmem:[#allocation2 + $0x90] sm:$0xf] %v807_v25  ;;  %v2345_v63 = vrot.slane %v2343_v47, 5  ;;  %v2694_v8 = vrot.slane %v2692_v17, 4  ;;  %v5759_v28 = vsel %vm5287_vm9, %v4541_v53, %v2692_v17  ;;  %4685 = vmatprep.subr.bf16.mxu0 %v4851_v40  ;;  %4735 = vmatpush3.bf16.msra.mxu1 %v4847_v22 }
 0x106   : > { %v4827_v36 = vld [vmem:[#allocation2 + $0x30] sm:$0xff]   ;;  %1990 = vrot.lane.b32.xlu1 %v4828_v37, %s5040_s12  ;;  %v2165_v9 = vshll.u32 %v2045_v13, 16  ;;  %v754_v62 = vld [vmem:[#allocation2 + $0x38] sm:$0x1]  ;;  %v2169_v52 = vshrl.u32 %v2045_v13, 16  ;;  %v2331_v42 = vrot.slane %v2330_v43, 4  ;;  %v2340_v3 = vor.u32 %v2339_v56, %v5727_v51  ;;  %v5780_v43 = vpop.permute.xlu0 %1972  ;;  %4728 = vmatprep.subr.bf16.mxu1 %v4851_v40 }
 0x107   : > { %v2044_v60 = vld [vmem:[#allocation2 + $0x30] sm:$0xf]  ;;  %1976 = vrot.lane.b32.xlu0 %v4827_v36, %s5040_s12  ;;  %v755_v21 = vsel %vm5283_vm5, %v474_v35, %v754_v62  ;;  %v5747_v5 = vld [vmem:[#allocation2 + $0x34] sm:$0xf]  ;;  %v610_v19 = vrot.slane %v5703_v31, 4  ;;  %v342_v4 = vsel %vm5348_vm14, 0, %v341_v49  ;;  %v5776_v44 = vsel %vm5287_vm9, %v2694_v8, %v2695_v57 }
 0x108   : > { %v2156_v26 = vshrl.u32 %v2044_v60, 16  ;;  %v2159_v41 = vshll.u32 %v2044_v60, 16  ;;  %v5742_v55 = vrot.slane %v2165_v9, 5  ;;  %v5745_v59 = vld [vmem:[#allocation2 + $0x30] sm:$0xe]  ;;  %v2171_v6 = vrot.slane %v2169_v52, 4  ;;  %4686 = vmatpush3.bf16.msra.mxu0 %v4851_v40 }
 0x109   : > { %756 = vst [vmem:[#allocation2 + $0x38] sm:$0x1] %v755_v21  ;;  %v2341_v20 = vrot.slane %v2340_v3, 4  ;;  %343 = vst [vmem:[#allocation2 + $0x98] sm:$0x1] %v342_v4  ;;  %v2699_v30 = vrot.slane %v5747_v5, 5  ;;  %v2336_v14 = vsel %vm5309_vm12, %v2331_v42, %v5727_v51  ;;  %4736 = vmatpush3.bf16.msra.mxu1 %v4851_v40 }
 0x10a   : > { %v2158_v11 = vrot.slane %v2156_v26, 4  ;;  %v2161_v12 = vrot.slane %v2159_v41, 5  ;;  %v2172_v27 = vor.u32 %v2171_v6, %v5742_v55  ;;  %v4542_v47 = vrot.slane %v5745_v59, 9  ;;  %v270_v50 = vld [vmem:[#allocation2 + $0x3c] sm:$0x1]  ;;  %v4853_v9 = vld [vmem:[#allocation8 + $0x30] sm:$0xff]  }
 0x10b   : > { %v2069_v29 = vld [vmem:[#allocation2 + $0x94] sm:$0xf]  ;;  %2519 = vrot.lane.b32.xlu0 %v4525_v45, %s5042_s30  ;;  %v2346_v35 = vsel %vm5309_vm12, %v2341_v20, %v2345_v63  ;;  %v4549_v48 = vrot.slane %v5749_v7, 9  ;;  %v2748_v13 = vrot.slane %v5751_v16, 5  ;;  %v2701_v45 = vrot.slane %v2699_v30, 4  ;;  %4687 = vmatprep.subr.bf16.mxu0 %v4853_v9 }
 0x10c   : > { %v2162_v24 = vor.u32 %v2161_v12, %v2158_v11  ;;  %v2357_v37 = vshll.u32 %v2069_v29, 16  ;;  %v2361_v10 = vshrl.u32 %v2069_v29, 16  ;;  %v4829_v23 = vld [vmem:[#allocation2 + $0x90] sm:$0xff]   ;;  %v2173_v51 = vrot.slane %v2172_v27, 4  ;;  %v381_v42 = vld [vmem:[%s5259_s11 + $0x20] sm:$0xf]  ;;  %4729 = vmatprep.subr.bf16.mxu1 %v4853_v9  ;;  %4688 = vmatpush3.bf16.msra.mxu0 %v4853_v9 }
 0x10d   : > { %v2068_v53 = vld [vmem:[#allocation2 + $0x90] sm:$0xf]  ;;  %v5785_v56 = vld [vmem:[#allocation2 + $0x94] sm:$0xf]  ;;  %1992 = vrot.lane.b32.xlu1 %v4829_v23, %s5040_s12  ;;  %v4533_v57 = vcombine.low %v2336_v14, %v2346_v35  ;;  %v4557_v26 = vcombine.low %v5759_v28, %v5776_v44  ;;  %v2750_v63 = vrot.slane %v2748_v13, 4  ;;  %v2751_v21 = vrot.slane %v5770_v39, 5  ;;  %4737 = vmatpush3.bf16.msra.mxu1 %v4853_v9 }
 0x10e   : > { %v5772_v46 = vrot.slane %v2162_v24, 4  ;;  %v5782_v17 = vrot.slane %v2357_v37, 5  ;;  %v2363_v25 = vrot.slane %v2361_v10, 4  ;;  %v2348_v49 = vshrl.u32 %v2068_v53, 16  ;;  %v5788_v60 = vld [vmem:[#allocation2 + $0x90] sm:$0xe] }
 0x10f   : > { %v2351_v36 = vshll.u32 %v2068_v53, 16  ;;  %v5803_v8 = vsel %vm5287_vm9, %v4542_v47, %v2699_v30  ;;  %v5807_v16 = vsel %vm5287_vm9, %v4549_v48, %v2748_v13  ;;  %v271_v20 = vsel %vm5283_vm5, 0, %v270_v50  ;;  %v382_v4 = vld [vmem:[%s5259_s11 + $0x24] sm:$0xf]  ;;  %v3085_v29 = vld [vmem:[#allocation2 + $0x30] sm:$0xf] }
 0x110   : > { %v2046_v62 = vld [vmem:[#allocation2 + $0x38] sm:$0x1]  ;;  %v2364_v41 = vor.u32 %v2363_v25, %v5782_v17  ;;  %v2350_v59 = vrot.slane %v2348_v49, 4  ;;  %v2168_v12 = vsel %vm5309_vm12, %v5772_v46, %v5742_v55  ;;  %v2755_v27 = vrot.slane %v5785_v56, 5  ;;  %272 = vst [vmem:[#allocation2 + $0x3c] sm:$0x1] %v271_v20 }
 0x111   : > { %v2591_v52 = vld [vmem:[#allocation2 + $0x38] sm:$0x1]  ;;  %v2175_v3 = vshll.u32 %v2046_v62, 16  ;;  %v2353_v5 = vrot.slane %v2351_v36, 5  ;;  %v5795_v11 = vpop.permute.xlu1 %1809  ;;  %2535 = vrot.lane.b32.xlu1 %v4533_v57, %s5042_s30  ;;  %v5828_v31 = vsel %vm5287_vm9, %v2750_v63, %v2751_v21  ;;  %v3086_v37 = vld [vmem:[#allocation2 + $0x34] sm:$0xf] }
 0x112   : > { %v2702_v7 = vrot.slane %v2591_v52, 5  ;;  %v810_v6 = vld [vmem:[#allocation2 + $0x98] sm:$0x1]  ;;  %v5822_v30 = vpop.permute.xlu0 %1795  ;;  %v5824_v35 = vrot.slane %v2364_v41, 4  ;;  %v476_v40 = vshrl.u32 %v381_v42, 16  ;;  %v479_v23 = vshll.u32 %v381_v42, 16 }
 0x113   : > { %v2177_v22 = vrot.slane %v2175_v3, 5  ;;  %v811_v55 = vsel %vm5283_vm5, %v610_v19, %v810_v6  ;;  %v2354_v14 = vor.u32 %v2353_v5, %v2350_v59  ;;  %v4550_v19 = vrot.slane %v5788_v60, 9  ;;  %v3087_v46 = vld [vmem:[#allocation2 + $0x38] sm:$0x1]  ;;  %v4856_v13 = vld [vmem:[#allocation8 + $0x38] sm:$0xff]  }
 0x114   : > { %v5819_v24 = vsel %vm5287_vm9, %v2701_v45, %v2702_v7  ;;  %812 = vst [vmem:[#allocation2 + $0x98] sm:$0x1] %v811_v55  ;;  %v484_v50 = vshrl.u32 %v382_v4, 16  ;;  %v487_v53 = vshll.u32 %v382_v4, 16  ;;  %v3176_v25 = vshrl.u32 %v3085_v29, 16  ;;  %4689 = vmatprep.subr.bf16.mxu0 %v4856_v13  ;;  %4730 = vmatprep.subr.bf16.mxu1 %v4856_v13  ;;  %v4836_v44 = vld [vmem:[#allocation2 + $0xc] sm:$0xff]  }
 0x115   : > { %v2178_v10 = vsel %vm5309_vm12, %v2173_v51, %v2177_v22  ;;  %v4558_v39 = vcombine.low %v5803_v8, %v5819_v24  ;;  %v5835_v47 = vpop.permute.xlu1 %1811  ;;  %v2757_v57 = vrot.slane %v2755_v27, 4  ;;  %v478_v51 = vrot.slane %v476_v40, 7  ;;  %v294_v45 = vld [vmem:[#allocation2 + $0x9c] sm:$0x1]  ;;  %v397_v42 = vld [vmem:[%s5259_s11 + $0x60] sm:$0xf]  ;;  %4690 = vmatpush3.bf16.msra.mxu0 %v4856_v13  ;;  %4738 = vmatpush3.bf16.msra.mxu1 %v4856_v13 }
 0x116   : > { %v4526_v48 = vcombine.low %v2168_v12, %v2178_v10  ;;  %v3179_v49 = vshll.u32 %v3085_v29, 16  ;;  %v3185_v36 = vshll.u32 %v3086_v37, 16  ;;  %v5839_v62 = vpop.permute.xlu0 %2836  ;;  %v5842_v41 = vrot.slane %v484_v50, 7  ;;  %v5848_v7 = vld [vmem:[%s5259_s11 + $0x64] sm:$0xf]  ;;  %v4834_v13 = vld [vmem:[#allocation2] sm:$0xff]  }
 0x117   : > { %v3178_v52 = vrot.slane %v3176_v25, 4  ;;  %v3189_v63 = vshrl.u32 %v3086_v37, 16  ;;  %v3195_v21 = vshll.u32 %v3087_v46, 16  ;;  %v481_v9 = vor.u32 %v479_v23, %v478_v51  ;;  %v757_v4 = vld [vmem:[#allocation2 + $0x3c] sm:$0xf]  ;;  %v4830_v60 = vld [vmem:[#allocation2 + $0x30] sm:$0xff]  }
 0x118   : > { %2521 = vrot.lane.b32.xlu0 %v4526_v48, %s5042_s30  ;;  %v482_v3 = vrot.slane %v478_v51, 4  ;;  %v3181_v59 = vrot.slane %v3179_v49, 5  ;;  %v5845_v5 = vrot.slane %v3185_v36, 5  ;;  %v2355_v6 = vrot.slane %v2354_v14, 4  ;;  %v4835_v51 = vld [vmem:[#allocation2 + $0x60] sm:$0xff]  }
 0x119   : > { %v5850_v12 = vpop.permute.xlu1 %2852  ;;  %v489_v20 = vor.u32 %v487_v53, %v5842_v41  ;;  %v3191_v22 = vrot.slane %v3189_v63, 4  ;;  %v5853_v55 = vrot.slane %v3195_v21, 5  ;;  %v758_v10 = vsel %vm5302_vm11, %v481_v9, %v757_v4  ;;  %v4855_v4 = vld [vmem:[#allocation2 + $0x24] sm:$0xff]   ;;  %v3110_v8 = vld [vmem:[#allocation2 + $0x94] sm:$0xf] }
 0x11a   : > { %v3182_v40 = vor.u32 %v3181_v59, %v3178_v52  ;;  %v295_v23 = vsel %vm5283_vm5, 0, %v294_v45  ;;  %v612_v46 = vshrl.u32 %v397_v42, 16  ;;  %759 = vst [vmem:[#allocation2 + $0x3c] sm:$0xf] %v758_v10  ;;  %v615_v45 = vshll.u32 %v397_v42, 16  ;;  %v4850_v59 = vld [vmem:[#allocation2 + $0x18] sm:$0xff]  }
 0x11b   : > { %v2070_v29 = vld [vmem:[#allocation2 + $0x98] sm:$0x1]  ;;  %v5859_v48 = vpop.permute.xlu0 %2838  ;;  %v490_v53 = vsel %vm5322_vm13, %v482_v3, %v489_v20  ;;  %v3192_v25 = vor.u32 %v3191_v22, %v5845_v5  ;;  %296 = vst [vmem:[#allocation2 + $0x9c] sm:$0x1] %v295_v23  ;;  %v620_v28 = vshrl.u32 %v5848_v7, 16  ;;  %v2360_v52 = vsel %vm5309_vm12, %v2355_v6, %v5782_v17 }
 0x11c   : > { %v2615_v37 = vld [vmem:[#allocation2 + $0x98] sm:$0x1]  ;;  %2840 = vrot.lane.b32.xlu0 %v4557_v26, %s5041_s13  ;;  %v2367_v14 = vshll.u32 %v2070_v29, 16  ;;  %760 = vst.msk [vmem:[#allocation2 + $0x40] sm:$0xf] %vm245_vm0, %v490_v53  ;;  %v5869_v49 = vrot.slane %v3182_v40, 4  ;;  %v5888_v42 = vsel %vm5287_vm9, %v4550_v19, %v2755_v27  ;;  %v4565_v23 = vcombine.low %v5807_v16, %v5828_v31 }
 0x11d   : > { %v2758_v50 = vrot.slane %v2615_v37, 5  ;;  %v5871_v36 = vrot.slane %v612_v46, 7  ;;  %v4838_v26 = vld [vmem:[#allocation2 + $0x6c] sm:$0xff]   ;;  %v5877_v21 = vrot.slane %v3192_v25, 4  ;;  %v623_v9 = vshll.u32 %v5848_v7, 16  ;;  %v4854_v20 = vld [vmem:[#allocation2 + $0x78] sm:$0xff]  }
 0x11e   : > { %v2369_v63 = vrot.slane %v2367_v14, 5  ;;  %v5880_v3 = vpop.permute.xlu1 %2854  ;;  %v3188_v7 = vsel %vm5309_vm12, %v5869_v49, %v5845_v5  ;;  %v320_v22 = vld [vmem:[#allocation2 + $0x44] sm:$0x1]  ;;  %v5899_v29 = vld [vmem:[#allocation2 + $0x90] sm:$0xf]  ;;  %v5909_v19 = vrot.slane %v620_v28, 7 }
 0x11f   : > { %v5892_v17 = vsel %vm5287_vm9, %v2757_v57, %v2758_v50  ;;  %v617_v6 = vor.u32 %v615_v45, %v5871_v36  ;;  %v618_v27 = vrot.slane %v5871_v36, 4  ;;  %vm356_vm15 = vcmask 1047840   ;;  %v1486_v57 = vpop.permute.xlu0 %1485 }
 0x120   : > { %v2370_v56 = vsel %vm5309_vm12, %v5824_v35, %v2369_v63  ;;  %2842 = vrot.lane.b32.xlu0 %v4558_v39, %s5041_s13  ;;  %v3198_v37 = vsel %vm5309_vm12, %v5877_v21, %v5853_v55  ;;  %357 = vst.msk [vmem:[#allocation3] sm:$0xff] %vm356_vm15, %v5037_v0  ;;  %vm969_vm1 = vcmask 31744   ;;  %vm1517_vm2 = vcmask 64544   ;;  %358 = vst.msk [vmem:[#allocation3 + $0x8] sm:$0xff] %vm356_vm15, %v5037_v0  ;;  %v5952_v55 = vld [vmem:[#allocation2 + $0x98] sm:$0x1] }
 0x121   : > { %v4534_v5 = vcombine.low %v2360_v52, %v2370_v56  ;;  %359 = vst.msk [vmem:[#allocation3 + $0x10] sm:$0xff] %vm356_vm15, %v5037_v0  ;;  %360 = vst.msk [vmem:[#allocation3 + $0x18] sm:$0xff] %vm356_vm15, %v5037_v0  ;;  %v491_v24 = vrot.slane %v5842_v41, 4  ;;  %v625_v35 = vor.u32 %v623_v9, %v5909_v19  ;;  %v321_v39 = vsel %vm5348_vm14, 0, %v320_v22  ;;  %v3088_v50 = vld [vmem:[#allocation2 + $0x3c] sm:$0xf] }
 0x122   : > { %361 = vst.msk [vmem:[#allocation3 + $0x20] sm:$0xff] %vm356_vm15, %v5037_v0  ;;  %362 = vst.msk [vmem:[#allocation3 + $0x28] sm:$0xff] %vm356_vm15, %v5037_v0  ;;  %v3368_v10 = vshrl.u32 %v5899_v29, 16  ;;  %v1472_v40 = vpop.permute.xlu1 %1471  ;;  %v4566_v46 = vcombine.low %v5888_v42, %v5892_v17  ;;  %v813_v14 = vld [vmem:[#allocation2 + $0x9c] sm:$0xf]  ;;  %v4589_v25 = vcombine.low %v3188_v7, %v3198_v37  ;;  %v3381_v52 = vshrl.u32 %v3110_v8, 16 }
 0x123   : > { %363 = vst.msk [vmem:[#allocation3 + $0x30] sm:$0xff] %vm356_vm15, %v5037_v0  ;;  %364 = vst.msk [vmem:[#allocation3 + $0x38] sm:$0xff] %vm356_vm15, %v5037_v0  ;;  %2537 = vrot.lane.b32.xlu1 %v4534_v5, %s5042_s30  ;;  %v4831_v53 = vld [vmem:[#allocation2 + $0x3c] sm:$0xff]   ;;  %v626_v16 = vsel %vm5322_vm13, %v618_v27, %v625_v35  ;;  %v814_v31 = vsel %vm5302_vm11, %v617_v6, %v813_v14  ;;  %v3630_v63 = vld [vmem:[#allocation2 + $0x30] sm:$0xe]  ;;  %vm1841_vm3 = vcmask 97344  }
 0x124   : > { %365 = vst.msk [vmem:[#allocation3 + $0x40] sm:$0xff] %vm356_vm15, %v5037_v0  ;;  %366 = vst.msk [vmem:[#allocation3 + $0x48] sm:$0xff] %vm356_vm15, %v5037_v0  ;;  %3018 = vrot.lane.b32.xlu0 %v4830_v60, %s5043_s6  ;;  %v3370_v45 = vrot.slane %v3368_v10, 4  ;;  %v3383_v7 = vrot.slane %v3381_v52, 4  ;;  %v627_v6 = vrot.slane %v5909_v19, 4  ;;  %vm2018_vm4 = vcmask 130144  }
 0x125   : > { %367 = vst.msk [vmem:[#allocation3 + $0x50] sm:$0xff] %vm356_vm15, %v5037_v0  ;;  %368 = vst.msk [vmem:[#allocation3 + $0x58] sm:$0xff] %vm356_vm15, %v5037_v0  ;;  %v3632_v56 = vld [vmem:[#allocation2 + $0x38] sm:$0x1]  ;;  %v4605_v37 = vrot.slane %v3630_v63, 9  ;;  %vm2563_vm6 = vcmask 162944  }
 0x126   : > { %369 = vst.msk [vmem:[#allocation3 + $0x60] sm:$0xff] %vm356_vm15, %v5037_v0  ;;  %370 = vst.msk [vmem:[#allocation3 + $0x68] sm:$0xff] %vm356_vm15, %v5037_v0  ;;  %v344_v35 = vld [vmem:[#allocation2 + $0xa4] sm:$0x1]  ;;  %vm2884_vm7 = vcmask 195744   ;;  %vm3062_vm8 = vcmask 228544  }
 0x127   : > { %371 = vst.msk [vmem:[#allocation3 + $0x70] sm:$0xff] %vm356_vm15, %v5037_v0  ;;  %372 = vst.msk [vmem:[#allocation3 + $0x78] sm:$0xff] %vm356_vm15, %v5037_v0  ;;  %v4857_v0 = vld [vmem:[#allocation2 + $0x84] sm:$0xff]   ;;  %2856 = vrot.lane.b32.xlu1 %v4565_v23, %s5041_s13  ;;  %v999_v23 = vld [vmem:[#allocation2 + $0x34] sm:$0xf]  ;;  %vm3607_vm10 = vcmask 261344  }
 0x128   : > { %970 = vst.msk [vmem:[#allocation3] sm:$0xff] %vm969_vm1, %v4834_v13  ;;  %978 = vst.msk [vmem:[#allocation3 + $0x40] sm:$0xff] %vm969_vm1, %v4835_v51  ;;  %v3089_v13 = vld [vmem:[#allocation2 + $0x40] sm:$0xf]  ;;  %v3200_v51 = vshrl.u32 %v3088_v50, 16  ;;  %3020 = vrot.lane.b32.xlu0 %v4831_v53, %s5043_s6  ;;  %vm3928_vm15 = vcmask 294144  }
 0x129   : > { %971 = vst.msk [vmem:[#allocation3 + $0x8] sm:$0xff] %vm969_vm1, %v4836_v44  ;;  %979 = vst.msk [vmem:[#allocation3 + $0x48] sm:$0xff] %vm969_vm1, %v4838_v26  ;;  %v3209_v49 = vshll.u32 %v3089_v13, 16  ;;  %v3213_v36 = vshrl.u32 %v3089_v13, 16  ;;  %v3371_v44 = vshll.u32 %v5899_v29, 16  ;;  %v3377_v26 = vshll.u32 %v3110_v8, 16  ;;  %v1488_v60 = vpop.permute.xlu1 %1487 }
 0x12a   : > { %972 = vst.msk [vmem:[#allocation3 + $0x10] sm:$0xff] %vm969_vm1, %v4850_v59  ;;  %980 = vst.msk [vmem:[#allocation3 + $0x50] sm:$0xff] %vm969_vm1, %v4854_v20  ;;  %v3202_v28 = vrot.slane %v3200_v51, 4  ;;  %v3387_v20 = vshll.u32 %v5952_v55, 16  ;;  %v998_v55 = vld [vmem:[#allocation2 + $0x30] sm:$0xf] }
 0x12b   : > { %973 = vst.msk [vmem:[#allocation3 + $0x18] sm:$0xff] %vm969_vm1, %v4855_v4  ;;  %322 = vst [vmem:[#allocation2 + $0x44] sm:$0x1] %v321_v39  ;;  %v5979_v9 = vrot.slane %v3209_v49, 5  ;;  %v3215_v59 = vrot.slane %v3213_v36, 4  ;;  %v3373_v42 = vrot.slane %v3371_v44, 5  ;;  %2858 = vrot.lane.b32.xlu1 %v4566_v46, %s5041_s13 }
 0x12c   : > { %1518 = vst.msk [vmem:[#allocation3] sm:$0xff] %vm1517_vm2, %v5714_v34  ;;  %1526 = vst.msk [vmem:[#allocation3 + $0x40] sm:$0xff] %vm1517_vm2, %v1486_v57  ;;  %v3203_v34 = vshll.u32 %v3088_v50, 16  ;;  %v3631_v4 = vld [vmem:[#allocation2 + $0x34] sm:$0xf]  ;;  %v3379_v17 = vrot.slane %v3377_v26, 5  ;;  %3563 = vrot.lane.b32.xlu0 %v4589_v25, %s5044_s26 }
 0x12d   : > { %1519 = vst.msk [vmem:[#allocation3 + $0x8] sm:$0xff] %vm1517_vm2, %v1472_v40  ;;  %815 = vst [vmem:[#allocation2 + $0x9c] sm:$0xf] %v814_v31  ;;  %v3216_v29 = vor.u32 %v3215_v59, %v5979_v9  ;;  %v3374_v57 = vor.u32 %v3373_v42, %v3370_v45  ;;  %v3736_v8 = vrot.slane %v3631_v4, 5  ;;  %v3389_v39 = vrot.slane %v3387_v20, 5 }
 0x12e   : > { %981 = vst.msk [vmem:[#allocation3 + $0x58] sm:$0xff] %vm969_vm1, %v4857_v0  ;;  %v3205_v21 = vrot.slane %v3203_v34, 5  ;;  %v3384_v5 = vor.u32 %v3383_v7, %v3379_v17  ;;  %v345_v40 = vsel %vm5348_vm14, 0, %v344_v35  ;;  %v1134_v53 = vshrl.u32 %v998_v55, 16  ;;  %v1000_v51 = vld [vmem:[#allocation2 + $0x38] sm:$0x1] }
 0x12f   : > { %816 = vst.msk [vmem:[#allocation2 + $0xa0] sm:$0xf] %vm245_vm0, %v626_v16  ;;  %v3738_v10 = vrot.slane %v3736_v8, 4  ;;  %346 = vst [vmem:[#allocation2 + $0xa4] sm:$0x1] %v345_v40  ;;  %v1143_v59 = vshll.u32 %v999_v23, 16 }
 0x130   : > { %v3206_v22 = vor.u32 %v3205_v21, %v3202_v28  ;;  %1842 = vst.msk [vmem:[#allocation3] sm:$0xff] %vm1841_vm3, %v5689_v61  ;;  %1850 = vst.msk [vmem:[#allocation3 + $0x40] sm:$0xff] %vm1841_vm3, %v5795_v11  ;;  %v4832_v61 = vld [vmem:[#allocation2 + $0x90] sm:$0xff]   ;;  %v3385_v41 = vrot.slane %v3384_v5, 4  ;;  %v1136_v63 = vrot.slane %v1134_v53, 4  ;;  %v1137_v21 = vshll.u32 %v998_v55, 16 }
 0x131   : > { %1843 = vst.msk [vmem:[#allocation3 + $0x8] sm:$0xff] %vm1841_vm3, %v5822_v30  ;;  %v6005_v30 = vrot.slane %v3216_v29, 4  ;;  %3034 = vrot.lane.b32.xlu1 %v4832_v61, %s5043_s6  ;;  %v3654_v28 = vld [vmem:[#allocation2 + $0x90] sm:$0xe]  ;;  %v3655_v44 = vld [vmem:[#allocation2 + $0x94] sm:$0xf] }
 0x132   : > { %v761_v27 = vld [vmem:[#allocation2 + $0x44] sm:$0x1]  ;;  %2019 = vst.msk [vmem:[#allocation3] sm:$0xff] %vm2018_vm4, %v5737_v15  ;;  %2027 = vst.msk [vmem:[#allocation3 + $0x40] sm:$0xff] %vm2018_vm4, %v5734_v58  ;;  %v6003_v15 = vrot.slane %v3206_v22, 4  ;;  %v3375_v58 = vrot.slane %v3374_v57, 4  ;;  %v3390_v16 = vsel %vm5309_vm12, %v3385_v41, %v3389_v39 }
 0x133   : > { %2020 = vst.msk [vmem:[#allocation3 + $0x8] sm:$0xff] %vm2018_vm4, %v5780_v43  ;;  %v762_v11 = vsel %vm5283_vm5, %v491_v24, %v761_v27  ;;  %v3739_v43 = vrot.slane %v3632_v56, 5  ;;  %v6014_v24 = vsel %vm5287_vm9, %v4605_v37, %v3736_v8  ;;  %v1147_v20 = vshrl.u32 %v999_v23, 16  ;;  %v3656_v42 = vld [vmem:[#allocation2 + $0x98] sm:$0x1] }
 0x134   : > { %1527 = vst.msk [vmem:[#allocation3 + $0x48] sm:$0xff] %vm1517_vm2, %v1488_v60  ;;  %763 = vst [vmem:[#allocation2 + $0x44] sm:$0x1] %v762_v11  ;;  %v3112_v0 = vld [vmem:[#allocation2 + $0x9c] sm:$0xf]  ;;  %v3212_v25 = vsel %vm5309_vm12, %v6003_v15, %v5979_v9  ;;  %v1153_v4 = vshll.u32 %v1000_v51, 16 }
 0x135   : > { %1851 = vst.msk [vmem:[#allocation3 + $0x48] sm:$0xff] %vm1841_vm3, %v5835_v47  ;;  %v3380_v47 = vsel %vm5309_vm12, %v3375_v58, %v3379_v17  ;;  %v3392_v14 = vshrl.u32 %v3112_v0, 16  ;;  %v3395_v50 = vshll.u32 %v3112_v0, 16  ;;  %v6029_v49 = vsel %vm5287_vm9, %v3738_v10, %v3739_v43  ;;  %v3633_v17 = vld [vmem:[#allocation2 + $0x3c] sm:$0xe]  ;;  %v6041_v58 = vpop.permute.xlu0 %2515 }
 0x136   : > { %2028 = vst.msk [vmem:[#allocation3 + $0x48] sm:$0xff] %vm2018_vm4, %v5762_v33  ;;  %v3113_v46 = vld [vmem:[#allocation2 + $0xa0] sm:$0xf]  ;;  %v4597_v34 = vcombine.low %v3380_v47, %v3390_v16  ;;  %v1139_v29 = vrot.slane %v1137_v21, 5  ;;  %v4613_v56 = vrot.slane %v3654_v28, 9  ;;  %v3792_v60 = vrot.slane %v3655_v44, 5 }
 0x137   : > { %v4833_v33 = vld [vmem:[#allocation2 + $0x9c] sm:$0xff]   ;;  %v3401_v31 = vshll.u32 %v3113_v46, 16  ;;  %v3405_v13 = vshrl.u32 %v3113_v46, 16  ;;  %v3394_v36 = vrot.slane %v3392_v14, 4  ;;  %v3397_v45 = vrot.slane %v3395_v50, 5  ;;  %2564 = vst.msk [vmem:[#allocation3] sm:$0xff] %vm2563_vm6, %v6041_v58 }
 0x138   : > { %3036 = vrot.lane.b32.xlu1 %v4833_v33, %s5043_s6  ;;  %v1145_v5 = vrot.slane %v1143_v59, 5  ;;  %v1149_v37 = vrot.slane %v1147_v20, 4  ;;  %v3634_v8 = vld [vmem:[#allocation2 + $0x40] sm:$0xf]  ;;  %v4621_v35 = vcombine.low %v6014_v24, %v6029_v49  ;;  %v817_v61 = vld [vmem:[#allocation2 + $0xa4] sm:$0x1]  ;;  %v1140_v15 = vor.u32 %v1139_v29, %v1136_v63 }
 0x139   : > { %v6031_v26 = vrot.slane %v3401_v31, 5  ;;  %v3407_v52 = vrot.slane %v3405_v13, 4  ;;  %v3398_v9 = vor.u32 %v3397_v45, %v3394_v36  ;;  %v1155_v39 = vrot.slane %v1153_v4, 5  ;;  %v1022_v24 = vld [vmem:[#allocation2 + $0x90] sm:$0xf]  ;;  %v6072_v63 = vpop.permute.xlu0 %2517  ;;  %2885 = vst.msk [vmem:[#allocation3] sm:$0xff] %vm2884_vm7, %v5839_v62 }
 0x13a   : > { %v818_v41 = vsel %vm5283_vm5, %v627_v6, %v817_v61  ;;  %v1150_v10 = vor.u32 %v1149_v37, %v1145_v5  ;;  %v6049_v40 = vsel %vm5287_vm9, %v4613_v56, %v3792_v60  ;;  %v1023_v0 = vld [vmem:[#allocation2 + $0x94] sm:$0xf]  ;;  %v1141_v23 = vrot.slane %v1140_v15, 4  ;;  %v1024_v13 = vld [vmem:[#allocation2 + $0x98] sm:$0x1]  ;;  %2565 = vst.msk [vmem:[#allocation3 + $0x8] sm:$0xff] %vm2563_vm6, %v6072_v63 }
 0x13b   : > { %v3090_v7 = vld [vmem:[#allocation2 + $0x44] sm:$0x1]  ;;  %v3408_v22 = vor.u32 %v3407_v52, %v6031_v26  ;;  %v6035_v57 = vrot.slane %v3398_v9, 4  ;;  %819 = vst [vmem:[#allocation2 + $0xa4] sm:$0x1] %v818_v41  ;;  %v3794_v47 = vrot.slane %v3792_v60, 4 }
 0x13c   : > { %v3219_v27 = vshll.u32 %v3090_v7, 16  ;;  %v3635_v55 = vld [vmem:[#allocation2 + $0x44] sm:$0x1]  ;;  %3579 = vrot.lane.b32.xlu1 %v4597_v34, %s5044_s26  ;;  %v3795_v46 = vrot.slane %v3656_v42, 5  ;;  %v4606_v14 = vrot.slane %v3633_v17, 9  ;;  %v1151_v50 = vrot.slane %v1150_v10, 4 }
 0x13d   : > { %v6039_v11 = vrot.slane %v3408_v22, 4  ;;  %v3743_v6 = vrot.slane %v3634_v8, 5  ;;  %v3746_v53 = vrot.slane %v3635_v55, 5  ;;  %v3404_v16 = vsel %vm5309_vm12, %v6035_v57, %v6031_v26  ;;  %v1001_v34 = vld [vmem:[#allocation2 + $0x3c] sm:$0xf]  ;;  %v6080_v8 = vpop.permute.xlu1 %2531  ;;  %v6083_v41 = vpop.permute.xlu0 %3014  ;;  %2886 = vst.msk [vmem:[#allocation3 + $0x8] sm:$0xff] %vm2884_vm7, %v5859_v48 }
 0x13e   : > { %v3221_v43 = vrot.slane %v3219_v27, 5  ;;  %v1146_v31 = vsel %vm5309_vm12, %v1141_v23, %v1145_v5  ;;  %v1326_v51 = vshrl.u32 %v1022_v24, 16  ;;  %v1156_v49 = vsel %vm5309_vm12, %v1151_v50, %v1155_v39  ;;  %v1002_v52 = vld [vmem:[#allocation2 + $0x40] sm:$0xf]  ;;  %v3657_v4 = vld [vmem:[#allocation2 + $0x9c] sm:$0xe] }
 0x13f   : > { %v3745_v36 = vrot.slane %v3743_v6, 4  ;;  %v4463_v45 = vcombine.low %v1146_v31, %v1156_v49  ;;  %v1329_v44 = vshll.u32 %v1022_v24, 16  ;;  %v1335_v26 = vshll.u32 %v1023_v0, 16  ;;  %v1003_v22 = vld [vmem:[#allocation2 + $0x44] sm:$0x1]  ;;  %2572 = vst.msk [vmem:[#allocation3 + $0x40] sm:$0xff] %vm2563_vm6, %v6080_v8 }
 0x140   : > { %v3222_v19 = vsel %vm5309_vm12, %v6005_v30, %v3221_v43  ;;  %v6065_v30 = vsel %vm5287_vm9, %v3794_v47, %v3795_v46  ;;  %v1328_v28 = vrot.slane %v1326_v51, 4  ;;  %v1339_v9 = vshrl.u32 %v1023_v0, 16  ;;  %v3658_v56 = vld [vmem:[#allocation2 + $0xa0] sm:$0xf]  ;;  %v1546_v50 = vld [vmem:[#allocation2 + $0x30] sm:$0xe] }
 0x141   : > { %v4590_v33 = vcombine.low %v3212_v25, %v3222_v19  ;;  %v6069_v25 = vsel %vm5287_vm9, %v4606_v14, %v3743_v6  ;;  %v6076_v21 = vsel %vm5287_vm9, %v3745_v36, %v3746_v53  ;;  %v1345_v59 = vshll.u32 %v1024_v13, 16  ;;  %v1547_v31 = vld [vmem:[#allocation2 + $0x34] sm:$0xf]  ;;  %v1025_v36 = vld [vmem:[#allocation2 + $0x9c] sm:$0xf]  ;;  %2893 = vst.msk [vmem:[#allocation3 + $0x40] sm:$0xff] %vm2884_vm7, %v5850_v12 }
 0x142   : > { %v1158_v20 = vshrl.u32 %v1001_v34, 16  ;;  %v4622_v42 = vcombine.low %v6069_v25, %v6076_v21  ;;  %v1331_v17 = vrot.slane %v1329_v44, 5  ;;  %v1337_v7 = vrot.slane %v1335_v26, 5  ;;  %v3114_v60 = vld [vmem:[#allocation2 + $0xa4] sm:$0x1]  ;;  %3063 = vst.msk [vmem:[#allocation3] sm:$0xff] %vm3062_vm8, %v6083_v41 }
 0x143   : > { %3565 = vrot.lane.b32.xlu0 %v4590_v33, %s5044_s26  ;;  %v1161_v29 = vshll.u32 %v1001_v34, 16  ;;  %v1341_v27 = vrot.slane %v1339_v9, 4  ;;  %v1347_v57 = vrot.slane %v1345_v59, 5  ;;  %v1167_v37 = vshll.u32 %v1002_v52, 16  ;;  %v3659_v43 = vld [vmem:[#allocation2 + $0xa4] sm:$0x1]  ;;  %v6095_v9 = vpop.permute.xlu1 %2533 }
 0x144   : > { %v1160_v5 = vrot.slane %v1158_v20, 4  ;;  %v3411_v61 = vshll.u32 %v3114_v60, 16  ;;  %v1332_v15 = vor.u32 %v1331_v17, %v1328_v28  ;;  %v1171_v55 = vshrl.u32 %v1002_v52, 16  ;;  %v1548_v25 = vld [vmem:[#allocation2 + $0x38] sm:$0x1]  ;;  %v6103_v17 = vpop.permute.xlu0 %3016  ;;  %2573 = vst.msk [vmem:[#allocation3 + $0x48] sm:$0xff] %vm2563_vm6, %v6095_v9 }
 0x145   : > { %v1163_v39 = vrot.slane %v1161_v29, 5  ;;  %v1342_v10 = vor.u32 %v1341_v27, %v1337_v7  ;;  %v1169_v24 = vrot.slane %v1167_v37, 5  ;;  %v1177_v0 = vshll.u32 %v1003_v22, 16  ;;  %v1026_v21 = vld [vmem:[#allocation2 + $0xa0] sm:$0xf]  ;;  %2894 = vst.msk [vmem:[#allocation3 + $0x48] sm:$0xff] %vm2884_vm7, %v5880_v3 }
 0x146   : > { %v4614_v23 = vrot.slane %v3657_v4, 9  ;;  %v3413_v47 = vrot.slane %v3411_v61, 5  ;;  %v1333_v46 = vrot.slane %v1332_v15, 4  ;;  %v1173_v19 = vrot.slane %v1171_v55, 4  ;;  %v1550_v4 = vld [vmem:[#allocation2 + $0x40] sm:$0xf] }
 0x147   : > { %3884 = vrot.lane.b32.xlu0 %v4621_v35, %s5045_s7  ;;  %v1164_v14 = vor.u32 %v1163_v39, %v1160_v5  ;;  %v1343_v6 = vrot.slane %v1342_v10, 4  ;;  %v1179_v53 = vrot.slane %v1177_v0, 5  ;;  %v3799_v33 = vrot.slane %v3658_v56, 5  ;;  %v1027_v22 = vld [vmem:[#allocation2 + $0xa4] sm:$0x1]  ;;  %3064 = vst.msk [vmem:[#allocation3 + $0x8] sm:$0xff] %vm3062_vm8, %v6103_v17 }
 0x148   : > { %v3802_v35 = vrot.slane %v3659_v43, 5  ;;  %v3414_v13 = vsel %vm5309_vm12, %v6039_v11, %v3413_v47  ;;  %v1338_v51 = vsel %vm5309_vm12, %v1333_v46, %v1337_v7  ;;  %v1174_v49 = vor.u32 %v1173_v19, %v1169_v24  ;;  %v1551_v5 = vld [vmem:[#allocation2 + $0x44] sm:$0x1]  ;;  %v1570_v37 = vld [vmem:[#allocation2 + $0x90] sm:$0xe]  ;;  %v4840_v12 = vld [vmem:[#allocation2 + $0x9c] sm:$0xff]  }
 0x149   : > { %v1165_v34 = vrot.slane %v1164_v14, 4  ;;  %v4598_v28 = vcombine.low %v3404_v16, %v3414_v13  ;;  %v4629_v44 = vcombine.low %v6049_v40, %v6065_v30  ;;  %v1348_v26 = vsel %vm5309_vm12, %v1343_v6, %v1347_v57  ;;  %v1549_v16 = vld [vmem:[#allocation2 + $0x3c] sm:$0xe]  ;;  %v1571_v61 = vld [vmem:[#allocation2 + $0x94] sm:$0xf] }
 0x14a   : > { %v3801_v52 = vrot.slane %v3799_v33, 4  ;;  %v6101_v59 = vsel %vm5287_vm9, %v4614_v23, %v3799_v33  ;;  %v4479_v20 = vrot.slane %v1546_v50, 9  ;;  %v4471_v40 = vcombine.low %v1338_v51, %v1348_v26  ;;  %v1572_v10 = vld [vmem:[#allocation2 + $0x98] sm:$0x1]  ;;  %v6118_v50 = vpop.permute.xlu1 %3030  ;;  %v273_v13 = vld [vmem:[#allocation2 + $0x48] sm:$0x1] }
 0x14b   : > { %1477 = vrot.lane.b32.xlu0 %v4463_v45, %s5039_s24  ;;  %v1170_v11 = vsel %vm5309_vm12, %v1165_v34, %v1169_v24  ;;  %v1175_v45 = vrot.slane %v1174_v49, 4  ;;  %3581 = vrot.lane.b32.xlu1 %v4598_v28, %s5044_s26  ;;  %v1663_v30 = vrot.slane %v1547_v31, 5  ;;  %v1666_v7 = vrot.slane %v1548_v25, 5  ;;  %v1573_v31 = vld [vmem:[#allocation2 + $0x9c] sm:$0xe]  ;;  %v6122_v34 = vpop.permute.xlu0 %3559  ;;  %3071 = vst.msk [vmem:[#allocation3 + $0x40] sm:$0xff] %vm3062_vm8, %v6118_v50 }
 0x14c   : > { %v1350_v29 = vshrl.u32 %v1025_v36, 16  ;;  %v6111_v60 = vsel %vm5287_vm9, %v3801_v52, %v3802_v35  ;;  %v1353_v27 = vshll.u32 %v1025_v36, 16  ;;  %v1359_v57 = vshll.u32 %v1026_v21, 16  ;;  %v383_v51 = vld [vmem:[%s5259_s11 + $0x28] sm:$0xf]  ;;  %3608 = vst.msk [vmem:[#allocation3] sm:$0xff] %vm3607_vm10, %v6122_v34 }
 0x14d   : > { %v1180_v56 = vsel %vm5309_vm12, %v1175_v45, %v1179_v53  ;;  %v1664_v39 = vsel %vm5287_vm9, %v4479_v20, %v1663_v30  ;;  %v1665_v55 = vrot.slane %v1663_v30, 4  ;;  %v1363_v0 = vshrl.u32 %v1026_v21, 16  ;;  %v384_v45 = vld [vmem:[%s5259_s11 + $0x2c] sm:$0xf] }
 0x14e   : > { %v4464_v15 = vcombine.low %v1170_v11, %v1180_v56  ;;  %v1352_v43 = vrot.slane %v1350_v29, 4  ;;  %v1361_v24 = vrot.slane %v1359_v57, 5  ;;  %v1369_v23 = vshll.u32 %v1027_v22, 16  ;;  %v1575_v11 = vld [vmem:[#allocation2 + $0xa4] sm:$0x1] }
 0x14f   : > { %3886 = vrot.lane.b32.xlu0 %v4622_v42, %s5045_s7  ;;  %v1355_v42 = vrot.slane %v1353_v27, 5  ;;  %3900 = vrot.lane.b32.xlu1 %v4629_v44, %s5045_s7  ;;  %v1667_v47 = vsel %vm5287_vm9, %v1665_v55, %v1666_v7  ;;  %v4480_v46 = vrot.slane %v1549_v16, 9  ;;  %v1670_v14 = vrot.slane %v1550_v4, 5  ;;  %v1574_v44 = vld [vmem:[#allocation2 + $0xa0] sm:$0xf]  ;;  %v6147_v27 = vpop.permute.xlu1 %3032 }
 0x150   : > { %v1673_v19 = vrot.slane %v1551_v5, 5  ;;  %v4495_v6 = vcombine.low %v1664_v39, %v1667_v47  ;;  %v1365_v33 = vrot.slane %v1363_v0, 4  ;;  %v1371_v35 = vrot.slane %v1369_v23, 5  ;;  %v2047_v7 = vld [vmem:[#allocation2 + $0x3c] sm:$0xf]  ;;  %3072 = vst.msk [vmem:[#allocation3 + $0x48] sm:$0xff] %vm3062_vm8, %v6147_v27 }
 0x151   : > { %v1356_v53 = vor.u32 %v1355_v42, %v1352_v43  ;;  %v1671_v49 = vsel %vm5287_vm9, %v4480_v46, %v1670_v14  ;;  %v1672_v25 = vrot.slane %v1670_v14, 4  ;;  %v4487_v36 = vrot.slane %v1570_v37, 9  ;;  %v6157_v39 = vpop.permute.xlu0 %3561  ;;  %v4837_v0 = vld [vmem:[#allocation2 + $0x3c] sm:$0xff]  }
 0x152   : > { %v1719_v28 = vrot.slane %v1571_v61, 5  ;;  %v1366_v52 = vor.u32 %v1365_v33, %v1361_v24  ;;  %v1722_v21 = vrot.slane %v1572_v10, 5  ;;  %v4630_v20 = vcombine.low %v6101_v59, %v6111_v60  ;;  %v2048_v60 = vld [vmem:[#allocation2 + $0x40] sm:$0xf]  ;;  %v2049_v61 = vld [vmem:[#allocation2 + $0x44] sm:$0x1] }
 0x153   : > { %1479 = vrot.lane.b32.xlu0 %v4464_v15, %s5039_s24  ;;  %v1357_v26 = vrot.slane %v1356_v53, 4  ;;  %1493 = vrot.lane.b32.xlu1 %v4471_v40, %s5039_s24  ;;  %v1674_v16 = vsel %vm5287_vm9, %v1672_v25, %v1673_v19  ;;  %v4488_v30 = vrot.slane %v1573_v31, 9  ;;  %v1726_v29 = vrot.slane %v1574_v44, 5  ;;  %v297_v15 = vld [vmem:[#allocation2 + $0xa8] sm:$0x1]  ;;  %3609 = vst.msk [vmem:[#allocation3 + $0x8] sm:$0xff] %vm3607_vm10, %v6157_v39 }
 0x154   : > { %v1721_v4 = vrot.slane %v1719_v28, 4  ;;  %v1367_v40 = vrot.slane %v1366_v52, 4  ;;  %v4496_v22 = vcombine.low %v1671_v49, %v1674_v16  ;;  %v1720_v58 = vsel %vm5287_vm9, %v4487_v36, %v1719_v28  ;;  %v6177_v52 = vpop.permute.xlu1 %3575 }
 0x155   : > { %v1362_v59 = vsel %vm5309_vm12, %v1357_v26, %v1361_v24  ;;  %v1729_v56 = vrot.slane %v1575_v11, 5  ;;  %v274_v63 = vsel %vm5283_vm5, 0, %v273_v13  ;;  %v493_v8 = vshrl.u32 %v383_v51, 16  ;;  %v399_v24 = vld [vmem:[%s5259_s11 + $0x68] sm:$0xf]  ;;  %v6169_v25 = vpop.permute.xlu0 %3880  ;;  %3616 = vst.msk [vmem:[#allocation3 + $0x40] sm:$0xff] %vm3607_vm10, %v6177_v52 }
 0x156   : > { %v1372_v9 = vsel %vm5309_vm12, %v1367_v40, %v1371_v35  ;;  %v1723_v57 = vsel %vm5287_vm9, %v1721_v4, %v1722_v21  ;;  %v6155_v5 = vsel %vm5287_vm9, %v4488_v30, %v1726_v29  ;;  %v1728_v37 = vrot.slane %v1726_v29, 4  ;;  %275 = vst [vmem:[#allocation2 + $0x48] sm:$0x1] %v274_v63  ;;  %v400_v35 = vld [vmem:[%s5259_s11 + $0x6c] sm:$0xf]  ;;  %3929 = vst.msk [vmem:[#allocation3] sm:$0xff] %vm3928_vm15, %v6169_v25 }
 0x157   : > { %1801 = vrot.lane.b32.xlu0 %v4495_v6, %s5038_s22  ;;  %3902 = vrot.lane.b32.xlu1 %v4630_v20, %s5045_s7  ;;  %v4472_v55 = vcombine.low %v1362_v59, %v1372_v9  ;;  %v495_v43 = vrot.slane %v493_v8, 7  ;;  %v496_v10 = vshll.u32 %v383_v51, 16  ;;  %v501_v42 = vshrl.u32 %v384_v45, 16  ;;  %v2071_v63 = vld [vmem:[#allocation2 + $0x9c] sm:$0xf] }
 0x158   : > { %v6164_v23 = vsel %vm5287_vm9, %v1728_v37, %v1729_v56  ;;  %v504_v47 = vshll.u32 %v384_v45, 16  ;;  %v2180_v46 = vshrl.u32 %v2047_v7, 16  ;;  %v2183_v14 = vshll.u32 %v2047_v7, 16  ;;  %v323_v56 = vld [vmem:[#allocation2 + $0x50] sm:$0x1] }
 0x159   : > { %v4503_v19 = vcombine.low %v1720_v58, %v1723_v57  ;;  %v498_v6 = vor.u32 %v496_v10, %v495_v43  ;;  %v499_v53 = vrot.slane %v495_v43, 4  ;;  %v6166_v33 = vrot.slane %v501_v42, 7  ;;  %v1474_v8 = vpop.permute.xlu0 %1473  ;;  %v2072_v57 = vld [vmem:[#allocation2 + $0xa0] sm:$0xf]  ;;  %v276_v52 = vld [vmem:[#allocation2 + $0x54] sm:$0x1] }
 0x15a   : > { %v2182_v31 = vrot.slane %v2180_v46, 4  ;;  %v2185_v13 = vrot.slane %v2183_v14, 5  ;;  %v2189_v51 = vshll.u32 %v2048_v60, 16  ;;  %v2193_v49 = vshrl.u32 %v2048_v60, 16  ;;  %1520 = vst.msk [vmem:[#allocation3 + $0x10] sm:$0xff] %vm1517_vm2, %v1474_v8 }
 0x15b   : > { %1803 = vrot.lane.b32.xlu0 %v4496_v22, %s5038_s22  ;;  %1495 = vrot.lane.b32.xlu1 %v4472_v55, %s5039_s24  ;;  %v4504_v36 = vcombine.low %v6155_v5, %v6164_v23  ;;  %v506_v28 = vor.u32 %v504_v47, %v6166_v33  ;;  %v2199_v44 = vshll.u32 %v2049_v61, 16  ;;  %v298_v26 = vsel %vm5283_vm5, 0, %v297_v15  ;;  %v2073_v15 = vld [vmem:[#allocation2 + $0xa4] sm:$0x1]  ;;  %v2592_v47 = vld [vmem:[#allocation2 + $0x3c] sm:$0xe] }
 0x15c   : > { %v2186_v21 = vor.u32 %v2185_v13, %v2182_v31  ;;  %v6180_v11 = vrot.slane %v2189_v51, 5  ;;  %v2195_v45 = vrot.slane %v2193_v49, 4  ;;  %299 = vst [vmem:[#allocation2 + $0xa8] sm:$0x1] %v298_v26  ;;  %v629_v20 = vshrl.u32 %v399_v24, 16  ;;  %v6213_v62 = vpop.permute.xlu1 %3577 }
 0x15d   : > { %v507_v16 = vsel %vm5322_vm13, %v499_v53, %v506_v28  ;;  %v764_v4 = vld [vmem:[#allocation2 + $0x48] sm:$0xf]  ;;  %v6184_v30 = vrot.slane %v2199_v44, 5  ;;  %v632_v7 = vshll.u32 %v399_v24, 16  ;;  %v637_v59 = vshrl.u32 %v400_v35, 16  ;;  %v6218_v24 = vpop.permute.xlu0 %3882  ;;  %3617 = vst.msk [vmem:[#allocation3 + $0x48] sm:$0xff] %vm3607_vm10, %v6213_v62 }
 0x15e   : > { %v765_v40 = vsel %vm5302_vm11, %v498_v6, %v764_v4  ;;  %767 = vst.msk [vmem:[#allocation2 + $0x4c] sm:$0xf] %vm245_vm0, %v507_v16  ;;  %v2187_v22 = vrot.slane %v2186_v21, 4  ;;  %v2196_v29 = vor.u32 %v2195_v45, %v6180_v11  ;;  %v631_v58 = vrot.slane %v629_v20, 7  ;;  %v2593_v46 = vld [vmem:[#allocation2 + $0x40] sm:$0xf] }
 0x15f   : > { %1978 = vrot.lane.b32.xlu0 %v4837_v0, %s5040_s12  ;;  %1817 = vrot.lane.b32.xlu1 %v4503_v19, %s5038_s22  ;;  %766 = vst [vmem:[#allocation2 + $0x48] sm:$0xf] %v765_v40  ;;  %v6191_v60 = vrot.slane %v637_v59, 7  ;;  %v640_v9 = vshll.u32 %v400_v35, 16  ;;  %v324_v43 = vsel %vm5348_vm14, 0, %v323_v56  ;;  %v2372_v10 = vshrl.u32 %v2071_v63, 16 }
 0x160   : > { %v2197_v5 = vrot.slane %v2196_v29, 4  ;;  %v634_v37 = vor.u32 %v632_v7, %v631_v58  ;;  %v635_v61 = vrot.slane %v631_v58, 4  ;;  %v2192_v48 = vsel %vm5309_vm12, %v2187_v22, %v6180_v11  ;;  %325 = vst [vmem:[#allocation2 + $0x50] sm:$0x1] %v324_v43  ;;  %v2594_v35 = vld [vmem:[#allocation2 + $0x44] sm:$0x1]  ;;  %v6230_v49 = vpop.permute.xlu1 %3896 }
 0x161   : > { %v642_v55 = vor.u32 %v640_v9, %v6191_v60  ;;  %v2375_v3 = vshll.u32 %v2071_v63, 16  ;;  %v2381_v41 = vshll.u32 %v2072_v57, 16  ;;  %v2385_v42 = vshrl.u32 %v2072_v57, 16  ;;  %v347_v22 = vld [vmem:[#allocation2 + $0xb0] sm:$0x1]  ;;  %v4868_v62 = vld [vmem:[#allocation2 + $0x3c] sm:$0xff]  }
 0x162   : > { %v2202_v17 = vsel %vm5309_vm12, %v2197_v5, %v6184_v30  ;;  %v2374_v0 = vrot.slane %v2372_v10, 4  ;;  %v2391_v23 = vshll.u32 %v2073_v15, 16  ;;  %v508_v31 = vrot.slane %v6166_v33, 4  ;;  %v1476_v30 = vpop.permute.xlu0 %1475  ;;  %975 = vst.msk [vmem:[#allocation3 + $0x28] sm:$0xff] %vm969_vm1, %v4868_v62 }
 0x163   : > { %1819 = vrot.lane.b32.xlu1 %v4504_v36, %s5038_s22  ;;  %v643_v50 = vsel %vm5322_vm13, %v635_v61, %v642_v55  ;;  %v820_v27 = vld [vmem:[#allocation2 + $0xa8] sm:$0xf]  ;;  %v2377_v19 = vrot.slane %v2375_v3, 5  ;;  %v2383_v6 = vrot.slane %v2381_v41, 5  ;;  %v2387_v53 = vrot.slane %v2385_v42, 4  ;;  %1521 = vst.msk [vmem:[#allocation3 + $0x18] sm:$0xff] %vm1517_vm2, %v1476_v30 }
 0x164   : > { %v821_v14 = vsel %vm5302_vm11, %v634_v37, %v820_v27  ;;  %823 = vst.msk [vmem:[#allocation2 + $0xac] sm:$0xf] %vm245_vm0, %v643_v50  ;;  %v2393_v51 = vrot.slane %v2391_v23, 5  ;;  %v4527_v28 = vcombine.low %v2192_v48, %v2202_v17  ;;  %v2706_v4 = vrot.slane %v2593_v46, 5  ;;  %v1490_v9 = vpop.permute.xlu1 %1489  ;;  %v4865_v55 = vld [vmem:[#allocation2 + $0x30] sm:$0xff]  }
 0x165   : > { %822 = vst [vmem:[#allocation2 + $0xa8] sm:$0xf] %v821_v14  ;;  %v2051_v13 = vld [vmem:[#allocation2 + $0x4c] sm:$0xf]  ;;  %v2378_v21 = vor.u32 %v2377_v19, %v2374_v0  ;;  %v2388_v11 = vor.u32 %v2387_v53, %v2383_v6  ;;  %v4543_v40 = vrot.slane %v2592_v47, 9  ;;  %v2709_v8 = vrot.slane %v2594_v35, 5 }
 0x166   : > { %v4839_v36 = vld [vmem:[#allocation2 + $0x48] sm:$0xff]   ;;  %v2213_v26 = vshll.u32 %v2051_v13, 16  ;;  %v2217_v16 = vshrl.u32 %v2051_v13, 16  ;;  %v2708_v61 = vrot.slane %v2706_v4, 4  ;;  %1528 = vst.msk [vmem:[#allocation3 + $0x50] sm:$0xff] %vm1517_vm2, %v1490_v9  ;;  %v644_v43 = vrot.slane %v6191_v60, 4  ;;  %v1798_v17 = vpop.permute.xlu0 %1797 }
 0x167   : > { %v2050_v44 = vld [vmem:[#allocation2 + $0x48] sm:$0xf]  ;;  %1994 = vrot.lane.b32.xlu1 %v4840_v12, %s5040_s12  ;;  %1980 = vrot.lane.b32.xlu0 %v4839_v36, %s5040_s12  ;;  %v2379_v7 = vrot.slane %v2378_v21, 4  ;;  %v2389_v59 = vrot.slane %v2388_v11, 4  ;;  %v768_v29 = vld [vmem:[#allocation2 + $0x50] sm:$0x1]  ;;  %v6253_v27 = vsel %vm5287_vm9, %v4543_v40, %v2706_v4 }
 0x168   : > { %v2204_v45 = vshrl.u32 %v2050_v44, 16  ;;  %v2207_v20 = vshll.u32 %v2050_v44, 16  ;;  %v6234_v33 = vrot.slane %v2213_v26, 5  ;;  %v2219_v63 = vrot.slane %v2217_v16, 4  ;;  %v6243_v15 = vld [vmem:[#allocation2 + $0x4c] sm:$0xf]  ;;  %v3899_v35 = vpop.permute.xlu1 %3898 }
 0x169   : > { %v769_v57 = vsel %vm5283_vm5, %v508_v31, %v768_v29  ;;  %v2384_v5 = vsel %vm5309_vm12, %v2379_v7, %v2383_v6  ;;  %v2394_v37 = vsel %vm5309_vm12, %v2389_v59, %v2393_v51  ;;  %v348_v48 = vsel %vm5348_vm14, 0, %v347_v22  ;;  %v2616_v41 = vld [vmem:[#allocation2 + $0x9c] sm:$0xe]  ;;  %v2617_v42 = vld [vmem:[#allocation2 + $0xa0] sm:$0xf]  ;;  %1844 = vst.msk [vmem:[#allocation3 + $0x10] sm:$0xff] %vm1841_vm3, %v1798_v17 }
 0x16a   : > { %v2206_v58 = vrot.slane %v2204_v45, 4  ;;  %v2209_v56 = vrot.slane %v2207_v20, 5  ;;  %770 = vst [vmem:[#allocation2 + $0x50] sm:$0x1] %v769_v57  ;;  %v2220_v12 = vor.u32 %v2219_v63, %v6234_v33  ;;  %349 = vst [vmem:[#allocation2 + $0xb0] sm:$0x1] %v348_v48  ;;  %v4535_v46 = vcombine.low %v2384_v5, %v2394_v37  ;;  %v1800_v21 = vpop.permute.xlu0 %1799 }
 0x16b   : > { %v2075_v3 = vld [vmem:[#allocation2 + $0xac] sm:$0xf]  ;;  %2523 = vrot.lane.b32.xlu0 %v4527_v28, %s5042_s30  ;;  %974 = vst.msk [vmem:[#allocation3 + $0x20] sm:$0xff] %vm969_vm1, %v4865_v55  ;;  %v6261_v14 = vsel %vm5287_vm9, %v2708_v61, %v2709_v8  ;;  %v6263_v6 = vld [vmem:[#allocation2 + $0x48] sm:$0xe]  ;;  %v2713_v26 = vrot.slane %v6243_v15, 5 }
 0x16c   : > { %v2210_v10 = vor.u32 %v2209_v56, %v2206_v58  ;;  %v4841_v50 = vld [vmem:[#allocation2 + $0xa8] sm:$0xff]   ;;  %v2405_v23 = vshll.u32 %v2075_v3, 16  ;;  %v2618_v53 = vld [vmem:[#allocation2 + $0xa4] sm:$0x1]  ;;  %v2409_v51 = vshrl.u32 %v2075_v3, 16  ;;  %v6268_v28 = vrot.slane %v2220_v12, 4  ;;  %v1492_v40 = vpop.permute.xlu1 %1491 }
 0x16d   : > { %v2074_v0 = vld [vmem:[#allocation2 + $0xa8] sm:$0xf]  ;;  %1996 = vrot.lane.b32.xlu1 %v4841_v50, %s5040_s12  ;;  %v4867_v11 = vld [vmem:[#allocation2 + $0x90] sm:$0xff]   ;;  %v4551_v16 = vrot.slane %v2616_v41, 9  ;;  %v2762_v4 = vrot.slane %v2617_v42, 5  ;;  %1845 = vst.msk [vmem:[#allocation3 + $0x18] sm:$0xff] %vm1841_vm3, %v1800_v21  ;;  %v4559_v34 = vcombine.low %v6253_v27, %v6261_v14 }
 0x16e   : > { %v6257_v47 = vrot.slane %v2210_v10, 4  ;;  %v2396_v19 = vshrl.u32 %v2074_v0, 16  ;;  %v2399_v31 = vshll.u32 %v2074_v0, 16  ;;  %v6266_v13 = vrot.slane %v2405_v23, 5  ;;  %v2619_v36 = vld [vmem:[#allocation2 + $0xa8] sm:$0xe]  ;;  %v1975_v61 = vpop.permute.xlu0 %1974 }
 0x16f   : > { %v2411_v20 = vrot.slane %v2409_v51, 4  ;;  %v4544_v30 = vrot.slane %v6263_v6, 9  ;;  %v2715_v39 = vrot.slane %v2713_v26, 4  ;;  %v2765_v7 = vrot.slane %v2618_v53, 5  ;;  %v6283_v59 = vld [vmem:[#allocation2 + $0xac] sm:$0xf] }
 0x170   : > { %v2398_v44 = vrot.slane %v2396_v19, 4  ;;  %v2401_v45 = vrot.slane %v2399_v31, 5  ;;  %982 = vst.msk [vmem:[#allocation3 + $0x60] sm:$0xff] %vm969_vm1, %v4867_v11  ;;  %v2764_v63 = vrot.slane %v2762_v4, 4  ;;  %v4552_v8 = vrot.slane %v2619_v36, 9  ;;  %v1814_v42 = vpop.permute.xlu1 %1813 }
 0x171   : > { %v2052_v22 = vld [vmem:[#allocation2 + $0x50] sm:$0x1]  ;;  %2539 = vrot.lane.b32.xlu1 %v4535_v46, %s5042_s30  ;;  %v2412_v58 = vor.u32 %v2411_v20, %v6266_v13  ;;  %1529 = vst.msk [vmem:[#allocation3 + $0x58] sm:$0xff] %vm1517_vm2, %v1492_v40  ;;  %v6291_v37 = vsel %vm5287_vm9, %v4551_v16, %v2762_v4  ;;  %v2216_v15 = vsel %vm5309_vm12, %v6257_v47, %v6234_v33  ;;  %v2769_v12 = vrot.slane %v6283_v59, 5  ;;  %v385_v48 = vld [vmem:[%s5259_s11 + $0x30] sm:$0xf] }
 0x172   : > { %v2402_v29 = vor.u32 %v2401_v45, %v2398_v44  ;;  %v2597_v56 = vld [vmem:[#allocation2 + $0x50] sm:$0x1]  ;;  %v2223_v9 = vshll.u32 %v2052_v22, 16  ;;  %v6304_v10 = vsel %vm5287_vm9, %v2764_v63, %v2765_v7  ;;  %v386_v3 = vld [vmem:[%s5259_s11 + $0x34] sm:$0xf]  ;;  %3937 = vst.msk [vmem:[#allocation3 + $0x40] sm:$0xff] %vm3928_vm15, %v6230_v49  ;;  %v6323_v25 = vsel %vm5287_vm9, %v4544_v30, %v2713_v26 }
 0x173   : > { %v824_v57 = vld [vmem:[#allocation2 + $0xb0] sm:$0x1]  ;;  %v2716_v5 = vrot.slane %v2597_v56, 5  ;;  %3930 = vst.msk [vmem:[#allocation3 + $0x8] sm:$0xff] %vm3928_vm15, %v6218_v24  ;;  %3938 = vst.msk [vmem:[#allocation3 + $0x48] sm:$0xff] %vm3928_vm15, %v3899_v35  ;;  %v4869_v49 = vld [vmem:[#allocation2 + $0x9c] sm:$0xff]   ;;  %v4567_v17 = vcombine.low %v6291_v37, %v6304_v10  ;;  %v6333_v50 = vsel %vm5287_vm9, %v4552_v8, %v2769_v12 }
 0x174   : > { %v825_v55 = vsel %vm5283_vm5, %v644_v43, %v824_v57  ;;  %2021 = vst.msk [vmem:[#allocation3 + $0x10] sm:$0xff] %vm2018_vm4, %v1975_v61  ;;  %v2225_v60 = vrot.slane %v2223_v9, 5  ;;  %v6317_v33 = vrot.slane %v2402_v29, 4  ;;  %v6319_v43 = vrot.slane %v2412_v58, 4  ;;  %v3091_v41 = vld [vmem:[#allocation2 + $0x48] sm:$0xf]  ;;  %v1816_v20 = vpop.permute.xlu1 %1815 }
 0x175   : > { %826 = vst [vmem:[#allocation2 + $0xb0] sm:$0x1] %v825_v55  ;;  %v6327_v24 = vsel %vm5287_vm9, %v2715_v39, %v2716_v5  ;;  %v277_v0 = vsel %vm5283_vm5, 0, %v276_v52  ;;  %v3092_v23 = vld [vmem:[#allocation2 + $0x4c] sm:$0xf]  ;;  %1852 = vst.msk [vmem:[#allocation3 + $0x50] sm:$0xff] %vm1841_vm3, %v1814_v42 }
 0x176   : > { %v2226_v47 = vsel %vm5309_vm12, %v6268_v28, %v2225_v60  ;;  %278 = vst [vmem:[#allocation2 + $0x54] sm:$0x1] %v277_v0  ;;  %v510_v46 = vshrl.u32 %v385_v48, 16  ;;  %v513_v19 = vshll.u32 %v385_v48, 16  ;;  %v518_v6 = vshrl.u32 %v386_v3, 16  ;;  %983 = vst.msk [vmem:[#allocation3 + $0x68] sm:$0xff] %vm969_vm1, %v4869_v49 }
 0x177   : > { %v300_v53 = vld [vmem:[#allocation2 + $0xb4] sm:$0x1]  ;;  %v4528_v35 = vcombine.low %v2216_v15, %v2226_v47  ;;  %v521_v31 = vshll.u32 %v386_v3, 16  ;;  %v3093_v51 = vld [vmem:[#allocation2 + $0x50] sm:$0x1]  ;;  %v3224_v36 = vshrl.u32 %v3091_v41, 16  ;;  %v2408_v63 = vsel %vm5309_vm12, %v6317_v33, %v6266_v13 }
 0x178   : > { %v3227_v44 = vshll.u32 %v3091_v41, 16  ;;  %v512_v26 = vrot.slane %v510_v46, 7  ;;  %v6342_v21 = vrot.slane %v518_v6, 7  ;;  %v3233_v11 = vshll.u32 %v3092_v23, 16  ;;  %v6345_v28 = vld [vmem:[%s5259_s11 + $0x70] sm:$0xf]  ;;  %v1991_v60 = vpop.permute.xlu1 %1990 }
 0x179   : > { %v3237_v45 = vshrl.u32 %v3092_v23, 16  ;;  %2525 = vrot.lane.b32.xlu0 %v4528_v35, %s5042_s30  ;;  %v2771_v16 = vrot.slane %v2769_v12, 4  ;;  %v3226_v4 = vrot.slane %v3224_v36, 4  ;;  %v301_v39 = vsel %vm5283_vm5, 0, %v300_v53  ;;  %v6351_v7 = vld [vmem:[%s5259_s11 + $0x74] sm:$0xf]  ;;  %v1977_v14 = vpop.permute.xlu0 %1976 }
 0x17a   : > { %v3229_v30 = vrot.slane %v3227_v44, 5  ;;  %1853 = vst.msk [vmem:[#allocation3 + $0x58] sm:$0xff] %vm1841_vm3, %v1816_v20  ;;  %v515_v59 = vor.u32 %v513_v19, %v512_v26  ;;  %v516_v52 = vrot.slane %v512_v26, 4  ;;  %v523_v40 = vor.u32 %v521_v31, %v6342_v21  ;;  %302 = vst [vmem:[#allocation2 + $0xb4] sm:$0x1] %v301_v39  ;;  %v3945_v22 = vld [vmem:[#allocation3] sm:$0xff] }
 0x17b   : > { %v3243_v62 = vshll.u32 %v3093_v51, 16  ;;  %v3953_v29 = vld [vmem:[#allocation3 + $0x40] sm:$0xff]  ;;  %v3946_v58 = vld [vmem:[#allocation3 + $0x8] sm:$0xff]  ;;  %v6359_v57 = vrot.slane %v3233_v11, 5  ;;  %v3239_v5 = vrot.slane %v3237_v45, 4  ;;  %4691 = vmatprep.mubr.bf16.mxu0 %v3945_v22  ;;  %v4560_v15 = vcombine.low %v6323_v25, %v6327_v24  ;;  %2029 = vst.msk [vmem:[#allocation3 + $0x50] sm:$0xff] %vm2018_vm4, %v1991_v60 }
 0x17c   : > { %v2076_v56 = vld [vmem:[#allocation2 + $0xb0] sm:$0x1]  ;;  %v3230_v9 = vor.u32 %v3229_v30, %v3226_v4  ;;  %4707 = vmatprep.mubr.bf16.mxu1 %v3953_v29  ;;  %v524_v12 = vsel %vm5322_vm13, %v516_v52, %v523_v40  ;;  %v326_v48 = vld [vmem:[#allocation2 + $0x5c] sm:$0x1]  ;;  %4692 = vmatmul.mubr.bf16.vlgmr.msra.gmra.mrb[0].mxu0 %v3946_v58  ;;  %v3954_v3 = vld [vmem:[#allocation3 + $0x48] sm:$0xff]  ;;  %v646_v25 = vshrl.u32 %v6345_v28, 16 }
 0x17d   : > { %v2621_v8 = vld [vmem:[#allocation2 + $0xb0] sm:$0x1]  ;;  %v2415_v61 = vshll.u32 %v2076_v56, 16  ;;  %2844 = vrot.lane.b32.xlu0 %v4559_v34, %s5041_s13  ;;  %v771_v13 = vld [vmem:[#allocation2 + $0x54] sm:$0xf]  ;;  %v3240_v41 = vor.u32 %v3239_v5, %v6359_v57  ;;  %v649_v42 = vshll.u32 %v6345_v28, 16  ;;  %4708 = vmatmul.mubr.bf16.vlgmr.msra.gmra.mrb[0].mxu1 %v3954_v3  ;;  %v2520_v39 = vpop.permute.xlu0 %2519 }
 0x17e   : > { %v2772_v55 = vrot.slane %v2621_v8, 5  ;;  %774 = vst.msk [vmem:[#allocation2 + $0x58] sm:$0xf] %vm245_vm0, %v524_v12  ;;  %v3231_v33 = vrot.slane %v3230_v9, 4  ;;  %v772_v24 = vsel %vm5302_vm11, %v515_v59, %v771_v13  ;;  %v3245_v0 = vrot.slane %v3243_v62, 5  ;;  %v4846_v44 = vld [vmem:[#allocation2 + $0x48] sm:$0xff]  }
 0x17f   : > { %v2417_v49 = vrot.slane %v2415_v61, 5  ;;  %v654_v27 = vshrl.u32 %v6351_v7, 16  ;;  %v525_v23 = vrot.slane %v6342_v21, 4  ;;  %773 = vst [vmem:[#allocation2 + $0x54] sm:$0xf] %v772_v24  ;;  %v3241_v47 = vrot.slane %v3240_v41, 4  ;;  %v1993_v61 = vpop.permute.xlu1 %1992 }
 0x180   : > { %v6379_v34 = vsel %vm5287_vm9, %v2771_v16, %v2772_v55  ;;  %v648_v46 = vrot.slane %v646_v25, 7  ;;  %v3115_v19 = vld [vmem:[#allocation2 + $0xa8] sm:$0xf]  ;;  %2022 = vst.msk [vmem:[#allocation3 + $0x18] sm:$0xff] %vm2018_vm4, %v1977_v14  ;;  %v657_v35 = vshll.u32 %v6351_v7, 16  ;;  %v327_v31 = vsel %vm5348_vm14, 0, %v326_v48 }
 0x181   : > { %v2418_v6 = vsel %vm5309_vm12, %v6319_v43, %v2417_v49  ;;  %v6386_v53 = vrot.slane %v654_v27, 7  ;;  %v3116_v51 = vld [vmem:[#allocation2 + $0xac] sm:$0xf]  ;;  %2846 = vrot.lane.b32.xlu0 %v4560_v15, %s5041_s13  ;;  %v3236_v26 = vsel %vm5309_vm12, %v3231_v33, %v6359_v57  ;;  %v827_v28 = vld [vmem:[#allocation2 + $0xb4] sm:$0xf]  ;;  %v3246_v20 = vsel %vm5309_vm12, %v3241_v47, %v3245_v0  ;;  %2566 = vst.msk [vmem:[#allocation3 + $0x10] sm:$0xff] %vm2563_vm6, %v2520_v39 }
 0x182   : > { %v4536_v36 = vcombine.low %v2408_v63, %v2418_v6  ;;  %v651_v11 = vor.u32 %v649_v42, %v648_v46  ;;  %v652_v45 = vrot.slane %v648_v46, 4  ;;  %328 = vst [vmem:[#allocation2 + $0x5c] sm:$0x1] %v327_v31  ;;  %v3117_v43 = vld [vmem:[#allocation2 + $0xb0] sm:$0x1]  ;;  %v3416_v30 = vshrl.u32 %v3115_v19, 16 }
 0x183   : > { %v659_v16 = vor.u32 %v657_v35, %v6386_v53  ;;  %v661_v4 = vrot.slane %v6386_v53, 4  ;;  %v3419_v59 = vshll.u32 %v3115_v19, 16  ;;  %v3425_v52 = vshll.u32 %v3116_v51, 16  ;;  %v3636_v62 = vld [vmem:[#allocation2 + $0x48] sm:$0xe]  ;;  %2030 = vst.msk [vmem:[#allocation3 + $0x58] sm:$0xff] %vm2018_vm4, %v1993_v61  ;;  %v2536_v47 = vpop.permute.xlu1 %2535 }
 0x184   : > { %2541 = vrot.lane.b32.xlu1 %v4536_v36, %s5042_s30  ;;  %v828_v7 = vsel %vm5302_vm11, %v651_v11, %v827_v28  ;;  %v3429_v40 = vshrl.u32 %v3116_v51, 16  ;;  %v3418_v58 = vrot.slane %v3416_v30, 4  ;;  %v3435_v56 = vshll.u32 %v3117_v43, 16  ;;  %v3637_v5 = vld [vmem:[#allocation2 + $0x4c] sm:$0xf]  ;;  %2574 = vst.msk [vmem:[#allocation3 + $0x50] sm:$0xff] %vm2563_vm6, %v2536_v47 }
 0x185   : > { %v660_v22 = vsel %vm5322_vm13, %v652_v45, %v659_v16  ;;  %829 = vst [vmem:[#allocation2 + $0xb4] sm:$0xf] %v828_v7  ;;  %v3095_v29 = vld [vmem:[#allocation2 + $0x58] sm:$0xf]  ;;  %3022 = vrot.lane.b32.xlu0 %v4846_v44, %s5043_s6  ;;  %v3421_v9 = vrot.slane %v3419_v59, 5  ;;  %v3427_v57 = vrot.slane %v3425_v52, 5  ;;  %v4568_v15 = vcombine.low %v6333_v50, %v6379_v34 }
 0x186   : > { %830 = vst.msk [vmem:[#allocation2 + $0xb8] sm:$0xf] %vm245_vm0, %v660_v22  ;;  %v3257_v63 = vshll.u32 %v3095_v29, 16  ;;  %v3261_v8 = vshrl.u32 %v3095_v29, 16  ;;  %v4848_v55 = vld [vmem:[#allocation2 + $0x54] sm:$0xff]   ;;  %v4591_v12 = vcombine.low %v3236_v26, %v3246_v20  ;;  %v3431_v3 = vrot.slane %v3429_v40, 4 }
 0x187   : > { %v3094_v48 = vld [vmem:[#allocation2 + $0x54] sm:$0xf]  ;;  %v3638_v25 = vld [vmem:[#allocation2 + $0x50] sm:$0x1]  ;;  %v3422_v49 = vor.u32 %v3421_v9, %v3418_v58  ;;  %v3437_v24 = vrot.slane %v3435_v56, 5  ;;  %v4607_v0 = vrot.slane %v3636_v62, 9 }
 0x188   : > { %2860 = vrot.lane.b32.xlu1 %v4567_v17, %s5041_s13  ;;  %v3248_v60 = vshrl.u32 %v3094_v48, 16  ;;  %v3251_v13 = vshll.u32 %v3094_v48, 16  ;;  %v6414_v33 = vrot.slane %v3257_v63, 5  ;;  %v3263_v41 = vrot.slane %v3261_v8, 4  ;;  %v350_v27 = vld [vmem:[#allocation2 + $0xbc] sm:$0x1] }
 0x189   : > { %v775_v42 = vld [vmem:[#allocation2 + $0x5c] sm:$0x1]  ;;  %v3432_v50 = vor.u32 %v3431_v3, %v3427_v57  ;;  %3024 = vrot.lane.b32.xlu0 %v4848_v55, %s5043_s6  ;;  %v4849_v14 = vld [vmem:[#allocation2 + $0xa8] sm:$0xff]   ;;  %v3423_v46 = vrot.slane %v3422_v49, 4  ;;  %v3750_v6 = vrot.slane %v3637_v5, 5  ;;  %v3753_v35 = vrot.slane %v3638_v25, 5 }
 0x18a   : > { %v776_v37 = vsel %vm5283_vm5, %v525_v23, %v775_v42  ;;  %v3250_v10 = vrot.slane %v3248_v60, 4  ;;  %v3253_v17 = vrot.slane %v3251_v13, 5  ;;  %v3264_v34 = vor.u32 %v3263_v41, %v6414_v33  ;;  %v1004_v31 = vld [vmem:[#allocation2 + $0x48] sm:$0xf]  ;;  %v1005_v39 = vld [vmem:[#allocation2 + $0x4c] sm:$0xf]  ;;  %v2522_v22 = vpop.permute.xlu0 %2521 }
 0x18b   : > { %777 = vst [vmem:[#allocation2 + $0x5c] sm:$0x1] %v776_v37  ;;  %v3433_v19 = vrot.slane %v3432_v50, 4  ;;  %v351_v23 = vsel %vm5348_vm14, 0, %v350_v27  ;;  %v3428_v44 = vsel %vm5309_vm12, %v3423_v46, %v3427_v57  ;;  %v6434_v11 = vsel %vm5287_vm9, %v4607_v0, %v3750_v6  ;;  %v1006_v40 = vld [vmem:[#allocation2 + $0x50] sm:$0x1] }
 0x18c   : > { %2862 = vrot.lane.b32.xlu1 %v4568_v15, %s5041_s13  ;;  %v3254_v51 = vor.u32 %v3253_v17, %v3250_v10  ;;  %v6424_v21 = vrot.slane %v3264_v34, 4  ;;  %v3118_v36 = vld [vmem:[#allocation2 + $0xb4] sm:$0xf]  ;;  %v3752_v45 = vrot.slane %v3750_v6, 4  ;;  %352 = vst [vmem:[#allocation2 + $0xbc] sm:$0x1] %v351_v23 }
 0x18d   : > { %v3438_v26 = vsel %vm5309_vm12, %v3433_v19, %v3437_v24  ;;  %v3119_v28 = vld [vmem:[#allocation2 + $0xb8] sm:$0xf]  ;;  %3567 = vrot.lane.b32.xlu0 %v4591_v12, %s5044_s26  ;;  %v3440_v16 = vshrl.u32 %v3118_v36, 16  ;;  %v3443_v30 = vshll.u32 %v3118_v36, 16  ;;  %v1182_v62 = vshrl.u32 %v1004_v31, 16  ;;  %2567 = vst.msk [vmem:[#allocation3 + $0x18] sm:$0xff] %vm2563_vm6, %v2522_v22 }
 0x18e   : > { %v3255_v43 = vrot.slane %v3254_v51, 4  ;;  %v4599_v20 = vcombine.low %v3428_v44, %v3438_v26  ;;  %v6439_v7 = vsel %vm5287_vm9, %v3752_v45, %v3753_v35  ;;  %v3449_v59 = vshll.u32 %v3119_v28, 16  ;;  %v4852_v29 = vld [vmem:[#allocation2 + $0xb4] sm:$0xff]   ;;  %v3660_v9 = vld [vmem:[#allocation2 + $0xa8] sm:$0xe]  ;;  %v2841_v0 = vpop.permute.xlu0 %2840 }
 0x18f   : > { %v3453_v52 = vshrl.u32 %v3119_v28, 16  ;;  %v4623_v56 = vcombine.low %v6434_v11, %v6439_v7  ;;  %v3442_v63 = vrot.slane %v3440_v16, 4  ;;  %v3445_v8 = vrot.slane %v3443_v30, 5  ;;  %v3661_v55 = vld [vmem:[#allocation2 + $0xac] sm:$0xf]  ;;  %2887 = vst.msk [vmem:[#allocation3 + $0x10] sm:$0xff] %vm2884_vm7, %v2841_v0 }
 0x190   : > { %3038 = vrot.lane.b32.xlu1 %v4849_v14, %s5043_s6  ;;  %v3260_v58 = vsel %vm5309_vm12, %v3255_v43, %v6414_v33  ;;  %v6448_v57 = vrot.slane %v3449_v59, 5  ;;  %v1184_v61 = vrot.slane %v1182_v62, 4  ;;  %v1185_v15 = vshll.u32 %v1004_v31, 16  ;;  %v3662_v12 = vld [vmem:[#allocation2 + $0xb0] sm:$0x1] }
 0x191   : > { %v3455_v5 = vrot.slane %v3453_v52, 4  ;;  %v3446_v3 = vor.u32 %v3445_v8, %v3442_v63  ;;  %v1191_v60 = vshll.u32 %v1005_v39, 16  ;;  %v1195_v13 = vshrl.u32 %v1005_v39, 16  ;;  %v3640_v41 = vld [vmem:[#allocation2 + $0x58] sm:$0xf] }
 0x192   : > { %v3096_v48 = vld [vmem:[#allocation2 + $0x5c] sm:$0x1]  ;;  %v1201_v33 = vshll.u32 %v1006_v40, 16  ;;  %v1187_v49 = vrot.slane %v1185_v15, 5  ;;  %v4615_v50 = vrot.slane %v3660_v9, 9  ;;  %v3806_v31 = vrot.slane %v3661_v55, 5  ;;  %v2843_v45 = vpop.permute.xlu0 %2842 }
 0x193   : > { %v3267_v25 = vshll.u32 %v3096_v48, 16  ;;  %v3456_v42 = vor.u32 %v3455_v5, %v6448_v57  ;;  %v3639_v24 = vld [vmem:[#allocation2 + $0x54] sm:$0xe]  ;;  %v831_v27 = vld [vmem:[#allocation2 + $0xbc] sm:$0x1]  ;;  %v6452_v14 = vrot.slane %v3446_v3, 4 }
 0x194   : > { %3040 = vrot.lane.b32.xlu1 %v4852_v29, %s5043_s6  ;;  %v1193_v37 = vrot.slane %v1191_v60, 5  ;;  %v1197_v10 = vrot.slane %v1195_v13, 4  ;;  %v1203_v17 = vrot.slane %v1201_v33, 5  ;;  %v832_v47 = vsel %vm5283_vm5, %v661_v4, %v831_v27  ;;  %v3641_v23 = vld [vmem:[#allocation2 + $0x5c] sm:$0x1]  ;;  %2888 = vst.msk [vmem:[#allocation3 + $0x18] sm:$0xff] %vm2884_vm7, %v2843_v45 }
 0x195   : > { %v3269_v34 = vrot.slane %v3267_v25, 5  ;;  %v6459_v46 = vrot.slane %v3456_v42, 4  ;;  %v1188_v19 = vor.u32 %v1187_v49, %v1184_v61  ;;  %833 = vst [vmem:[#allocation2 + $0xbc] sm:$0x1] %v832_v47  ;;  %v3452_v6 = vsel %vm5309_vm12, %v6452_v14, %v6448_v57  ;;  %v1028_v36 = vld [vmem:[#allocation2 + $0xa8] sm:$0xf]  ;;  %v2538_v8 = vpop.permute.xlu1 %2537 }
 0x196   : > { %v1198_v35 = vor.u32 %v1197_v10, %v1193_v37  ;;  %v3809_v51 = vrot.slane %v3662_v12, 5  ;;  %v4608_v4 = vrot.slane %v3639_v24, 9  ;;  %v3757_v26 = vrot.slane %v3640_v41, 5  ;;  %v1029_v39 = vld [vmem:[#allocation2 + $0xac] sm:$0xf]  ;;  %2575 = vst.msk [vmem:[#allocation3 + $0x58] sm:$0xff] %vm2563_vm6, %v2538_v8  ;;  %v3019_v12 = vpop.permute.xlu0 %3018 }
 0x197   : > { %v3270_v53 = vsel %vm5309_vm12, %v6424_v21, %v3269_v34  ;;  %v1189_v44 = vrot.slane %v1188_v19, 4  ;;  %v6471_v16 = vsel %vm5287_vm9, %v4615_v50, %v3806_v31  ;;  %v3808_v30 = vrot.slane %v3806_v31, 4  ;;  %v1030_v62 = vld [vmem:[#allocation2 + $0xb0] sm:$0x1]  ;;  %v1007_v63 = vld [vmem:[#allocation2 + $0x54] sm:$0xf] }
 0x198   : > { %v4592_v28 = vcombine.low %v3260_v58, %v3270_v53  ;;  %3583 = vrot.lane.b32.xlu1 %v4599_v20, %s5044_s26  ;;  %v1199_v43 = vrot.slane %v1198_v35, 4  ;;  %v6478_v21 = vsel %vm5287_vm9, %v4608_v4, %v3757_v26  ;;  %v3759_v52 = vrot.slane %v3757_v26, 4  ;;  %v1008_v55 = vld [vmem:[#allocation2 + $0x58] sm:$0xf]  ;;  %v4870_v48 = vld [vmem:[#allocation2 + $0x48] sm:$0xff]   ;;  %3065 = vst.msk [vmem:[#allocation3 + $0x10] sm:$0xff] %vm3062_vm8, %v3019_v12 }
 0x199   : > { %v1194_v59 = vsel %vm5309_vm12, %v1189_v44, %v1193_v37  ;;  %v3760_v40 = vrot.slane %v3641_v23, 5  ;;  %v6485_v22 = vsel %vm5287_vm9, %v3808_v30, %v3809_v51  ;;  %v1374_v29 = vshrl.u32 %v1028_v36, 16  ;;  %v3663_v41 = vld [vmem:[#allocation2 + $0xb4] sm:$0xe]  ;;  %v4871_v25 = vld [vmem:[#allocation2 + $0xa8] sm:$0xff]   ;;  %976 = vst.msk [vmem:[#allocation3 + $0x30] sm:$0xff] %vm969_vm1, %v4870_v48  ;;  %v2857_v47 = vpop.permute.xlu1 %2856 }
 0x19a   : > { %3569 = vrot.lane.b32.xlu0 %v4592_v28, %s5044_s26  ;;  %v1204_v20 = vsel %vm5309_vm12, %v1199_v43, %v1203_v17  ;;  %v1377_v58 = vshll.u32 %v1028_v36, 16  ;;  %v4631_v5 = vcombine.low %v6471_v16, %v6485_v22  ;;  %v1383_v15 = vshll.u32 %v1029_v39, 16  ;;  %v1009_v17 = vld [vmem:[#allocation2 + $0x5c] sm:$0x1]  ;;  %984 = vst.msk [vmem:[#allocation3 + $0x70] sm:$0xff] %vm969_vm1, %v4871_v25  ;;  %v3021_v36 = vpop.permute.xlu0 %3020 }
 0x19b   : > { %v4465_v9 = vcombine.low %v1194_v59, %v1204_v20  ;;  %v6491_v61 = vsel %vm5287_vm9, %v3759_v52, %v3760_v40  ;;  %v1376_v60 = vrot.slane %v1374_v29, 4  ;;  %v1387_v33 = vshrl.u32 %v1029_v39, 16  ;;  %v3664_v23 = vld [vmem:[#allocation2 + $0xb8] sm:$0xf]  ;;  %2895 = vst.msk [vmem:[#allocation3 + $0x50] sm:$0xff] %vm2884_vm7, %v2857_v47 }
 0x19c   : > { %v4624_v3 = vcombine.low %v6478_v21, %v6491_v61  ;;  %v1379_v13 = vrot.slane %v1377_v58, 5  ;;  %v3120_v42 = vld [vmem:[#allocation2 + $0xbc] sm:$0x1]  ;;  %v1385_v49 = vrot.slane %v1383_v15, 5  ;;  %v1393_v50 = vshll.u32 %v1030_v62, 16  ;;  %3066 = vst.msk [vmem:[#allocation3 + $0x18] sm:$0xff] %vm3062_vm8, %v3021_v36 }
 0x19d   : > { %v1206_v24 = vshrl.u32 %v1007_v63, 16  ;;  %v1209_v0 = vshll.u32 %v1007_v63, 16  ;;  %v3459_v27 = vshll.u32 %v3120_v42, 16  ;;  %v1389_v10 = vrot.slane %v1387_v33, 4  ;;  %v3665_v28 = vld [vmem:[#allocation2 + $0xbc] sm:$0x1]  ;;  %v2859_v20 = vpop.permute.xlu1 %2858 }
 0x19e   : > { %3888 = vrot.lane.b32.xlu0 %v4623_v56, %s5045_s7  ;;  %v1380_v37 = vor.u32 %v1379_v13, %v1376_v60  ;;  %v1215_v34 = vshll.u32 %v1008_v55, 16  ;;  %v1395_v19 = vrot.slane %v1393_v50, 5  ;;  %v1219_v51 = vshrl.u32 %v1008_v55, 16  ;;  %v4872_v56 = vld [vmem:[#allocation2 + $0x54] sm:$0xff]   ;;  %v1552_v40 = vld [vmem:[#allocation2 + $0x48] sm:$0xe]  ;;  %v3564_v15 = vpop.permute.xlu0 %3563 }
 0x19f   : > { %v1208_v35 = vrot.slane %v1206_v24, 4  ;;  %v1211_v31 = vrot.slane %v1209_v0, 5  ;;  %v3461_v53 = vrot.slane %v3459_v27, 5  ;;  %v1390_v11 = vor.u32 %v1389_v10, %v1385_v49  ;;  %v1553_v62 = vld [vmem:[#allocation2 + $0x4c] sm:$0xf]  ;;  %977 = vst.msk [vmem:[#allocation3 + $0x38] sm:$0xff] %vm969_vm1, %v4872_v56 }
 0x1a0   : > { %v1381_v44 = vrot.slane %v1380_v37, 4  ;;  %v1217_v7 = vrot.slane %v1215_v34, 5  ;;  %v1221_v26 = vrot.slane %v1219_v51, 4  ;;  %v1225_v45 = vshll.u32 %v1009_v17, 16  ;;  %v1554_v8 = vld [vmem:[#allocation2 + $0x50] sm:$0x1] }
 0x1a1   : > { %v1212_v4 = vor.u32 %v1211_v31, %v1208_v35  ;;  %v4616_v43 = vrot.slane %v3663_v41, 9  ;;  %v3462_v30 = vsel %vm5309_vm12, %v6459_v46, %v3461_v53  ;;  %v1391_v59 = vrot.slane %v1390_v11, 4  ;;  %2896 = vst.msk [vmem:[#allocation3 + $0x58] sm:$0xff] %vm2884_vm7, %v2859_v20  ;;  %v1032_v13 = vld [vmem:[#allocation2 + $0xb8] sm:$0xf] }
 0x1a2   : > { %1481 = vrot.lane.b32.xlu0 %v4465_v9, %s5039_s24  ;;  %v1386_v39 = vsel %vm5309_vm12, %v1381_v44, %v1385_v49  ;;  %v3813_v52 = vrot.slane %v3664_v23, 5  ;;  %v4600_v29 = vcombine.low %v3452_v6, %v3462_v30  ;;  %v1222_v46 = vor.u32 %v1221_v26, %v1217_v7  ;;  %v1031_v9 = vld [vmem:[#allocation2 + $0xb4] sm:$0xf]  ;;  %3610 = vst.msk [vmem:[#allocation3 + $0x10] sm:$0xff] %vm3607_vm10, %v3564_v15  ;;  %v1033_v41 = vld [vmem:[#allocation2 + $0xbc] sm:$0x1] }
 0x1a3   : > { %v1213_v58 = vrot.slane %v1212_v4, 4  ;;  %v1227_v63 = vrot.slane %v1225_v45, 5  ;;  %v1396_v55 = vsel %vm5309_vm12, %v1391_v59, %v1395_v19  ;;  %v3816_v60 = vrot.slane %v3665_v28, 5  ;;  %v1555_v25 = vld [vmem:[#allocation2 + $0x54] sm:$0xe]  ;;  %v3035_v37 = vpop.permute.xlu1 %3034 }
 0x1a4   : > { %v6522_v12 = vsel %vm5287_vm9, %v4616_v43, %v3813_v52  ;;  %v3815_v48 = vrot.slane %v3813_v52, 4  ;;  %3585 = vrot.lane.b32.xlu1 %v4600_v29, %s5044_s26  ;;  %v4473_v57 = vcombine.low %v1386_v39, %v1396_v55  ;;  %v1223_v6 = vrot.slane %v1222_v46, 4  ;;  %v1556_v42 = vld [vmem:[#allocation2 + $0x58] sm:$0xf]  ;;  %v1557_v49 = vld [vmem:[#allocation2 + $0x5c] sm:$0x1] }
 0x1a5   : > { %v1218_v14 = vsel %vm5309_vm12, %v1213_v58, %v1217_v7  ;;  %v4481_v33 = vrot.slane %v1552_v40, 9  ;;  %v1677_v24 = vrot.slane %v1553_v62, 5  ;;  %v1680_v0 = vrot.slane %v1554_v8, 5  ;;  %v4873_v10 = vld [vmem:[#allocation2 + $0xb4] sm:$0xff]   ;;  %v1576_v35 = vld [vmem:[#allocation2 + $0xa8] sm:$0xe] }
 0x1a6   : > { %3890 = vrot.lane.b32.xlu0 %v4624_v3, %s5045_s7  ;;  %v6534_v50 = vsel %vm5287_vm9, %v3815_v48, %v3816_v60  ;;  %v1398_v27 = vshrl.u32 %v1031_v9, 16  ;;  %v1228_v17 = vsel %vm5309_vm12, %v1223_v6, %v1227_v63  ;;  %v1401_v47 = vshll.u32 %v1031_v9, 16  ;;  %v1577_v21 = vld [vmem:[#allocation2 + $0xac] sm:$0xf]  ;;  %3073 = vst.msk [vmem:[#allocation3 + $0x50] sm:$0xff] %vm3062_vm8, %v3035_v37 }
 0x1a7   : > { %v4632_v34 = vcombine.low %v6522_v12, %v6534_v50  ;;  %v1407_v19 = vshll.u32 %v1032_v13, 16  ;;  %v4466_v61 = vcombine.low %v1218_v14, %v1228_v17  ;;  %v1678_v3 = vsel %vm5287_vm9, %v4481_v33, %v1677_v24  ;;  %v1578_v23 = vld [vmem:[#allocation2 + $0xb0] sm:$0x1]  ;;  %v1579_v36 = vld [vmem:[#allocation2 + $0xb4] sm:$0xe]  ;;  %985 = vst.msk [vmem:[#allocation3 + $0x78] sm:$0xff] %vm969_vm1, %v4873_v10 }
 0x1a8   : > { %v1679_v31 = vrot.slane %v1677_v24, 4  ;;  %v1400_v51 = vrot.slane %v1398_v27, 4  ;;  %3904 = vrot.lane.b32.xlu1 %v4631_v5, %s5045_s7  ;;  %v1403_v53 = vrot.slane %v1401_v47, 5  ;;  %v1411_v11 = vshrl.u32 %v1032_v13, 16  ;;  %v1580_v28 = vld [vmem:[#allocation2 + $0xb8] sm:$0xf] }
 0x1a9   : > { %v1409_v44 = vrot.slane %v1407_v19, 5  ;;  %v1417_v7 = vshll.u32 %v1033_v41, 16  ;;  %v4482_v4 = vrot.slane %v1555_v25, 9  ;;  %v1684_v26 = vrot.slane %v1556_v42, 5  ;;  %v1581_v16 = vld [vmem:[#allocation2 + $0xbc] sm:$0x1] }
 0x1aa   : > { %1483 = vrot.lane.b32.xlu0 %v4466_v61, %s5039_s24  ;;  %v1681_v56 = vsel %vm5287_vm9, %v1679_v31, %v1680_v0  ;;  %v1687_v45 = vrot.slane %v1557_v49, 5  ;;  %v3037_v43 = vpop.permute.xlu1 %3036  ;;  %v1404_v39 = vor.u32 %v1403_v53, %v1400_v51  ;;  %v1413_v59 = vrot.slane %v1411_v11, 4  ;;  %v2053_v22 = vld [vmem:[#allocation2 + $0x54] sm:$0xf]  ;;  %v2054_v29 = vld [vmem:[#allocation2 + $0x58] sm:$0xf] }
 0x1ab   : > { %v4497_v30 = vcombine.low %v1678_v3, %v1681_v56  ;;  %v1419_v52 = vrot.slane %v1417_v7, 5  ;;  %3074 = vst.msk [vmem:[#allocation3 + $0x58] sm:$0xff] %vm3062_vm8, %v3037_v43  ;;  %v1685_v5 = vsel %vm5287_vm9, %v4482_v4, %v1684_v26  ;;  %v1686_v40 = vrot.slane %v1684_v26, 4  ;;  %v303_v6 = vld [vmem:[#allocation2 + $0xc0] sm:$0x1]  ;;  %v4858_v17 = vld [vmem:[#allocation2 + $0x54] sm:$0xff]  }
 0x1ac   : > { %v4489_v62 = vrot.slane %v1576_v35, 9  ;;  %v1733_v20 = vrot.slane %v1577_v21, 5  ;;  %1497 = vrot.lane.b32.xlu1 %v4473_v57, %s5039_s24  ;;  %v1405_v58 = vrot.slane %v1404_v39, 4  ;;  %v1414_v46 = vor.u32 %v1413_v59, %v1409_v44  ;;  %v2055_v25 = vld [vmem:[#allocation2 + $0x5c] sm:$0x1] }
 0x1ad   : > { %v1736_v63 = vrot.slane %v1578_v23, 5  ;;  %v4490_v8 = vrot.slane %v1579_v36, 9  ;;  %v1688_v9 = vsel %vm5287_vm9, %v1686_v40, %v1687_v45  ;;  %v1740_v12 = vrot.slane %v1580_v28, 5  ;;  %v403_v27 = vld [vmem:[%s5259_s11 + $0x78] sm:$0xf]  ;;  %v4859_v28 = vld [vmem:[#allocation2 + $0x60] sm:$0xff]  }
 0x1ae   : > { %1805 = vrot.lane.b32.xlu0 %v4497_v30, %s5038_s22  ;;  %v6560_v15 = vsel %vm5287_vm9, %v4489_v62, %v1733_v20  ;;  %v1735_v55 = vrot.slane %v1733_v20, 4  ;;  %v3580_v48 = vpop.permute.xlu1 %3579  ;;  %v1410_v60 = vsel %vm5309_vm12, %v1405_v58, %v1409_v44  ;;  %v1415_v13 = vrot.slane %v1414_v46, 4  ;;  %v404_v35 = vld [vmem:[%s5259_s11 + $0x7c] sm:$0xf]  ;;  %v2056_v51 = vld [vmem:[#allocation2 + $0x60] sm:$0xf] }
 0x1af   : > { %v4498_v57 = vcombine.low %v1685_v5, %v1688_v9  ;;  %v1743_v14 = vrot.slane %v1581_v16, 5  ;;  %3618 = vst.msk [vmem:[#allocation3 + $0x50] sm:$0xff] %vm3607_vm10, %v3580_v48  ;;  %v1742_v41 = vrot.slane %v1740_v12, 4  ;;  %v2228_v42 = vshrl.u32 %v2053_v22, 16  ;;  %v2057_v11 = vld [vmem:[#allocation2 + $0x64] sm:$0xf] }
 0x1b0   : > { %v1737_v33 = vsel %vm5287_vm9, %v1735_v55, %v1736_v63  ;;  %3906 = vrot.lane.b32.xlu1 %v4632_v34, %s5045_s7  ;;  %v1420_v49 = vsel %vm5309_vm12, %v1415_v13, %v1419_v52  ;;  %v6572_v50 = vsel %vm5287_vm9, %v4490_v8, %v1740_v12  ;;  %v2231_v24 = vshll.u32 %v2053_v22, 16  ;;  %v2058_v45 = vld [vmem:[#allocation2 + $0x68] sm:$0x1]  ;;  %v2077_v46 = vld [vmem:[#allocation2 + $0xb4] sm:$0xf]  ;;  %s4960_s11 = scalar_lea.vmem %s6921_s28, 4096 }
 0x1b1   : > { %v2237_v0 = vshll.u32 %v2054_v29, 16  ;;  %v4474_v37 = vcombine.low %v1410_v60, %v1420_v49  ;;  %v4505_v10 = vcombine.low %v6560_v15, %v1737_v33  ;;  %v2230_v47 = vrot.slane %v2228_v42, 4  ;;  %v2078_v55 = vld [vmem:[#allocation2 + $0xb8] sm:$0xf]  ;;  %v2079_v12 = vld [vmem:[#allocation2 + $0xbc] sm:$0x1]  ;;  %p4961_p11 = scmp.ne.s32.totalorder %s6921_s28, %s4960_s11 }
 0x1b2   : > { %1807 = vrot.lane.b32.xlu0 %v4498_v57, %s5038_s22  ;;  %v2241_v19 = vshrl.u32 %v2054_v29, 16  ;;  %v1744_v21 = vsel %vm5287_vm9, %v1742_v41, %v1743_v14  ;;  %v2233_v61 = vrot.slane %v2231_v24, 5  ;;  %v2247_v31 = vshll.u32 %v2055_v25, 16  ;;  %v2598_v14 = vld [vmem:[#allocation2 + $0x54] sm:$0xe] }
 0x1b3   : > { %v2239_v3 = vrot.slane %v2237_v0, 5  ;;  %v304_v36 = vsel %vm5283_vm5, 0, %v303_v6  ;;  %v663_v53 = vshrl.u32 %v403_v27, 16  ;;  %v666_v44 = vshll.u32 %v403_v27, 16  ;;  %v2599_v49 = vld [vmem:[#allocation2 + $0x58] sm:$0xf]  ;;  %p4962_p2 = pnand %p4961_p11, %p7000_p0 }
 0x1b4   : > { %v2243_v23 = vrot.slane %v2241_v19, 4  ;;  %1499 = vrot.lane.b32.xlu1 %v4474_v37, %s5039_s24  ;;  %v2234_v7 = vor.u32 %v2233_v61, %v2230_v47  ;;  %v2249_v56 = vrot.slane %v2247_v31, 5  ;;  %305 = vst [vmem:[#allocation2 + $0xc0] sm:$0x1] %v304_v36  ;;  %v671_v4 = vshrl.u32 %v404_v35, 16  ;;  %s5046_s24 = smov [#allocation11]  }
 0x1b5   : > { %v3566_v34 = vpop.permute.xlu0 %3565  ;;  %v674_v26 = vshll.u32 %v404_v35, 16  ;;  %v665_v30 = vrot.slane %v663_v53, 7  ;;  %v2252_v39 = vshrl.u32 %v2056_v51, 16  ;;  %v2255_v59 = vshll.u32 %v2056_v51, 16  ;;  %v2602_v61 = vld [vmem:[#allocation2 + $0x64] sm:$0xf]  ;;  %p4963_p3 = pneg %p4962_p2 }
 0x1b6   : > { %3611 = vst.msk [vmem:[#allocation3 + $0x18] sm:$0xff] %vm3607_vm10, %v3566_v34  ;;  %1982 = vrot.lane.b32.xlu0 %v4858_v17, %s5040_s12  ;;  %v2244_v43 = vor.u32 %v2243_v23, %v2239_v3  ;;  %v2235_v16 = vrot.slane %v2234_v7, 4  ;;  %v6585_v22 = vrot.slane %v671_v4, 7  ;;  %v2261_v5 = vshll.u32 %v2057_v11, 16  ;;  %v4860_v17 = vld [vmem:[#allocation2 + $0xb4] sm:$0xff]  }
 0x1b7   : > { %v2265_v40 = vshrl.u32 %v2057_v11, 16  ;;  %v4506_v62 = vcombine.low %v6572_v50, %v1744_v21  ;;  %v669_v29 = vrot.slane %v665_v30, 4  ;;  %v2254_v58 = vrot.slane %v2252_v39, 4  ;;  %v2600_v50 = vld [vmem:[#allocation2 + $0x5c] sm:$0x1] }
 0x1b8   : > { %v2245_v20 = vrot.slane %v2244_v43, 4  ;;  %1821 = vrot.lane.b32.xlu1 %v4505_v10, %s5038_s22  ;;  %v2240_v63 = vsel %vm5309_vm12, %v2235_v16, %v2239_v3  ;;  %v668_v8 = vor.u32 %v666_v44, %v665_v30  ;;  %v676_v9 = vor.u32 %v674_v26, %v6585_v22  ;;  %v353_v34 = vld [vmem:[#allocation2 + $0xc8] sm:$0x1]  ;;  %v2601_v21 = vld [vmem:[#allocation2 + $0x60] sm:$0xe] }
 0x1b9   : > { %v3885_v52 = vpop.permute.xlu0 %3884  ;;  %v2257_v15 = vrot.slane %v2255_v59, 5  ;;  %v2263_v60 = vrot.slane %v2261_v5, 5  ;;  %v2267_v13 = vrot.slane %v2265_v40, 4  ;;  %v2271_v57 = vshll.u32 %v2058_v45, 16  ;;  %v2603_v53 = vld [vmem:[#allocation2 + $0x68] sm:$0x1] }
 0x1ba   : > { %3931 = vst.msk [vmem:[#allocation3 + $0x10] sm:$0xff] %vm3928_vm15, %v3885_v52  ;;  %1984 = vrot.lane.b32.xlu0 %v4859_v28, %s5040_s12  ;;  %v2250_v48 = vsel %vm5309_vm12, %v2245_v20, %v2249_v56  ;;  %v677_v41 = vsel %vm5322_vm13, %v669_v29, %v676_v9  ;;  %v2420_v42 = vshrl.u32 %v2077_v46, 16  ;;  %v2423_v37 = vshll.u32 %v2077_v46, 16  ;;  %v6615_v29 = vld [vmem:[#allocation2 + $0xb4] sm:$0xe] }
 0x1bb   : > { %v4529_v33 = vcombine.low %v2240_v63, %v2250_v48  ;;  %v2258_v25 = vor.u32 %v2257_v15, %v2254_v58  ;;  %v834_v24 = vld [vmem:[#allocation2 + $0xc0] sm:$0xf]  ;;  %837 = vst.msk [vmem:[#allocation2 + $0xc4] sm:$0xf] %vm245_vm0, %v677_v41  ;;  %v2268_v0 = vor.u32 %v2267_v13, %v2263_v60  ;;  %v2273_v27 = vrot.slane %v2271_v57, 5 }
 0x1bc   : > { %v2429_v10 = vshll.u32 %v2078_v55, 16  ;;  %1823 = vrot.lane.b32.xlu1 %v4506_v62, %s5038_s22  ;;  %v835_v54 = vsel %vm5302_vm11, %v668_v8, %v834_v24  ;;  %v2422_v19 = vrot.slane %v2420_v42, 4  ;;  %v2433_v35 = vshrl.u32 %v2078_v55, 16  ;;  %v2623_v48 = vld [vmem:[#allocation2 + $0xb8] sm:$0xf] }
 0x1bd   : > { %v1478_v6 = vpop.permute.xlu0 %1477  ;;  %v2259_v47 = vrot.slane %v2258_v25, 4  ;;  %v3582_v3 = vpop.permute.xlu1 %3581  ;;  %836 = vst [vmem:[#allocation2 + $0xc0] sm:$0xf] %v835_v54  ;;  %v2269_v31 = vrot.slane %v2268_v0, 4  ;;  %v2425_v51 = vrot.slane %v2423_v37, 5  ;;  %v2439_v36 = vshll.u32 %v2079_v12, 16 }
 0x1be   : > { %1522 = vst.msk [vmem:[#allocation3 + $0x20] sm:$0xff] %vm1517_vm2, %v1478_v6  ;;  %2527 = vrot.lane.b32.xlu0 %v4529_v33, %s5042_s30  ;;  %v2431_v23 = vrot.slane %v2429_v10, 5  ;;  %v2435_v7 = vrot.slane %v2433_v35, 4  ;;  %v4545_v56 = vrot.slane %v2598_v14, 9  ;;  %v2720_v4 = vrot.slane %v2599_v49, 5 }
 0x1bf   : > { %3619 = vst.msk [vmem:[#allocation3 + $0x58] sm:$0xff] %vm3607_vm10, %v3582_v3  ;;  %v2264_v11 = vsel %vm5309_vm12, %v2259_v47, %v2263_v60  ;;  %v2274_v26 = vsel %vm5309_vm12, %v2269_v31, %v2273_v27  ;;  %v2426_v45 = vor.u32 %v2425_v51, %v2422_v19  ;;  %v2441_v28 = vrot.slane %v2439_v36, 5  ;;  %v3098_v35 = vld [vmem:[#allocation2 + $0x64] sm:$0xf] }
 0x1c0   : > { %v2723_v43 = vrot.slane %v2600_v50, 5  ;;  %1998 = vrot.lane.b32.xlu1 %v4860_v17, %s5040_s12  ;;  %v4530_v30 = vcombine.low %v2264_v11, %v2274_v26  ;;  %v2436_v39 = vor.u32 %v2435_v7, %v2431_v23  ;;  %v2721_v59 = vsel %vm5287_vm9, %v4545_v56, %v2720_v4  ;;  %v3097_v50 = vld [vmem:[#allocation2 + $0x60] sm:$0xf]  ;;  %v3100_v7 = vld [vmem:[#allocation2 + $0x6c] sm:$0xf] }
 0x1c1   : > { %v3887_v44 = vpop.permute.xlu0 %3886  ;;  %v3947_v32 = vld [vmem:[#allocation3 + $0x10] sm:$0xff]  ;;  %v2722_v52 = vrot.slane %v2720_v4, 4  ;;  %v3901_v16 = vpop.permute.xlu1 %3900  ;;  %v2427_v5 = vrot.slane %v2426_v45, 4  ;;  %v354_v40 = vsel %vm5348_vm14, 0, %v353_v34  ;;  %v4546_v62 = vrot.slane %v2601_v21, 9 }
 0x1c2   : > { %3932 = vst.msk [vmem:[#allocation3 + $0x18] sm:$0xff] %vm3928_vm15, %v3887_v44  ;;  %4695 = vmatprep.mubr.bf16.mxu0 %v3947_v32  ;;  %v2727_v20 = vrot.slane %v2602_v61, 5  ;;  %3939 = vst.msk [vmem:[#allocation3 + $0x50] sm:$0xff] %vm3928_vm15, %v3901_v16  ;;  %2529 = vrot.lane.b32.xlu0 %v4530_v30, %s5042_s30  ;;  %v2437_v46 = vrot.slane %v2436_v39, 4  ;;  %v2081_v8 = vld [vmem:[#allocation2 + $0xc4] sm:$0xf] }
 0x1c3   : > { %v2724_v63 = vsel %vm5287_vm9, %v2722_v52, %v2723_v43  ;;  %355 = vst [vmem:[#allocation2 + $0xc8] sm:$0x1] %v354_v40  ;;  %v2730_v9 = vrot.slane %v2603_v53, 5  ;;  %v2432_v18 = vsel %vm5309_vm12, %v2427_v5, %v2431_v23  ;;  %v2453_v55 = vshll.u32 %v2081_v8, 16  ;;  %v6640_v34 = vld [vmem:[#allocation2 + $0xbc] sm:$0x1] }
 0x1c4   : > { %v4561_v15 = vcombine.low %v2721_v59, %v2724_v63  ;;  %v2457_v12 = vshrl.u32 %v2081_v8, 16  ;;  %v4861_v60 = vld [vmem:[#allocation2 + $0xc0] sm:$0xff]   ;;  %v2442_v13 = vsel %vm5309_vm12, %v2437_v46, %v2441_v28  ;;  %v2728_v14 = vsel %vm5287_vm9, %v4546_v62, %v2727_v20  ;;  %v3099_v32 = vld [vmem:[#allocation2 + $0x68] sm:$0x1]  ;;  %v3101_v45 = vld [vmem:[#allocation2 + $0x70] sm:$0xf] }
 0x1c5   : > { %v1480_v58 = vpop.permute.xlu0 %1479  ;;  %v2080_v57 = vld [vmem:[#allocation2 + $0xc0] sm:$0xf]  ;;  %v2729_v6 = vrot.slane %v2727_v20, 4  ;;  %v1494_v33 = vpop.permute.xlu1 %1493  ;;  %v678_v41 = vrot.slane %v6585_v22, 4  ;;  %v4537_v25 = vcombine.low %v2432_v18, %v2442_v13  ;;  %2000 = vrot.lane.b32.xlu1 %v4861_v60, %s5040_s12  ;;  %v6632_v0 = vrot.slane %v2453_v55, 5  ;;  %v4863_v46 = vld [vmem:[#allocation2 + $0x6c] sm:$0xff]  }
 0x1c6   : > { %1523 = vst.msk [vmem:[#allocation3 + $0x28] sm:$0xff] %vm1517_vm2, %v1480_v58  ;;  %v2444_v42 = vshrl.u32 %v2080_v57, 16  ;;  %v2447_v49 = vshll.u32 %v2080_v57, 16  ;;  %1530 = vst.msk [vmem:[#allocation3 + $0x60] sm:$0xff] %vm1517_vm2, %v1494_v33  ;;  %2848 = vrot.lane.b32.xlu0 %v4561_v15, %s5041_s13  ;;  %v6634_v27 = vrot.slane %v2457_v12, 4  ;;  %v4553_v22 = vrot.slane %v6615_v29, 9 }
 0x1c7   : > { %v2731_v37 = vsel %vm5287_vm9, %v2729_v6, %v2730_v9  ;;  %v2776_v19 = vrot.slane %v2623_v48, 5  ;;  %v3272_v51 = vshrl.u32 %v3097_v50, 16  ;;  %v3275_v23 = vshll.u32 %v3097_v50, 16  ;;  %v4862_v44 = vld [vmem:[#allocation2 + $0x60] sm:$0xff]   ;;  %v3102_v59 = vld [vmem:[#allocation2 + $0x74] sm:$0x1] }
 0x1c8   : > { %v2446_v17 = vrot.slane %v2444_v42, 4  ;;  %v2449_v54 = vrot.slane %v2447_v49, 5  ;;  %v4562_v47 = vcombine.low %v2728_v14, %v2731_v37  ;;  %v3281_v11 = vshll.u32 %v3098_v35, 16  ;;  %v6657_v5 = vld [vmem:[#allocation2 + $0xc4] sm:$0xf]  ;;  %s4964_s12 = sshll.u32 %s5046_s24, 4  ;;  %s4965_s12 = int_to_ptr.vmem [resolvable:$false] %s4964_s12 }
 0x1c9   : > { %v1802_v24 = vpop.permute.xlu0 %1801  ;;  %v3948_v10 = vld [vmem:[#allocation3 + $0x18] sm:$0xff]  ;;  %v3903_v21 = vpop.permute.xlu1 %3902  ;;  %v3955_v61 = vld [vmem:[#allocation3 + $0x50] sm:$0xff]  ;;  %2543 = vrot.lane.b32.xlu1 %v4537_v25, %s5042_s30  ;;  %v2460_v56 = vor.u32 %v6634_v27, %v6632_v0  ;;  %v6652_v4 = vsel %vm5287_vm9, %v4553_v22, %v2776_v19  ;;  %v2778_v26 = vrot.slane %v2776_v19, 4  ;;  %v2779_v1 = vrot.slane %v6640_v34, 5  ;;  %v2625_v58 = vld [vmem:[#allocation2 + $0xc0] sm:$0xe]  ;;  %p4967_p7 = scmp.lt.s32.totalorder %s6921_s28, %s4965_s12 }
 0x1ca   : > { %1846 = vst.msk [vmem:[#allocation3 + $0x20] sm:$0xff] %vm1841_vm3, %v1802_v24  ;;  %4696 = vmatmul.mubr.bf16.gmra.mrb[4].mxu0 %v3948_v10  ;;  %v838_v3 = vld [vmem:[#allocation2 + $0xc8] sm:$0x1]  ;;  %v2450_v31 = vor.u32 %v2449_v54, %v2446_v17  ;;  %4711 = vmatprep.mubr.bf16.mxu1 %v3955_v61  ;;  %v3274_v28 = vrot.slane %v3272_v51, 4  ;;  %v3277_v43 = vrot.slane %v3275_v23, 5  ;;  %v3283_v30 = vrot.slane %v3281_v11, 5 }
 0x1cb   : > { %3940 = vst.msk [vmem:[#allocation3 + $0x58] sm:$0xff] %vm3928_vm15, %v3903_v21  ;;  %v839_v53 = vsel %vm5283_vm5, %v678_v41, %v838_v3  ;;  %2850 = vrot.lane.b32.xlu0 %v4562_v47, %s5041_s13  ;;  %v3285_v39 = vshrl.u32 %v3098_v35, 16  ;;  %v3291_v40 = vshll.u32 %v3099_v32, 16  ;;  %v3296_v62 = vshrl.u32 %v3100_v7, 16  ;;  %v3121_v50 = vld [vmem:[#allocation2 + $0xc0] sm:$0xf] }
 0x1cc   : > { %840 = vst [vmem:[#allocation2 + $0xc8] sm:$0x1] %v839_v53  ;;  %v6655_v16 = vrot.slane %v2450_v31, 4  ;;  %v3299_v20 = vshll.u32 %v3100_v7, 16  ;;  %v3278_v63 = vor.u32 %v3277_v43, %v3274_v28  ;;  %v3305_v9 = vshll.u32 %v3101_v45, 16 }
 0x1cd   : > { %v1804_v36 = vpop.permute.xlu0 %1803  ;;  %v1496_v52 = vpop.permute.xlu1 %1495  ;;  %v3287_v8 = vrot.slane %v3285_v39, 4  ;;  %v3309_v18 = vshrl.u32 %v3101_v45, 16  ;;  %v3293_v15 = vrot.slane %v3291_v40, 5  ;;  %v3298_v55 = vrot.slane %v3296_v62, 4  ;;  %v3122_v17 = vld [vmem:[#allocation2 + $0xc4] sm:$0xf] }
 0x1ce   : > { %1847 = vst.msk [vmem:[#allocation3 + $0x28] sm:$0xff] %vm1841_vm3, %v1804_v36  ;;  %v3301_v12 = vrot.slane %v3299_v20, 5  ;;  %v3315_v48 = vshll.u32 %v3102_v59, 16  ;;  %v3279_v60 = vrot.slane %v3278_v63, 4  ;;  %v3307_v57 = vrot.slane %v3305_v9, 5 }
 0x1cf   : > { %1531 = vst.msk [vmem:[#allocation3 + $0x68] sm:$0xff] %vm1517_vm2, %v1496_v52  ;;  %3026 = vrot.lane.b32.xlu0 %v4862_v44, %s5043_s6  ;;  %v3288_v13 = vor.u32 %v3287_v8, %v3283_v30  ;;  %v3311_v14 = vrot.slane %v3309_v18, 4  ;;  %v2461_v41 = vrot.slane %v2460_v56, 4  ;;  %v4554_v25 = vrot.slane %v2625_v58, 9  ;;  %v3642_v51 = vld [vmem:[#allocation2 + $0x60] sm:$0xe] }
 0x1d0   : > { %v2783_v42 = vrot.slane %v6657_v5, 5  ;;  %v3302_v49 = vor.u32 %v3301_v12, %v3298_v55  ;;  %v3284_v27 = vsel %vm5309_vm12, %v3279_v60, %v3283_v30  ;;  %v3317_v10 = vrot.slane %v3315_v48, 5  ;;  %v3643_v32 = vld [vmem:[#allocation2 + $0x64] sm:$0xf]  ;;  %v3125_v5 = vld [vmem:[#allocation2 + $0xd0] sm:$0xf] }
 0x1d1   : > { %v1979_v29 = vpop.permute.xlu0 %1978  ;;  %v1818_v6 = vpop.permute.xlu1 %1817  ;;  %v3289_v37 = vrot.slane %v3288_v13, 4  ;;  %v3312_v22 = vor.u32 %v3311_v14, %v3307_v57  ;;  %v2456_v54 = vsel %vm5309_vm12, %v6655_v16, %v6632_v0  ;;  %v2780_v19 = vsel %vm5287_vm9, %v2778_v26, %v2779_v1  ;;  %v3644_v1 = vld [vmem:[#allocation2 + $0x68] sm:$0x1]  ;;  %v3124_v16 = vld [vmem:[#allocation2 + $0xcc] sm:$0xf] }
 0x1d2   : > { %2023 = vst.msk [vmem:[#allocation3 + $0x20] sm:$0xff] %vm2018_vm4, %v1979_v29  ;;  %v3956_v33 = vld [vmem:[#allocation3 + $0x58] sm:$0xff]  ;;  %v3303_v34 = vrot.slane %v3302_v49, 4  ;;  %v3464_v3 = vshrl.u32 %v3121_v50, 16  ;;  %v3467_v31 = vshll.u32 %v3121_v50, 16  ;;  %v3473_v0 = vshll.u32 %v3122_v17, 16 }
 0x1d3   : > { %1854 = vst.msk [vmem:[#allocation3 + $0x60] sm:$0xff] %vm1841_vm3, %v1818_v6  ;;  %4712 = vmatmul.mubr.bf16.gmra.mrb[4].mxu1 %v3956_v33  ;;  %v2082_v24 = vld [vmem:[#allocation2 + $0xc8] sm:$0x1]  ;;  %3028 = vrot.lane.b32.xlu0 %v4863_v46, %s5043_s6  ;;  %v3294_v21 = vsel %vm5309_vm12, %v3289_v37, %v3293_v15  ;;  %v3313_v61 = vrot.slane %v3312_v22, 4  ;;  %v2785_v11 = vrot.slane %v2783_v42, 4  ;;  %v3477_v26 = vshrl.u32 %v3122_v17, 16 }
 0x1d4   : > { %v2463_v47 = vshll.u32 %v2082_v24, 16  ;;  %v2627_v35 = vld [vmem:[#allocation2 + $0xc8] sm:$0x1]  ;;  %v4593_v53 = vcombine.low %v3284_v27, %v3294_v21  ;;  %v3308_v44 = vsel %vm5309_vm12, %v3303_v34, %v3307_v57  ;;  %v4609_v43 = vrot.slane %v3642_v51, 9  ;;  %v3645_v46 = vld [vmem:[#allocation2 + $0x6c] sm:$0xe] }
 0x1d5   : > { %v1820_v23 = vpop.permute.xlu1 %1819  ;;  %v2786_v7 = vrot.slane %v2627_v35, 5  ;;  %v3318_v56 = vsel %vm5309_vm12, %v3313_v61, %v3317_v10  ;;  %v4569_v39 = vcombine.low %v6652_v4, %v2780_v19  ;;  %v2784_v59 = vsel %vm5287_vm9, %v4554_v25, %v2783_v42  ;;  %v3646_v15 = vld [vmem:[#allocation2 + $0x70] sm:$0xf]  ;;  %v3647_v55 = vld [vmem:[#allocation2 + $0x74] sm:$0x1]  ;;  %v4864_v34 = vld [vmem:[#allocation2 + $0xc0] sm:$0xff]  }
 0x1d6   : > { %v2465_v36 = vrot.slane %v2463_v47, 5  ;;  %1855 = vst.msk [vmem:[#allocation3 + $0x68] sm:$0xff] %vm1841_vm3, %v1820_v23  ;;  %v4594_v28 = vcombine.low %v3308_v44, %v3318_v56  ;;  %v3764_v52 = vrot.slane %v3643_v32, 5  ;;  %v3466_v62 = vrot.slane %v3464_v3, 4  ;;  %v3123_v12 = vld [vmem:[#allocation2 + $0xc8] sm:$0x1] }
 0x1d7   : > { %3571 = vrot.lane.b32.xlu0 %v4593_v53, %s5044_s26  ;;  %v3469_v20 = vrot.slane %v3467_v31, 5  ;;  %v6686_v29 = vrot.slane %v3473_v0, 5  ;;  %v3767_v58 = vrot.slane %v3644_v1, 5  ;;  %v2787_v4 = vsel %vm5287_vm9, %v2785_v11, %v2786_v7  ;;  %v3126_v47 = vld [vmem:[#allocation2 + $0xd4] sm:$0x1]  ;;  %v4866_v32 = vld [vmem:[#allocation2 + $0xcc] sm:$0xff]  }
 0x1d8   : > { %v2466_v45 = vsel %vm5309_vm12, %v2461_v41, %v2465_v36  ;;  %v3479_v8 = vrot.slane %v3477_v26, 4  ;;  %v3765_v9 = vsel %vm5287_vm9, %v4609_v43, %v3764_v52  ;;  %v3766_v18 = vrot.slane %v3764_v52, 4  ;;  %v3667_v0 = vld [vmem:[#allocation2 + $0xc4] sm:$0xf]  ;;  %v3666_v56 = vld [vmem:[#allocation2 + $0xc0] sm:$0xe] }
 0x1d9   : > { %v4538_v30 = vcombine.low %v2456_v54, %v2466_v45  ;;  %v1995_v40 = vpop.permute.xlu1 %1994  ;;  %v1981_v63 = vpop.permute.xlu0 %1980  ;;  %v3488_v48 = vshrl.u32 %v3124_v16, 16  ;;  %v3491_v60 = vshll.u32 %v3124_v16, 16  ;;  %v3497_v13 = vshll.u32 %v3125_v5, 16 }
 0x1da   : > { %2031 = vst.msk [vmem:[#allocation3 + $0x60] sm:$0xff] %vm2018_vm4, %v1995_v40  ;;  %2024 = vst.msk [vmem:[#allocation3 + $0x28] sm:$0xff] %vm2018_vm4, %v1981_v63  ;;  %v3501_v57 = vshrl.u32 %v3125_v5, 16  ;;  %v3768_v14 = vsel %vm5287_vm9, %v3766_v18, %v3767_v58  ;;  %v4610_v6 = vrot.slane %v3645_v46, 9  ;;  %v4570_v33 = vcombine.low %v2784_v59, %v2787_v4  ;;  %v3671_v58 = vld [vmem:[#allocation2 + $0xd4] sm:$0x1] }
 0x1db   : > { %2545 = vrot.lane.b32.xlu1 %v4538_v30, %s5042_s30  ;;  %3573 = vrot.lane.b32.xlu0 %v4594_v28, %s5044_s26  ;;  %v3470_v41 = vor.u32 %v3469_v20, %v3466_v62  ;;  %v4625_v25 = vcombine.low %v3765_v9, %v3768_v14  ;;  %v3480_v49 = vor.u32 %v3479_v8, %v6686_v29  ;;  %v3483_v50 = vshll.u32 %v3123_v12, 16  ;;  %v3668_v28 = vld [vmem:[#allocation2 + $0xc8] sm:$0x1]  ;;  %v3670_v30 = vld [vmem:[#allocation2 + $0xd0] sm:$0xf] }
 0x1dc   : > { %v3771_v24 = vrot.slane %v3646_v15, 5  ;;  %v3774_v27 = vrot.slane %v3647_v55, 5  ;;  %v3490_v37 = vrot.slane %v3488_v48, 4  ;;  %v3493_v22 = vrot.slane %v3491_v60, 5  ;;  %v3669_v62 = vld [vmem:[#allocation2 + $0xcc] sm:$0xe] }
 0x1dd   : > { %v2524_v42 = vpop.permute.xlu0 %2523  ;;  %v3499_v10 = vrot.slane %v3497_v13, 5  ;;  %v3503_v17 = vrot.slane %v3501_v57, 4  ;;  %v3471_v21 = vrot.slane %v3470_v41, 4  ;;  %v3481_v61 = vrot.slane %v3480_v49, 4 }
 0x1de   : > { %2568 = vst.msk [vmem:[#allocation3 + $0x20] sm:$0xff] %vm2563_vm6, %v2524_v42  ;;  %v3772_v19 = vsel %vm5287_vm9, %v4610_v6, %v3771_v24  ;;  %v3773_v35 = vrot.slane %v3771_v24, 4  ;;  %v3485_v3 = vrot.slane %v3483_v50, 5  ;;  %v3494_v51 = vor.u32 %v3493_v22, %v3490_v37 }
 0x1df   : > { %2864 = vrot.lane.b32.xlu1 %v4569_v39, %s5041_s13  ;;  %3892 = vrot.lane.b32.xlu0 %v4625_v25, %s5045_s7  ;;  %v1997_v54 = vpop.permute.xlu1 %1996  ;;  %v3504_v23 = vor.u32 %v3503_v17, %v3499_v10  ;;  %v3507_v36 = vshll.u32 %v3126_v47, 16  ;;  %v3476_v11 = vsel %vm5309_vm12, %v3471_v21, %v6686_v29  ;;  %v3820_v43 = vrot.slane %v3667_v0, 5 }
 0x1e0   : > { %2032 = vst.msk [vmem:[#allocation3 + $0x68] sm:$0xff] %vm2018_vm4, %v1997_v54  ;;  %v3775_v31 = vsel %vm5287_vm9, %v3773_v35, %v3774_v27  ;;  %v3486_v7 = vsel %vm5309_vm12, %v3481_v61, %v3485_v3  ;;  %v3495_v26 = vrot.slane %v3494_v51, 4  ;;  %v4617_v59 = vrot.slane %v3666_v56, 9 }
 0x1e1   : > { %v4626_v53 = vcombine.low %v3772_v19, %v3775_v31  ;;  %v3505_v1 = vrot.slane %v3504_v23, 4  ;;  %v3509_v45 = vrot.slane %v3507_v36, 5  ;;  %v4601_v39 = vcombine.low %v3476_v11, %v3486_v7 }
 0x1e2   : > { %v3823_v52 = vrot.slane %v3668_v28, 5  ;;  %v3500_v16 = vsel %vm5309_vm12, %v3495_v26, %v3499_v10  ;;  %v3822_v40 = vrot.slane %v3820_v43, 4  ;;  %v3827_v20 = vrot.slane %v3670_v30, 5  ;;  %v6772_v30 = vld [vmem:[#allocation10] ss:$0 sm:$0xff] }
 0x1e3   : > { %2866 = vrot.lane.b32.xlu1 %v4570_v33, %s5041_s13  ;;  %v2540_v44 = vpop.permute.xlu1 %2539  ;;  %3894 = vrot.lane.b32.xlu0 %v4626_v53, %s5045_s7  ;;  %v3510_v5 = vsel %vm5309_vm12, %v3505_v1, %v3509_v45  ;;  %v4618_v63 = vrot.slane %v3669_v62, 9  ;;  %v3821_v4 = vsel %vm5287_vm9, %v4617_v59, %v3820_v43  ;;  %v3830_v38 = vrot.slane %v3671_v58, 5  ;;  %s4966_s13 = scalar_lea.vmem %s4965_s12, 8192 }
 0x1e4   : > { %2576 = vst.msk [vmem:[#allocation3 + $0x60] sm:$0xff] %vm2563_vm6, %v2540_v44  ;;  %v4602_v46 = vcombine.low %v3500_v16, %v3510_v5  ;;  %v3824_v8 = vsel %vm5287_vm9, %v3822_v40, %v3823_v52  ;;  %v3829_v9 = vrot.slane %v3827_v20, 4  ;;  %v6776_v59 = vstv %s4193_s21  ;;  %p4968_p9 = scmp.lt.s32.totalorder %s4966_s13, %s4960_s11 }
 0x1e5   : > { %v4633_v15 = vcombine.low %v3821_v4, %v3824_v8  ;;  %v3828_v55 = vsel %vm5287_vm9, %v4618_v63, %v3827_v20  ;;  %vm4291_vm5 = vcmask 130048  }
 0x1e6   : > { %v3831_v12 = vsel %vm5287_vm9, %v3829_v9, %v3830_v38  ;;  %p4969_p12 = por %p4968_p9, %p4967_p7 }
 0x1e7   : > { %3042 = vrot.lane.b32.xlu1 %v4864_v34, %s5043_s6  ;;  %v4634_v13 = vcombine.low %v3828_v55, %v3831_v12 }
 0x1e8   : > { %p4970_p1 = pnand %p4969_p12, %p4963_p3 }
 0x1eb   : > { %3044 = vrot.lane.b32.xlu1 %v4866_v32, %s5043_s6  ;;  %v2526_v29 = vpop.permute.xlu0 %2525 }
 0x1ec   : > { %2569 = vst.msk [vmem:[#allocation3 + $0x28] sm:$0xff] %vm2563_vm6, %v2526_v29 }
 0x1ef   : > { %3587 = vrot.lane.b32.xlu1 %v4601_v39, %s5044_s26  ;;  %v2845_v18 = vpop.permute.xlu0 %2844 }
 0x1f0   : > { %2889 = vst.msk [vmem:[#allocation3 + $0x20] sm:$0xff] %vm2884_vm7, %v2845_v18 }
 0x1f3   : > { %3589 = vrot.lane.b32.xlu1 %v4602_v46, %s5044_s26  ;;  %v2847_v48 = vpop.permute.xlu0 %2846 }
 0x1f4   : > { %2890 = vst.msk [vmem:[#allocation3 + $0x28] sm:$0xff] %vm2884_vm7, %v2847_v48 }
 0x1f6   : > { %v2542_v60 = vpop.permute.xlu1 %2541 }
 0x1f7   : > { %3908 = vrot.lane.b32.xlu1 %v4633_v15, %s5045_s7  ;;  %2577 = vst.msk [vmem:[#allocation3 + $0x68] sm:$0xff] %vm2563_vm6, %v2542_v60  ;;  %v3023_v57 = vpop.permute.xlu0 %3022 }
 0x1f8   : > { %3067 = vst.msk [vmem:[#allocation3 + $0x20] sm:$0xff] %vm3062_vm8, %v3023_v57 }
 0x1fa   : > { %v2861_v14 = vpop.permute.xlu1 %2860 }
 0x1fb   : > { %3910 = vrot.lane.b32.xlu1 %v4634_v13, %s5045_s7  ;;  %2897 = vst.msk [vmem:[#allocation3 + $0x60] sm:$0xff] %vm2884_vm7, %v2861_v14  ;;  %v3025_v6 = vpop.permute.xlu0 %3024 }
 0x1fc   : > { %3068 = vst.msk [vmem:[#allocation3 + $0x28] sm:$0xff] %vm3062_vm8, %v3025_v6 }
 0x1fe   : > { %v2863_v2 = vpop.permute.xlu1 %2862 }
 0x1ff   : > { %2898 = vst.msk [vmem:[#allocation3 + $0x68] sm:$0xff] %vm2884_vm7, %v2863_v2  ;;  %v3568_v33 = vpop.permute.xlu0 %3567 }
 0x200   : > { %3612 = vst.msk [vmem:[#allocation3 + $0x20] sm:$0xff] %vm3607_vm10, %v3568_v33 }
 0x202   : > { %v3039_v41 = vpop.permute.xlu1 %3038 }
 0x203   : > { %3075 = vst.msk [vmem:[#allocation3 + $0x60] sm:$0xff] %vm3062_vm8, %v3039_v41 }
 0x206   : > { %v3041_v25 = vpop.permute.xlu1 %3040 }
 0x207   : > { %3076 = vst.msk [vmem:[#allocation3 + $0x68] sm:$0xff] %vm3062_vm8, %v3041_v25 }
 0x20a   : > { %v3584_v42 = vpop.permute.xlu1 %3583 }
 0x20b   : > { %3620 = vst.msk [vmem:[#allocation3 + $0x60] sm:$0xff] %vm3607_vm10, %v3584_v42 }
 0x20c   : > { %v3570_v49 = vpop.permute.xlu0 %3569 }
 0x20d   : > { %3613 = vst.msk [vmem:[#allocation3 + $0x28] sm:$0xff] %vm3607_vm10, %v3570_v49 }
 0x210   : > { %v3889_v50 = vpop.permute.xlu0 %3888 }
 0x211   : > { %3933 = vst.msk [vmem:[#allocation3 + $0x20] sm:$0xff] %vm3928_vm15, %v3889_v50 }
 0x214   : > { %v1482_v24 = vpop.permute.xlu0 %1481 }
 0x215   : > { %1524 = vst.msk [vmem:[#allocation3 + $0x30] sm:$0xff] %vm1517_vm2, %v1482_v24 }
 0x216   : > { %v3586_v27 = vpop.permute.xlu1 %3585 }
 0x217   : > { %3621 = vst.msk [vmem:[#allocation3 + $0x68] sm:$0xff] %vm3607_vm10, %v3586_v27 }
 0x218   : > { %v3891_v37 = vpop.permute.xlu0 %3890  ;;  %v3949_v22 = vld [vmem:[#allocation3 + $0x20] sm:$0xff] }
 0x219   : > { %3934 = vst.msk [vmem:[#allocation3 + $0x28] sm:$0xff] %vm3928_vm15, %v3891_v37  ;;  %4699 = vmatprep.mubr.bf16.mxu0 %v3949_v22 }
 0x21a   : > { %v3905_v10 = vpop.permute.xlu1 %3904 }
 0x21b   : > { %3941 = vst.msk [vmem:[#allocation3 + $0x60] sm:$0xff] %vm3928_vm15, %v3905_v10 }
 0x21c   : > { %v1484_v17 = vpop.permute.xlu0 %1483 }
 0x21d   : > { %1525 = vst.msk [vmem:[#allocation3 + $0x38] sm:$0xff] %vm1517_vm2, %v1484_v17 }
 0x21e   : > { %v1498_v54 = vpop.permute.xlu1 %1497 }
 0x21f   : > { %1532 = vst.msk [vmem:[#allocation3 + $0x70] sm:$0xff] %vm1517_vm2, %v1498_v54 }
 0x220   : > { %v1806_v47 = vpop.permute.xlu0 %1805  ;;  %v3950_v19 = vld [vmem:[#allocation3 + $0x28] sm:$0xff] }
 0x221   : > { %1848 = vst.msk [vmem:[#allocation3 + $0x30] sm:$0xff] %vm1841_vm3, %v1806_v47  ;;  %4700 = vmatmul.mubr.bf16.gmra.mrb[8].mxu0 %v3950_v19 }
 0x222   : > { %v3907_v35 = vpop.permute.xlu1 %3906  ;;  %v3957_v34 = vld [vmem:[#allocation3 + $0x60] sm:$0xff] }
 0x223   : > { %3942 = vst.msk [vmem:[#allocation3 + $0x68] sm:$0xff] %vm3928_vm15, %v3907_v35  ;;  %4715 = vmatprep.mubr.bf16.mxu1 %v3957_v34 }
 0x224   : > { %v1808_v21 = vpop.permute.xlu0 %1807 }
 0x225   : > { %1849 = vst.msk [vmem:[#allocation3 + $0x38] sm:$0xff] %vm1841_vm3, %v1808_v21 }
 0x226   : > { %v1500_v61 = vpop.permute.xlu1 %1499 }
 0x227   : > { %1533 = vst.msk [vmem:[#allocation3 + $0x78] sm:$0xff] %vm1517_vm2, %v1500_v61 }
 0x228   : > { %v1983_v3 = vpop.permute.xlu0 %1982 }
 0x229   : > { %2025 = vst.msk [vmem:[#allocation3 + $0x30] sm:$0xff] %vm2018_vm4, %v1983_v3 }
 0x22a   : > { %v1822_v31 = vpop.permute.xlu1 %1821  ;;  %v3958_v51 = vld [vmem:[#allocation3 + $0x68] sm:$0xff] }
 0x22b   : > { %1856 = vst.msk [vmem:[#allocation3 + $0x70] sm:$0xff] %vm1841_vm3, %v1822_v31  ;;  %4716 = vmatmul.mubr.bf16.gmra.mrb[8].mxu1 %v3958_v51 }
 0x22c   : > { %v1985_v23 = vpop.permute.xlu0 %1984 }
 0x22d   : > { %2026 = vst.msk [vmem:[#allocation3 + $0x38] sm:$0xff] %vm2018_vm4, %v1985_v23 }
 0x22e   : > { %v1824_v36 = vpop.permute.xlu1 %1823 }
 0x22f   : > { %1857 = vst.msk [vmem:[#allocation3 + $0x78] sm:$0xff] %vm1841_vm3, %v1824_v36 }
 0x230   : > { %v2528_v53 = vpop.permute.xlu0 %2527 }
 0x231   : > { %2570 = vst.msk [vmem:[#allocation3 + $0x30] sm:$0xff] %vm2563_vm6, %v2528_v53 }
 0x232   : > { %v1999_v44 = vpop.permute.xlu1 %1998 }
 0x233   : > { %2033 = vst.msk [vmem:[#allocation3 + $0x70] sm:$0xff] %vm2018_vm4, %v1999_v44 }
 0x234   : > { %v2530_v0 = vpop.permute.xlu0 %2529 }
 0x235   : > { %2571 = vst.msk [vmem:[#allocation3 + $0x38] sm:$0xff] %vm2563_vm6, %v2530_v0 }
 0x237   : > { %v2001_v32 = vpop.permute.xlu1 %2000 }
 0x238   : > { %v2849_v11 = vpop.permute.xlu0 %2848  ;;  %2034 = vst.msk [vmem:[#allocation3 + $0x78] sm:$0xff] %vm2018_vm4, %v2001_v32 }
 0x239   : > { %2891 = vst.msk [vmem:[#allocation3 + $0x30] sm:$0xff] %vm2884_vm7, %v2849_v11 }
 0x23b   : > { %v2544_v7 = vpop.permute.xlu1 %2543 }
 0x23c   : > { %2578 = vst.msk [vmem:[#allocation3 + $0x70] sm:$0xff] %vm2563_vm6, %v2544_v7 }
 0x23d   : > { %v2851_v56 = vpop.permute.xlu0 %2850 }
 0x23e   : > { %2892 = vst.msk [vmem:[#allocation3 + $0x38] sm:$0xff] %vm2884_vm7, %v2851_v56 }
 0x241   : > { %v3027_v26 = vpop.permute.xlu0 %3026 }
 0x242   : > { %3069 = vst.msk [vmem:[#allocation3 + $0x30] sm:$0xff] %vm3062_vm8, %v3027_v26 }
 0x245   : > { %v3029_v1 = vpop.permute.xlu0 %3028 }
 0x246   : > { %3070 = vst.msk [vmem:[#allocation3 + $0x38] sm:$0xff] %vm3062_vm8, %v3029_v1 }
 0x249   : > { %v3572_v45 = vpop.permute.xlu0 %3571 }
 0x24a   : > { %3614 = vst.msk [vmem:[#allocation3 + $0x30] sm:$0xff] %vm3607_vm10, %v3572_v45 }
 0x24d   : > { %v2546_v28 = vpop.permute.xlu1 %2545  ;;  %v3574_v43 = vpop.permute.xlu0 %3573 }
 0x24e   : > { %2579 = vst.msk [vmem:[#allocation3 + $0x78] sm:$0xff] %vm2563_vm6, %v2546_v28 }
 0x24f   : > { %3615 = vst.msk [vmem:[#allocation3 + $0x38] sm:$0xff] %vm3607_vm10, %v3574_v43  ;;  %v4693_v39 = vpop.f32.mrb[0].mxu0 }
 0x250   : > { %v4075_v16 = vadd.f32 %v4693_v39, %v6772_v30  ;;  %v4066_v5 = vpop.f32.mrb[1].mxu0  ;;  %v4709_v63 = vpop.f32.mrb[0].mxu1 }
 0x251   : > { %v2865_v52 = vpop.permute.xlu1 %2864  ;;  %v3893_v40 = vpop.permute.xlu0 %3892  ;;  %v4067_v62 = vadd.f32 %v6772_v30, %v4066_v5  ;;  %v4139_v9 = vadd.f32 %v4709_v63, %v6772_v30 }
 0x252   : > { %2899 = vst.msk [vmem:[#allocation3 + $0x70] sm:$0xff] %vm2884_vm7, %v2865_v52  ;;  %v4694_v20 = vpop.f32.mrb[2].mxu0  ;;  %vm4196_vm0 = vcmp.gt.f32.partialorder %v4075_v16, 0.0  ;;  %v4229_v29 = vmul.f32 %v6776_v59, %v4075_v16  ;;  %v4130_v38 = vpop.f32.mrb[1].mxu1 }
 0x253   : > { %3935 = vst.msk [vmem:[#allocation3 + $0x30] sm:$0xff] %vm3928_vm15, %v3893_v40  ;;  %v4078_v58 = vadd.f32 %v4694_v20, %v6772_v30  ;;  %v4069_v46 = vpop.f32.mrb[3].mxu0  ;;  %vm4194_vm9 = vcmp.gt.f32.partialorder %v4067_v62, 0.0  ;;  %v4227_v4 = vmul.f32 %v6776_v59, %v4067_v62  ;;  %v4131_v12 = vadd.f32 %v6772_v30, %v4130_v38  ;;  %v4710_v48 = vpop.f32.mrb[2].mxu1 }
 0x254   : > { %v4070_v8 = vadd.f32 %v6772_v30, %v4069_v46  ;;  %v4261_v15 = vsel %vm4196_vm0, %v4075_v16, %v4229_v29  ;;  %vm4212_vm13 = vcmp.gt.f32.partialorder %v4139_v9, 0.0  ;;  %v4133_v57 = vpop.f32.mrb[3].mxu1  ;;  %v4245_v6 = vmul.f32 %v6776_v59, %v4139_v9 }
 0x255   : > { %v2867_v18 = vpop.permute.xlu1 %2866  ;;  %vm4197_vm11 = vcmp.gt.f32.partialorder %v4078_v58, 0.0  ;;  %v4230_v55 = vmul.f32 %v6776_v59, %v4078_v58  ;;  %4294 = vst.msk [vmem:[%s6790_s16 + $0x10] sm:$0xff] %vm4291_vm5, %v4261_v15  ;;  %v4259_v60 = vsel %vm4194_vm9, %v4067_v62, %v4227_v4  ;;  %vm4210_vm14 = vcmp.gt.f32.partialorder %v4131_v12, 0.0  ;;  %v3895_v33 = vpop.permute.xlu0 %3894 }
 0x256   : > { %2900 = vst.msk [vmem:[#allocation3 + $0x78] sm:$0xff] %vm2884_vm7, %v2867_v18  ;;  %vm4195_vm12 = vcmp.gt.f32.partialorder %v4070_v8, 0.0  ;;  %v4228_v13 = vmul.f32 %v6776_v59, %v4070_v8  ;;  %v4243_v2 = vmul.f32 %v6776_v59, %v4131_v12  ;;  %v4142_v25 = vadd.f32 %v4710_v48, %v6772_v30 }
 0x257   : > { %4292 = vst.msk [vmem:[%s6790_s16] sm:$0xff] %vm4291_vm5, %v4259_v60  ;;  %v4262_v14 = vsel %vm4197_vm11, %v4078_v58, %v4230_v55  ;;  %v4134_v42 = vadd.f32 %v6772_v30, %v4133_v57  ;;  %v4277_v50 = vsel %vm4212_vm13, %v4139_v9, %v4245_v6 }
 0x258   : > { %4295 = vst.msk [vmem:[%s6790_s16 + $0x18] sm:$0xff] %vm4291_vm5, %v4262_v14  ;;  %v4260_v41 = vsel %vm4195_vm12, %v4070_v8, %v4228_v13  ;;  %v4275_v24 = vsel %vm4210_vm14, %v4131_v12, %v4243_v2  ;;  %4310 = vst.msk [vmem:[%s6790_s16 + $0x90] sm:$0xff] %vm4291_vm5, %v4277_v50  ;;  %vm4213_vm1 = vcmp.gt.f32.partialorder %v4142_v25, 0.0  ;;  %v4246_v37 = vmul.f32 %v6776_v59, %v4142_v25 }
 0x259   : > { %v3043_v49 = vpop.permute.xlu1 %3042  ;;  %3936 = vst.msk [vmem:[#allocation3 + $0x38] sm:$0xff] %vm3928_vm15, %v3895_v33  ;;  %vm4211_vm2 = vcmp.gt.f32.partialorder %v4134_v42, 0.0  ;;  %v4244_v22 = vmul.f32 %v6776_v59, %v4134_v42 }
 0x25a   : > { %4293 = vst.msk [vmem:[%s6790_s16 + $0x8] sm:$0xff] %vm4291_vm5, %v4260_v41  ;;  %v3951_v27 = vld [vmem:[#allocation3 + $0x30] sm:$0xff]  ;;  %4308 = vst.msk [vmem:[%s6790_s16 + $0x80] sm:$0xff] %vm4291_vm5, %v4275_v24  ;;  %v4278_v10 = vsel %vm4213_vm1, %v4142_v25, %v4246_v37 }
 0x25b   : > { %3077 = vst.msk [vmem:[#allocation3 + $0x70] sm:$0xff] %vm3062_vm8, %v3043_v49  ;;  %4703 = vmatprep.mubr.bf16.mxu0 %v3951_v27  ;;  %v4276_v17 = vsel %vm4211_vm2, %v4134_v42, %v4244_v22 }
 0x25c   : > { %4311 = vst.msk [vmem:[%s6790_s16 + $0x98] sm:$0xff] %vm4291_vm5, %v4278_v10  ;;  %4309 = vst.msk [vmem:[%s6790_s16 + $0x88] sm:$0xff] %vm4291_vm5, %v4276_v17 }
 0x25d   : > { %v3045_v54 = vpop.permute.xlu1 %3044 }
 0x25e   : > { %3078 = vst.msk [vmem:[#allocation3 + $0x78] sm:$0xff] %vm3062_vm8, %v3045_v54 }
 0x260   : > { %v3952_v47 = vld [vmem:[#allocation3 + $0x38] sm:$0xff] }
 0x261   : > { %v3588_v19 = vpop.permute.xlu1 %3587  ;;  %4704 = vmatmul.mubr.bf16.gmra.mrb[12].mxu0 %v3952_v47 }
 0x262   : > { %3622 = vst.msk [vmem:[#allocation3 + $0x70] sm:$0xff] %vm3607_vm10, %v3588_v19 }
 0x265   : > { %v3590_v35 = vpop.permute.xlu1 %3589 }
 0x266   : > { %3623 = vst.msk [vmem:[#allocation3 + $0x78] sm:$0xff] %vm3607_vm10, %v3590_v35 }
 0x269   : > { %v3909_v34 = vpop.permute.xlu1 %3908 }
 0x26a   : > { %3943 = vst.msk [vmem:[#allocation3 + $0x70] sm:$0xff] %vm3928_vm15, %v3909_v34 }
 0x26d   : > { %v3911_v21 = vpop.permute.xlu1 %3910 }
 0x26e   : > { %3944 = vst.msk [vmem:[#allocation3 + $0x78] sm:$0xff] %vm3928_vm15, %v3911_v21 }
 0x271   : > { %v3959_v61 = vld [vmem:[#allocation3 + $0x70] sm:$0xff] }
 0x272   : > { %4719 = vmatprep.mubr.bf16.mxu1 %v3959_v61 }
 0x275   : > { %v3960_v3 = vld [vmem:[#allocation3 + $0x78] sm:$0xff] }
 0x276   : > { %4720 = vmatmul.mubr.bf16.gmra.mrb[12].mxu1 %v3960_v3 }
 0x29d   : > { %v4697_v31 = vpop.f32.mrb[4].mxu0 }
 0x29e   : > { %v4091_v51 = vadd.f32 %v4697_v31, %v6772_v30  ;;  %v4082_v23 = vpop.f32.mrb[5].mxu0 }
 0x29f   : > { %v4083_v36 = vadd.f32 %v6772_v30, %v4082_v23  ;;  %v4698_v53 = vpop.f32.mrb[6].mxu0 }
 0x2a0   : > { %vm4200_vm3 = vcmp.gt.f32.partialorder %v4091_v51, 0.0  ;;  %v4233_v44 = vmul.f32 %v6776_v59, %v4091_v51  ;;  %v4094_v0 = vadd.f32 %v4698_v53, %v6772_v30  ;;  %v4085_v32 = vpop.f32.mrb[7].mxu0 }
 0x2a1   : > { %vm4198_vm4 = vcmp.gt.f32.partialorder %v4083_v36, 0.0  ;;  %v4231_v11 = vmul.f32 %v6776_v59, %v4083_v36  ;;  %v4086_v7 = vadd.f32 %v6772_v30, %v4085_v32 }
 0x2a2   : > { %v4265_v56 = vsel %vm4200_vm3, %v4091_v51, %v4233_v44  ;;  %vm4201_vm6 = vcmp.gt.f32.partialorder %v4094_v0, 0.0  ;;  %v4234_v26 = vmul.f32 %v6776_v59, %v4094_v0 }
 0x2a3   : > { %4298 = vst.msk [vmem:[%s6790_s16 + $0x30] sm:$0xff] %vm4291_vm5, %v4265_v56  ;;  %v4263_v1 = vsel %vm4198_vm4, %v4083_v36, %v4231_v11  ;;  %vm4199_vm7 = vcmp.gt.f32.partialorder %v4086_v7, 0.0  ;;  %v4232_v45 = vmul.f32 %v6776_v59, %v4086_v7 }
 0x2a4   : > { %4296 = vst.msk [vmem:[%s6790_s16 + $0x20] sm:$0xff] %vm4291_vm5, %v4263_v1  ;;  %v4266_v28 = vsel %vm4201_vm6, %v4094_v0, %v4234_v26 }
 0x2a5   : > { %4299 = vst.msk [vmem:[%s6790_s16 + $0x38] sm:$0xff] %vm4291_vm5, %v4266_v28  ;;  %v4264_v43 = vsel %vm4199_vm7, %v4086_v7, %v4232_v45 }
 0x2a6   : > { %4297 = vst.msk [vmem:[%s6790_s16 + $0x28] sm:$0xff] %vm4291_vm5, %v4264_v43  ;;  %v4713_v39 = vpop.f32.mrb[4].mxu1 }
 0x2a7   : > { %v4155_v52 = vadd.f32 %v4713_v39, %v6772_v30  ;;  %v4146_v16 = vpop.f32.mrb[5].mxu1 }
 0x2a8   : > { %v4147_v5 = vadd.f32 %v6772_v30, %v4146_v16  ;;  %v4714_v40 = vpop.f32.mrb[6].mxu1 }
 0x2a9   : > { %vm4216_vm8 = vcmp.gt.f32.partialorder %v4155_v52, 0.0  ;;  %v4249_v62 = vmul.f32 %v6776_v59, %v4155_v52  ;;  %v4158_v20 = vadd.f32 %v4714_v40, %v6772_v30  ;;  %v4149_v29 = vpop.f32.mrb[7].mxu1 }
 0x2aa   : > { %vm4214_vm10 = vcmp.gt.f32.partialorder %v4147_v5, 0.0  ;;  %v4247_v58 = vmul.f32 %v6776_v59, %v4147_v5  ;;  %v4150_v46 = vadd.f32 %v6772_v30, %v4149_v29 }
 0x2ab   : > { %v4281_v63 = vsel %vm4216_vm8, %v4155_v52, %v4249_v62  ;;  %vm4217_vm15 = vcmp.gt.f32.partialorder %v4158_v20, 0.0  ;;  %v4250_v4 = vmul.f32 %v6776_v59, %v4158_v20 }
 0x2ac   : > { %4314 = vst.msk [vmem:[%s6790_s16 + $0xb0] sm:$0xff] %vm4291_vm5, %v4281_v63  ;;  %v4279_v8 = vsel %vm4214_vm10, %v4147_v5, %v4247_v58  ;;  %vm4215_vm0 = vcmp.gt.f32.partialorder %v4150_v46, 0.0  ;;  %v4248_v9 = vmul.f32 %v6776_v59, %v4150_v46 }
 0x2ad   : > { %4312 = vst.msk [vmem:[%s6790_s16 + $0xa0] sm:$0xff] %vm4291_vm5, %v4279_v8  ;;  %v4282_v38 = vsel %vm4217_vm15, %v4158_v20, %v4250_v4 }
 0x2ae   : > { %4315 = vst.msk [vmem:[%s6790_s16 + $0xb8] sm:$0xff] %vm4291_vm5, %v4282_v38  ;;  %v4280_v18 = vsel %vm4215_vm0, %v4150_v46, %v4248_v9 }
 0x2af   : > { %4313 = vst.msk [vmem:[%s6790_s16 + $0xa8] sm:$0xff] %vm4291_vm5, %v4280_v18 }
 0x2f4   : > { %v4701_v15 = vpop.f32.mrb[8].mxu0 }
 0x2f5   : > { %v4107_v55 = vadd.f32 %v4701_v15, %v6772_v30  ;;  %v4098_v12 = vpop.f32.mrb[9].mxu0 }
 0x2f6   : > { %v4099_v48 = vadd.f32 %v6772_v30, %v4098_v12  ;;  %v4702_v60 = vpop.f32.mrb[10].mxu0 }
 0x2f7   : > { %vm4204_vm9 = vcmp.gt.f32.partialorder %v4107_v55, 0.0  ;;  %v4237_v13 = vmul.f32 %v6776_v59, %v4107_v55  ;;  %v4110_v57 = vadd.f32 %v4702_v60, %v6772_v30  ;;  %v4101_v14 = vpop.f32.mrb[11].mxu0 }
 0x2f8   : > { %vm4202_vm11 = vcmp.gt.f32.partialorder %v4099_v48, 0.0  ;;  %v4235_v6 = vmul.f32 %v6776_v59, %v4099_v48  ;;  %v4102_v2 = vadd.f32 %v6772_v30, %v4101_v14 }
 0x2f9   : > { %v4269_v33 = vsel %vm4204_vm9, %v4107_v55, %v4237_v13  ;;  %vm4205_vm12 = vcmp.gt.f32.partialorder %v4110_v57, 0.0  ;;  %v4238_v41 = vmul.f32 %v6776_v59, %v4110_v57 }
 0x2fa   : > { %4302 = vst.msk [vmem:[%s6790_s16 + $0x50] sm:$0xff] %vm4291_vm5, %v4269_v33  ;;  %v4267_v25 = vsel %vm4202_vm11, %v4099_v48, %v4235_v6  ;;  %vm4203_vm13 = vcmp.gt.f32.partialorder %v4102_v2, 0.0  ;;  %v4236_v42 = vmul.f32 %v6776_v59, %v4102_v2 }
 0x2fb   : > { %4300 = vst.msk [vmem:[%s6790_s16 + $0x40] sm:$0xff] %vm4291_vm5, %v4267_v25  ;;  %v4270_v49 = vsel %vm4205_vm12, %v4110_v57, %v4238_v41 }
 0x2fc   : > { %4303 = vst.msk [vmem:[%s6790_s16 + $0x58] sm:$0xff] %vm4291_vm5, %v4270_v49  ;;  %v4268_v50 = vsel %vm4203_vm13, %v4102_v2, %v4236_v42 }
 0x2fd   : > { %4301 = vst.msk [vmem:[%s6790_s16 + $0x48] sm:$0xff] %vm4291_vm5, %v4268_v50 }
 0x2fe   : > { %v4717_v24 = vpop.f32.mrb[8].mxu1 }
 0x2ff   : > { %v4171_v27 = vadd.f32 %v4717_v24, %v6772_v30  ;;  %v4162_v37 = vpop.f32.mrb[9].mxu1 }
 0x300   : > { %v4163_v22 = vadd.f32 %v6772_v30, %v4162_v37  ;;  %v4718_v10 = vpop.f32.mrb[10].mxu1 }
 0x301   : > { %vm4220_vm14 = vcmp.gt.f32.partialorder %v4171_v27, 0.0  ;;  %v4253_v17 = vmul.f32 %v6776_v59, %v4171_v27  ;;  %v4174_v54 = vadd.f32 %v4718_v10, %v6772_v30  ;;  %v4165_v47 = vpop.f32.mrb[11].mxu1 }
 0x302   : > { %vm4218_vm1 = vcmp.gt.f32.partialorder %v4163_v22, 0.0  ;;  %v4251_v19 = vmul.f32 %v6776_v59, %v4163_v22  ;;  %v4166_v35 = vadd.f32 %v6772_v30, %v4165_v47 }
 0x303   : > { %v4285_v34 = vsel %vm4220_vm14, %v4171_v27, %v4253_v17  ;;  %vm4221_vm2 = vcmp.gt.f32.partialorder %v4174_v54, 0.0  ;;  %v4254_v21 = vmul.f32 %v6776_v59, %v4174_v54 }
 0x304   : > { %4318 = vst.msk [vmem:[%s6790_s16 + $0xd0] sm:$0xff] %vm4291_vm5, %v4285_v34  ;;  %v4283_v61 = vsel %vm4218_vm1, %v4163_v22, %v4251_v19  ;;  %vm4219_vm3 = vcmp.gt.f32.partialorder %v4166_v35, 0.0  ;;  %v4252_v3 = vmul.f32 %v6776_v59, %v4166_v35 }
 0x305   : > { %4316 = vst.msk [vmem:[%s6790_s16 + $0xc0] sm:$0xff] %vm4291_vm5, %v4283_v61  ;;  %v4286_v31 = vsel %vm4221_vm2, %v4174_v54, %v4254_v21 }
 0x306   : > { %4319 = vst.msk [vmem:[%s6790_s16 + $0xd8] sm:$0xff] %vm4291_vm5, %v4286_v31  ;;  %v4284_v51 = vsel %vm4219_vm3, %v4166_v35, %v4252_v3 }
 0x307   : > { %4317 = vst.msk [vmem:[%s6790_s16 + $0xc8] sm:$0xff] %vm4291_vm5, %v4284_v51 }
 0x334   : > { %v4705_v23 = vpop.f32.mrb[12].mxu0 }
 0x335   : > { %v4123_v36 = vadd.f32 %v4705_v23, %v6772_v30  ;;  %v4114_v53 = vpop.f32.mrb[13].mxu0 }
 0x336   : > { %v4115_v44 = vadd.f32 %v6772_v30, %v4114_v53  ;;  %v4706_v0 = vpop.f32.mrb[14].mxu0 }
 0x337   : > { %vm4208_vm4 = vcmp.gt.f32.partialorder %v4123_v36, 0.0  ;;  %v4241_v32 = vmul.f32 %v6776_v59, %v4123_v36  ;;  %v4126_v11 = vadd.f32 %v4706_v0, %v6772_v30  ;;  %v4117_v7 = vpop.f32.mrb[15].mxu0 }
 0x338   : > { %vm4206_vm6 = vcmp.gt.f32.partialorder %v4115_v44, 0.0  ;;  %v4239_v56 = vmul.f32 %v6776_v59, %v4115_v44  ;;  %v4118_v26 = vadd.f32 %v6772_v30, %v4117_v7 }
 0x339   : > { %v4273_v1 = vsel %vm4208_vm4, %v4123_v36, %v4241_v32  ;;  %vm4209_vm7 = vcmp.gt.f32.partialorder %v4126_v11, 0.0  ;;  %v4242_v45 = vmul.f32 %v6776_v59, %v4126_v11 }
 0x33a   : > { %4306 = vst.msk [vmem:[%s6790_s16 + $0x70] sm:$0xff] %vm4291_vm5, %v4273_v1  ;;  %v4271_v28 = vsel %vm4206_vm6, %v4115_v44, %v4239_v56  ;;  %vm4207_vm8 = vcmp.gt.f32.partialorder %v4118_v26, 0.0  ;;  %v4240_v43 = vmul.f32 %v6776_v59, %v4118_v26 }
 0x33b   : > { %4304 = vst.msk [vmem:[%s6790_s16 + $0x60] sm:$0xff] %vm4291_vm5, %v4271_v28  ;;  %v4274_v39 = vsel %vm4209_vm7, %v4126_v11, %v4242_v45 }
 0x33c   : > { %4307 = vst.msk [vmem:[%s6790_s16 + $0x78] sm:$0xff] %vm4291_vm5, %v4274_v39  ;;  %v4272_v52 = vsel %vm4207_vm8, %v4118_v26, %v4240_v43 }
 0x33d   : > { %4305 = vst.msk [vmem:[%s6790_s16 + $0x68] sm:$0xff] %vm4291_vm5, %v4272_v52 }
 0x349   : > { %v4721_v16 = vpop.f32.mrb[12].mxu1 }
 0x34a   : > { %v4187_v5 = vadd.f32 %v4721_v16, %v6772_v30  ;;  %v4178_v40 = vpop.f32.mrb[13].mxu1 }
 0x34b   : > { %v4179_v62 = vadd.f32 %v6772_v30, %v4178_v40  ;;  %v4722_v20 = vpop.f32.mrb[14].mxu1 }
 0x34c   : > { %vm4224_vm10 = vcmp.gt.f32.partialorder %v4187_v5, 0.0  ;;  %v4257_v29 = vmul.f32 %v6776_v59, %v4187_v5  ;;  %v4190_v58 = vadd.f32 %v4722_v20, %v6772_v30  ;;  %v4181_v46 = vpop.f32.mrb[15].mxu1 }
 0x34d   : > { %vm4222_vm15 = vcmp.gt.f32.partialorder %v4179_v62, 0.0  ;;  %v4255_v63 = vmul.f32 %v6776_v59, %v4179_v62  ;;  %v4182_v4 = vadd.f32 %v6772_v30, %v4181_v46 }
 0x34e   : > { %v4289_v8 = vsel %vm4224_vm10, %v4187_v5, %v4257_v29  ;;  %vm4225_vm0 = vcmp.gt.f32.partialorder %v4190_v58, 0.0  ;;  %v4258_v9 = vmul.f32 %v6776_v59, %v4190_v58 }
 0x34f   : > { %4322 = vst.msk [vmem:[%s6790_s16 + $0xf0] sm:$0xff] %vm4291_vm5, %v4289_v8  ;;  %v4287_v38 = vsel %vm4222_vm15, %v4179_v62, %v4255_v63  ;;  %vm4223_vm9 = vcmp.gt.f32.partialorder %v4182_v4, 0.0  ;;  %v4256_v18 = vmul.f32 %v6776_v59, %v4182_v4 }
 0x350   : > { %4320 = vst.msk [vmem:[%s6790_s16 + $0xe0] sm:$0xff] %vm4291_vm5, %v4287_v38  ;;  %v4290_v30 = vsel %vm4225_vm0, %v4190_v58, %v4258_v9 }
 0x351   : > { %4323 = vst.msk [vmem:[%s6790_s16 + $0xf8] sm:$0xff] %vm4291_vm5, %v4290_v30  ;;  %v4288_v15 = vsel %vm4223_vm9, %v4182_v4, %v4256_v18 }
 0x352   : > { %4321 = vst.msk [vmem:[%s6790_s16 + $0xe8] sm:$0xff] %vm4291_vm5, %v4288_v15 }
 0x353   : > { %4973 = shalt.err (!%p4970_p1)
}
 0x354   : > { %s4974_s30 = scalar_lea.hbm %s6917_s9, 4096  ;;  %s4978_s7 = scalar_lea.hbm %s6974_s4, 8192 }
 0x355   : > { %p4975_p13 = scmp.ne.s32.totalorder %s6917_s9, %s4974_s30  ;;  %p4979_p4 = scmp.lt.u32.totalorder %s6917_s9, %s6974_s4 }
 0x356   : > { %p4980_p5 = scmp.lt.u32.totalorder %s4978_s7, %s4974_s30  ;;  %p4982_p11 = scmp.lt.u32.totalorder %s4974_s30, %s6917_s9 }
 0x357   : > { %p4976_p6 = pnand %p4975_p13, %p7000_p0 }
 0x358   : > { %p4981_p8 = por %p4980_p5, %p4979_p4 }
 0x359   : > { %p4977_p10 = pneg %p4976_p6 }
 0x35a   : > { %p4983_p2 = por %p4982_p11, %p4981_p8 }
 0x35c   : > { %p4984_p3 = pnand %p4983_p2, %p4977_p10 }
 0x35e   : > { %4987 = shalt.err (!%p4984_p3)
}
 0x35f   : > { %s5047_s16 = smov 128  }
 0x360   : > { %4749 = dma.vmem_to_hbm [thread:$0]  (%p7000_p0), %s6921_s28, 4096, %s6917_s9, %s4325_s27, %s5047_s16, %s5047_s16, %s5038_s22  }
 0x361 PF: > { %s4353_s25 = sand.u32 1, %s5018_s17   ;;  %p7001_p7 = scmp.ne.s32.totalorder %s6979_s23, 0 }
 0x362   : > { %p7002_p9 = scmp.ge.s32.totalorder %s5030_s20, 2  ;;  %s4354_s3 = scalar_lea.sflag [#allocation7], %s4353_s25 }
 0x364   : > { %p4763_p12 = pnand %p7002_p9, %p7001_p7 }
 0x366   : > { %5013 = dma.done.wait (!%p4763_p12), %s4354_s3, 4096  }
 0x367   : > { %5015 = vsyncadd (!%p4763_p12), %s4354_s3, 4294963200  ;;  %p19_p1 = scmp.ge.s32.totalorder %s5190_s10, 4   ;;  %s7003_s17 = smov %s5022_s18 }
 0x368   : > { %s7004_s18 = smov %s5026_s19  ;;  %s7005_s19 = smov %s5206_s15 }
 0x369   : > { %s7006_s20 = smov %s5190_s10  ;;  %21 = sbr.rel (!%p19_p1) target bundleno = 8 (0x8), region = 92 }
 0x370   :  { %4359 = vsyncpa [#allocation6], 1 }
 0x371   :  { %4361 = vsyncpa [#allocation6 + $0x1], 1 }
 0x372   :  { %4362 = vsyncpa [#allocation9], 1 }
 0x373   :  { %4363 = vsyncpa [#allocation7], 1 }
 0x374   :  { %4365 = vsyncpa [#allocation7 + $0x1], 1 }

</bundles_post_ra>
